<compile_context>
chip_gen: v6e
topology: v6e:2x2x1
jax: 0.10.0
libtpu: 0.0.40
codegen_flags: <defaults>
</compile_context>

<pallas_src>
import math
from collections import namedtuple

import jax
import jax.numpy as jnp
from jax import lax
from jax.experimental import pallas as pl
from jax.experimental.pallas import tpu as pltpu

WrappedBackboneOutput = namedtuple("WrappedBackboneOutput", ["logits", "pooler_output"])

# ----------------------------- model config --------------------------------
IMG = 16
CHANS = 3
PATCH = 4
HIDDEN = 32
HEADS = 4
HEAD_DIM = HIDDEN // HEADS
MLP_DIM = 64
LAYERS = 2
NUM_CLASSES = 10
NUM_PATCHES = (IMG // PATCH) ** 2
SEQ = NUM_PATCHES + 1                      # +1 CLS token
PATCH_DIM = CHANS * PATCH * PATCH          # 48
LN_EPS = 1e-5                              # torch.nn.LayerNorm default
SCALE = 1.0 / math.sqrt(HEAD_DIM)

# lane-dense padded sizes (last dim presented to VPU/MXU is a full 128 lanes)
DP = 128        # padded hidden (32 -> 128)
PKP = 128       # padded patch-vector dim (48 -> 128)
MLPP = 128      # padded MLP dim (64 -> 128)
NCP = 128       # padded classifier dim (10 -> 128)


# ------------------------------ fused kernel -------------------------------
def _vit_forward_kernel(
    # inputs (per grid step = one image; weights use constant index maps)
    patches_ref,                      # (SEQ, PKP)   row 0 is zeros (CLS slot)
    patch_w_ref,                      # (PKP, DP)
    clspos_ref,                       # (SEQ, DP)    cls+pos / pos+patch_b table
    ln1_g_ref, ln1_b_ref,             # (L, 1, DP)
    qkv_w_ref,                        # (L, DP, 3*DP)
    qkv_b_ref,                        # (L, 1, 3*DP)
    proj_w_ref,                       # (L, HIDDEN, DP)
    proj_b_ref,                       # (L, 1, DP)
    ln2_g_ref, ln2_b_ref,             # (L, 1, DP)
    fc1_w_ref,                        # (L, DP, MLPP)
    fc1_b_ref,                        # (L, 1, MLPP)
    fc2_w_ref,                        # (L, MLPP, DP)
    fc2_b_ref,                        # (L, 1, DP)
    lnf_g_ref, lnf_b_ref,             # (1, DP)
    cls_w_ref,                        # (DP, NCP)
    cls_b_ref,                        # (1, NCP)
    # outputs
    logits_ref,                       # (1, NCP)
    pool_ref,                         # (1, DP)
):
    f32 = jnp.float32

    # Lane mask over the real hidden dims, hoisted out of the layer loop.
    # Activation pad lanes stay exactly zero throughout (zero-padded weights,
    # biases and LN gamma/beta), so only the LN variance needs masking.
    lane = lax.broadcasted_iota(jnp.int32, (1, DP), 1)
    real_lane = lane < HIDDEN
    inv_hidden = 1.0 / HIDDEN

    def layer_norm(x, g, b):
        mu = jnp.sum(x, axis=-1, keepdims=True) * inv_hidden
        c = x - mu
        cm = jnp.where(real_lane, c, 0.0)
        var = jnp.sum(cm * cm, axis=-1, keepdims=True) * inv_hidden
        y = c * lax.rsqrt(var + LN_EPS)
        return y * g + b              # pad lanes -> 0 (gamma/beta pads are 0)

    # --- patch embedding (+ CLS / positional embedding, patch bias folded) ---
    x = jnp.dot(patches_ref[...], patch_w_ref[...],
                preferred_element_type=f32) + clspos_ref[...]        # (SEQ, DP)

    # --- transformer encoder: statically unrolled, everything VMEM-resident ---
    # TODO(synk): for a real-size backbone cast matmul operands to bf16 (keep
    # f32 accumulation), tile the matmuls and use flash-style attention.
    for l in range(LAYERS):
        # multi-head self-attention (pre-norm)
        h = layer_norm(x, ln1_g_ref[l], ln1_b_ref[l])
        qkv = jnp.dot(h, qkv_w_ref[l], preferred_element_type=f32) + qkv_b_ref[l]
        pw = proj_w_ref[l]                                           # (HIDDEN, DP)
        attn = jnp.zeros((SEQ, DP), f32)
        for hh in range(HEADS):
            lo = hh * HEAD_DIM
            hi = lo + HEAD_DIM
            qh = qkv[:, lo:hi]                # 1/sqrt(dh) folded into Q weights
            kh = qkv[:, DP + lo:DP + hi]
            vh = qkv[:, 2 * DP + lo:2 * DP + hi]
            # scores without an explicit K^T: contract the last axes directly
            s = lax.dot_general(qh, kh, (((1,), (1,)), ((), ())),
                                preferred_element_type=f32)          # (SEQ, SEQ)
            e = jnp.exp(s - jnp.max(s, axis=-1, keepdims=True))
            p = e * pl.reciprocal(jnp.sum(e, axis=-1, keepdims=True), approx=True)
            oh = jnp.dot(p, vh, preferred_element_type=f32)          # (SEQ, HEAD_DIM)
            # merge heads by accumulating each head's slice of the output proj
            attn = attn + jnp.dot(oh, pw[lo:hi, :], preferred_element_type=f32)
        x = x + attn + proj_b_ref[l]

        # MLP (pre-norm)
        h = layer_norm(x, ln2_g_ref[l], ln2_b_ref[l])
        m = jnp.dot(h, fc1_w_ref[l], preferred_element_type=f32) + fc1_b_ref[l]
        # TODO(synk): PyTorch nn.GELU default is exact erf; tanh approximation used.
        m = jax.nn.gelu(m, approximate=True)
        x = x + jnp.dot(m, fc2_w_ref[l], preferred_element_type=f32) + fc2_b_ref[l]

    # --- heads: logits from post-final-LN CLS; pooler = pre-LN CLS token
    #     (hidden_states[-1][:, 0], HF convention) ---
    hf = layer_norm(x, lnf_g_ref[...], lnf_b_ref[...])
    logits_ref[...] = (jnp.dot(hf[0:1, :], cls_w_ref[...],
                               preferred_element_type=f32) + cls_b_ref[...]
                       ).astype(logits_ref.dtype)
    pool_ref[...] = x[0:1, :].astype(pool_ref.dtype)


# ----------------------------- parameters ----------------------------------
def init_params(key):
    def normal(k, shape, scale=0.02):
        return scale * jax.random.normal(k, shape, jnp.float32)

    keys = jax.random.split(key, 4 + 4 * LAYERS)
    ki = iter(keys)
    params = {
        "patch_w": normal(next(ki), (PATCH_DIM, HIDDEN)),
        "patch_b": jnp.zeros((HIDDEN,), jnp.float32),
        "cls": normal(next(ki), (1, 1, HIDDEN)),
        "pos": normal(next(ki), (1, SEQ, HIDDEN)),
        "lnf_g": jnp.ones((HIDDEN,), jnp.float32),
        "lnf_b": jnp.zeros((HIDDEN,), jnp.float32),
        "cls_w": normal(next(ki), (HIDDEN, NUM_CLASSES)),
        "cls_b": jnp.zeros((NUM_CLASSES,), jnp.float32),
        "layers": [],
    }
    for _ in range(LAYERS):
        params["layers"].append({
            "ln1_g": jnp.ones((HIDDEN,), jnp.float32),
            "ln1_b": jnp.zeros((HIDDEN,), jnp.float32),
            "qkv_w": normal(next(ki), (HIDDEN, 3 * HIDDEN)),
            "qkv_b": jnp.zeros((3 * HIDDEN,), jnp.float32),
            "proj_w": normal(next(ki), (HIDDEN, HIDDEN)),
            "proj_b": jnp.zeros((HIDDEN,), jnp.float32),
            "ln2_g": jnp.ones((HIDDEN,), jnp.float32),
            "ln2_b": jnp.zeros((HIDDEN,), jnp.float32),
            "fc1_w": normal(next(ki), (HIDDEN, MLP_DIM)),
            "fc1_b": jnp.zeros((MLP_DIM,), jnp.float32),
            "fc2_w": normal(next(ki), (MLP_DIM, HIDDEN)),
            "fc2_b": jnp.zeros((HIDDEN,), jnp.float32),
        })
    return params


def pad_and_pack_params(params):
    """Pad all weights to 128-lane-dense slabs, stack per-layer weights, and
    return a flat list in the kernel's argument order (one-time prep)."""
    f32 = jnp.float32

    def pad2(a, r, c):
        return jnp.zeros((r, c), f32).at[: a.shape[0], : a.shape[1]].set(a)

    def pad3(a, r, c):
        return jnp.zeros((a.shape[0], r, c), f32).at[:, : a.shape[1], : a.shape[2]].set(a)

    def stack(name):
        return jnp.stack([lyr[name] for lyr in params["layers"]])

    L = LAYERS

    # patch embedding (patch bias is folded into the cls/pos additive table)
    patch_w = pad2(params["patch_w"], PKP, DP)
    clspos = jnp.zeros((SEQ, DP), f32)
    clspos = clspos.at[0, :HIDDEN].set(params["cls"][0, 0] + params["pos"][0, 0])
    clspos = clspos.at[1:, :HIDDEN].set(params["pos"][0, 1:] + params["patch_b"][None, :])

    ln1_g = pad3(stack("ln1_g")[:, None, :], 1, DP)
    ln1_b = pad3(stack("ln1_b")[:, None, :], 1, DP)
    ln2_g = pad3(stack("ln2_g")[:, None, :], 1, DP)
    ln2_b = pad3(stack("ln2_b")[:, None, :], 1, DP)

    # QKV: each of Q/K/V is padded to a full 128-lane group (so the kernel
    # slices at vreg-aligned offsets 0/128/256); attention scale folded into Q.
    qkv_w = stack("qkv_w")                               # (L, 32, 96)
    qkv_b = stack("qkv_b")                               # (L, 96)
    qkv_w_p = jnp.zeros((L, DP, 3 * DP), f32)
    qkv_b_p = jnp.zeros((L, 1, 3 * DP), f32)
    for c in range(3):
        scl = SCALE if c == 0 else 1.0
        qkv_w_p = qkv_w_p.at[:, :HIDDEN, c * DP:c * DP + HIDDEN].set(
            scl * qkv_w[:, :, c * HIDDEN:(c + 1) * HIDDEN])
        qkv_b_p = qkv_b_p.at[:, 0, c * DP:c * DP + HIDDEN].set(
            scl * qkv_b[:, c * HIDDEN:(c + 1) * HIDDEN])

    proj_w = pad3(stack("proj_w"), HIDDEN, DP)           # K dim stays 32 (real)
    proj_b = pad3(stack("proj_b")[:, None, :], 1, DP)
    fc1_w = pad3(stack("fc1_w"), DP, MLPP)
    fc1_b = pad3(stack("fc1_b")[:, None, :], 1, MLPP)
    fc2_w = pad3(stack("fc2_w"), MLPP, DP)
    fc2_b = pad3(stack("fc2_b")[:, None, :], 1, DP)

    lnf_g = pad2(params["lnf_g"][None, :], 1, DP)
    lnf_b = pad2(params["lnf_b"][None, :], 1, DP)
    cls_w = pad2(params["cls_w"], DP, NCP)
    cls_b = pad2(params["cls_b"][None, :], 1, NCP)

    return [patch_w, clspos,
            ln1_g, ln1_b, qkv_w_p, qkv_b_p, proj_w, proj_b,
            ln2_g, ln2_b, fc1_w, fc1_b, fc2_w, fc2_b,
            lnf_g, lnf_b, cls_w, cls_b]


# ------------------------------- forward ------------------------------------
def patchify_pad(images):
    """NCHW -> (B, SEQ, PKP): conv(stride=P) expressed as a patch matmul input.
    Row 0 is zeros (CLS slot); patch-vector dim zero-padded to 128 lanes."""
    B, C, H, W = images.shape
    P = PATCH
    x = images.reshape(B, C, H // P, P, W // P, P)
    x = x.transpose(0, 2, 4, 1, 3, 5).reshape(B, NUM_PATCHES, C * P * P)
    return jnp.pad(x, ((0, 0), (1, 0), (0, PKP - C * P * P)))


def wrapped_backbone_forward(flat_params, inputs):
    """Equivalent of WrappedBackboneModel.forward — one fused pallas_call."""
    B = inputs.shape[0]
    patches = patchify_pad(inputs)

    def const_spec(arr):
        n = arr.ndim
        return pl.BlockSpec(arr.shape, lambda b, _n=n: (0,) * _n)

    logits_p, pool_p = pl.pallas_call(
        _vit_forward_kernel,
        grid=(B,),
        in_specs=[pl.BlockSpec((None, SEQ, PKP), lambda b: (b, 0, 0))]
        + [const_spec(w) for w in flat_params],
        out_specs=(
            pl.BlockSpec((None, 1, NCP), lambda b: (b, 0, 0)),
            pl.BlockSpec((None, 1, DP), lambda b: (b, 0, 0)),
        ),
        out_shape=(
            jax.ShapeDtypeStruct((B, 1, NCP), jnp.float32),
            jax.ShapeDtypeStruct((B, 1, DP), jnp.float32),
        ),
        compiler_params=pltpu.CompilerParams(
            dimension_semantics=("parallel",),   # 2nd TensorCore on v7x megacore
        ),
    )(patches, *flat_params)

    logits = logits_p[:, 0, :NUM_CLASSES]
    pooler = pool_p[:, 0, :HIDDEN]
    return WrappedBackboneOutput(logits=logits, pooler_output=pooler)


# --------------------------------- main --------------------------------------
if __name__ == "__main__":
    key = jax.random.PRNGKey(0)
    kp, kx = jax.random.split(key)
    params = init_params(kp)
    flat_params = pad_and_pack_params(params)   # one-time padding / stacking
    x = jax.random.normal(kx, (2, CHANS, IMG, IMG), jnp.float32)

    fwd = jax.jit(wrapped_backbone_forward)
    out = fwd(flat_params, x)
    jax.block_until_ready(out)

    assert out.logits.shape == (2, NUM_CLASSES)
    assert out.pooler_output.shape == (2, HIDDEN)
    assert bool(jnp.all(jnp.isfinite(out.logits)))
    assert bool(jnp.all(jnp.isfinite(out.pooler_output)))
    print("KERNEL_OK")
</pallas_src>

<mosaic_0001>
module attributes {stable_mosaic.version = 11 : i64} {
  func.func @_vit_forward_kernel(%arg0: i32, %arg1: memref<1x17x128xf32, #tpu.memory_space<vmem>>, %arg2: memref<128x128xf32, #tpu.memory_space<vmem>>, %arg3: memref<17x128xf32, #tpu.memory_space<vmem>>, %arg4: memref<2x1x128xf32, #tpu.memory_space<vmem>>, %arg5: memref<2x1x128xf32, #tpu.memory_space<vmem>>, %arg6: memref<2x128x384xf32, #tpu.memory_space<vmem>>, %arg7: memref<2x1x384xf32, #tpu.memory_space<vmem>>, %arg8: memref<2x32x128xf32, #tpu.memory_space<vmem>>, %arg9: memref<2x1x128xf32, #tpu.memory_space<vmem>>, %arg10: memref<2x1x128xf32, #tpu.memory_space<vmem>>, %arg11: memref<2x1x128xf32, #tpu.memory_space<vmem>>, %arg12: memref<2x128x128xf32, #tpu.memory_space<vmem>>, %arg13: memref<2x1x128xf32, #tpu.memory_space<vmem>>, %arg14: memref<2x128x128xf32, #tpu.memory_space<vmem>>, %arg15: memref<2x1x128xf32, #tpu.memory_space<vmem>>, %arg16: memref<1x128xf32, #tpu.memory_space<vmem>>, %arg17: memref<1x128xf32, #tpu.memory_space<vmem>>, %arg18: memref<128x128xf32, #tpu.memory_space<vmem>>, %arg19: memref<1x128xf32, #tpu.memory_space<vmem>>, %arg20: memref<1x1x128xf32, #tpu.memory_space<vmem>>, %arg21: memref<1x1x128xf32, #tpu.memory_space<vmem>>) attributes {dimension_semantics = [#tpu.dimension_semantics<parallel>], iteration_bounds = array<i64: 2>, scalar_prefetch = 0 : i64, scratch_operands = 0 : i64, tpu.core_type = #tpu.core_type<tc>, window_params = [{transform_indices = @transform_0, window_bounds = array<i64: 1, 17, 128>}, {pipeline_mode = #tpu.pipeline_mode<synchronous>, transform_indices = @transform_1, window_bounds = array<i64: 128, 128>}, {pipeline_mode = #tpu.pipeline_mode<synchronous>, transform_indices = @transform_2, window_bounds = array<i64: 17, 128>}, {pipeline_mode = #tpu.pipeline_mode<synchronous>, transform_indices = @transform_3, window_bounds = array<i64: 2, 1, 128>}, {pipeline_mode = #tpu.pipeline_mode<synchronous>, transform_indices = @transform_4, window_bounds = array<i64: 2, 1, 128>}, {pipeline_mode = #tpu.pipeline_mode<synchronous>, transform_indices = @transform_5, window_bounds = array<i64: 2, 128, 384>}, {pipeline_mode = #tpu.pipeline_mode<synchronous>, transform_indices = @transform_6, window_bounds = array<i64: 2, 1, 384>}, {pipeline_mode = #tpu.pipeline_mode<synchronous>, transform_indices = @transform_7, window_bounds = array<i64: 2, 32, 128>}, {pipeline_mode = #tpu.pipeline_mode<synchronous>, transform_indices = @transform_8, window_bounds = array<i64: 2, 1, 128>}, {pipeline_mode = #tpu.pipeline_mode<synchronous>, transform_indices = @transform_9, window_bounds = array<i64: 2, 1, 128>}, {pipeline_mode = #tpu.pipeline_mode<synchronous>, transform_indices = @transform_10, window_bounds = array<i64: 2, 1, 128>}, {pipeline_mode = #tpu.pipeline_mode<synchronous>, transform_indices = @transform_11, window_bounds = array<i64: 2, 128, 128>}, {pipeline_mode = #tpu.pipeline_mode<synchronous>, transform_indices = @transform_12, window_bounds = array<i64: 2, 1, 128>}, {pipeline_mode = #tpu.pipeline_mode<synchronous>, transform_indices = @transform_13, window_bounds = array<i64: 2, 128, 128>}, {pipeline_mode = #tpu.pipeline_mode<synchronous>, transform_indices = @transform_14, window_bounds = array<i64: 2, 1, 128>}, {pipeline_mode = #tpu.pipeline_mode<synchronous>, transform_indices = @transform_15, window_bounds = array<i64: 1, 128>}, {pipeline_mode = #tpu.pipeline_mode<synchronous>, transform_indices = @transform_16, window_bounds = array<i64: 1, 128>}, {pipeline_mode = #tpu.pipeline_mode<synchronous>, transform_indices = @transform_17, window_bounds = array<i64: 128, 128>}, {pipeline_mode = #tpu.pipeline_mode<synchronous>, transform_indices = @transform_18, window_bounds = array<i64: 1, 128>}, {transform_indices = @transform_19, window_bounds = array<i64: 1, 1, 128>}, {transform_indices = @transform_20, window_bounds = array<i64: 1, 1, 128>}]} {
    %0 = tpu.iota {dimensions = array<i32: 1>} : vector<1x128xi32>
    %c32_i32 = arith.constant 32 : i32
    %1 = vector.broadcast %c32_i32 : i32 to vector<1x128xi32>
    %2 = arith.cmpi slt, %0, %1 : vector<1x128xi32>
    %c0 = arith.constant 0 : index
    %c0_0 = arith.constant 0 : index
    %c0_1 = arith.constant 0 : index
    %3 = vector.load %arg1[%c0, %c0_0, %c0_1] : memref<1x17x128xf32, #tpu.memory_space<vmem>>, vector<1x17x128xf32>
    %4 = vector.shape_cast %3 : vector<1x17x128xf32> to vector<17x128xf32>
    %c0_2 = arith.constant 0 : index
    %c0_3 = arith.constant 0 : index
    %5 = vector.load %arg2[%c0_2, %c0_3] : memref<128x128xf32, #tpu.memory_space<vmem>>, vector<128x128xf32>
    %cst = arith.constant dense<0.000000e+00> : vector<17x128xf32>
    %6 = tpu.matmul %4, %5, %cst {dimension_numbers = #tpu.dot_dimension_numbers<[1], [0], [0], [1], [0, 0, 1, 1], [], []>} : vector<17x128xf32>, vector<128x128xf32>, vector<17x128xf32> -> vector<17x128xf32>
    %c0_4 = arith.constant 0 : index
    %c0_5 = arith.constant 0 : index
    %7 = vector.load %arg3[%c0_4, %c0_5] : memref<17x128xf32, #tpu.memory_space<vmem>>, vector<17x128xf32>
    %8 = arith.addf %6, %7 : vector<17x128xf32>
    %c0_6 = arith.constant 0 : index
    %c0_7 = arith.constant 0 : index
    %c0_8 = arith.constant 0 : index
    %9 = vector.load %arg4[%c0_6, %c0_7, %c0_8] : memref<2x1x128xf32, #tpu.memory_space<vmem>>, vector<1x1x128xf32>
    %10 = vector.shape_cast %9 : vector<1x1x128xf32> to vector<1x128xf32>
    %c0_9 = arith.constant 0 : index
    %c0_10 = arith.constant 0 : index
    %c0_11 = arith.constant 0 : index
    %11 = vector.load %arg5[%c0_9, %c0_10, %c0_11] : memref<2x1x128xf32, #tpu.memory_space<vmem>>, vector<1x1x128xf32>
    %12 = vector.shape_cast %11 : vector<1x1x128xf32> to vector<1x128xf32>
    %cst_12 = arith.constant dense<0.000000e+00> : vector<17xf32>
    %13 = vector.multi_reduction <add>, %8, %cst_12 [1] : vector<17x128xf32> to vector<17xf32>
    %14 = vector.shape_cast %13 : vector<17xf32> to vector<17x1xf32>
    %cst_13 = arith.constant 3.125000e-02 : f32
    %15 = vector.broadcast %cst_13 : f32 to vector<17x1xf32>
    %16 = arith.mulf %14, %15 : vector<17x1xf32>
    %17 = vector.broadcast %16 : vector<17x1xf32> to vector<17x128xf32>
    %18 = arith.subf %8, %17 : vector<17x128xf32>
    %cst_14 = arith.constant 0.000000e+00 : f32
    %19 = vector.shape_cast %2 : vector<1x128xi1> to vector<1x128xi1>
    %20 = vector.broadcast %19 : vector<1x128xi1> to vector<17x128xi1>
    %21 = vector.broadcast %cst_14 : f32 to vector<17x128xf32>
    %22 = arith.select %20, %18, %21 : vector<17x128xi1>, vector<17x128xf32>
    %23 = arith.mulf %22, %22 : vector<17x128xf32>
    %cst_15 = arith.constant dense<0.000000e+00> : vector<17xf32>
    %24 = vector.multi_reduction <add>, %23, %cst_15 [1] : vector<17x128xf32> to vector<17xf32>
    %25 = vector.shape_cast %24 : vector<17xf32> to vector<17x1xf32>
    %cst_16 = arith.constant 3.125000e-02 : f32
    %26 = vector.broadcast %cst_16 : f32 to vector<17x1xf32>
    %27 = arith.mulf %25, %26 : vector<17x1xf32>
    %cst_17 = arith.constant 9.99999974E-6 : f32
    %28 = vector.broadcast %cst_17 : f32 to vector<17x1xf32>
    %29 = arith.addf %27, %28 : vector<17x1xf32>
    %30 = math.rsqrt %29 : vector<17x1xf32>
    %31 = vector.broadcast %30 : vector<17x1xf32> to vector<17x128xf32>
    %32 = arith.mulf %18, %31 : vector<17x128xf32>
    %33 = vector.broadcast %10 : vector<1x128xf32> to vector<17x128xf32>
    %34 = arith.mulf %32, %33 : vector<17x128xf32>
    %35 = vector.broadcast %12 : vector<1x128xf32> to vector<17x128xf32>
    %36 = arith.addf %34, %35 : vector<17x128xf32>
    %c0_18 = arith.constant 0 : index
    %c0_19 = arith.constant 0 : index
    %c0_20 = arith.constant 0 : index
    %37 = vector.load %arg6[%c0_18, %c0_19, %c0_20] : memref<2x128x384xf32, #tpu.memory_space<vmem>>, vector<1x128x384xf32>
    %38 = vector.shape_cast %37 : vector<1x128x384xf32> to vector<128x384xf32>
    %cst_21 = arith.constant dense<0.000000e+00> : vector<17x384xf32>
    %39 = tpu.matmul %36, %38, %cst_21 {dimension_numbers = #tpu.dot_dimension_numbers<[1], [0], [0], [1], [0, 0, 1, 1], [], []>} : vector<17x128xf32>, vector<128x384xf32>, vector<17x384xf32> -> vector<17x384xf32>
    %c0_22 = arith.constant 0 : index
    %c0_23 = arith.constant 0 : index
    %c0_24 = arith.constant 0 : index
    %40 = vector.load %arg7[%c0_22, %c0_23, %c0_24] : memref<2x1x384xf32, #tpu.memory_space<vmem>>, vector<1x1x384xf32>
    %41 = vector.shape_cast %40 : vector<1x1x384xf32> to vector<1x384xf32>
    %42 = vector.broadcast %41 : vector<1x384xf32> to vector<17x384xf32>
    %43 = arith.addf %39, %42 : vector<17x384xf32>
    %c0_25 = arith.constant 0 : index
    %c0_26 = arith.constant 0 : index
    %c0_27 = arith.constant 0 : index
    %44 = vector.load %arg8[%c0_25, %c0_26, %c0_27] : memref<2x32x128xf32, #tpu.memory_space<vmem>>, vector<1x32x128xf32>
    %45 = vector.shape_cast %44 : vector<1x32x128xf32> to vector<32x128xf32>
    %cst_28 = arith.constant 0.000000e+00 : f32
    %46 = vector.broadcast %cst_28 : f32 to vector<17x128xf32>
    %47 = vector.extract_strided_slice %43 {offsets = [0, 0], sizes = [17, 8], strides = [1, 1]} : vector<17x384xf32> to vector<17x8xf32>
    %48 = vector.extract_strided_slice %43 {offsets = [0, 128], sizes = [17, 8], strides = [1, 1]} : vector<17x384xf32> to vector<17x8xf32>
    %49 = vector.extract_strided_slice %43 {offsets = [0, 256], sizes = [17, 8], strides = [1, 1]} : vector<17x384xf32> to vector<17x8xf32>
    %cst_29 = arith.constant dense<0.000000e+00> : vector<17x17xf32>
    %50 = tpu.matmul %47, %48, %cst_29 {dimension_numbers = #tpu.dot_dimension_numbers<[1], [1], [0], [0], [0, 0, 1, 0], [], []>} : vector<17x8xf32>, vector<17x8xf32>, vector<17x17xf32> -> vector<17x17xf32>
    %cst_30 = arith.constant dense<0xFF800000> : vector<17xf32>
    %51 = vector.multi_reduction <maximumf>, %50, %cst_30 [1] : vector<17x17xf32> to vector<17xf32>
    %52 = vector.shape_cast %51 : vector<17xf32> to vector<17x1xf32>
    %53 = vector.broadcast %52 : vector<17x1xf32> to vector<17x17xf32>
    %54 = arith.subf %50, %53 : vector<17x17xf32>
    %55 = math.exp %54 : vector<17x17xf32>
    %cst_31 = arith.constant dense<0.000000e+00> : vector<17xf32>
    %56 = vector.multi_reduction <add>, %55, %cst_31 [1] : vector<17x17xf32> to vector<17xf32>
    %57 = vector.shape_cast %56 : vector<17xf32> to vector<17x1xf32>
    %58 = tpu.reciprocal %57 {approx = true} : vector<17x1xf32> -> vector<17x1xf32>
    %59 = vector.broadcast %58 : vector<17x1xf32> to vector<17x17xf32>
    %60 = arith.mulf %55, %59 : vector<17x17xf32>
    %cst_32 = arith.constant dense<0.000000e+00> : vector<17x8xf32>
    %61 = tpu.matmul %60, %49, %cst_32 {dimension_numbers = #tpu.dot_dimension_numbers<[1], [0], [0], [1], [0, 0, 1, 1], [], []>} : vector<17x17xf32>, vector<17x8xf32>, vector<17x8xf32> -> vector<17x8xf32>
    %62 = vector.extract_strided_slice %45 {offsets = [0, 0], sizes = [8, 128], strides = [1, 1]} : vector<32x128xf32> to vector<8x128xf32>
    %cst_33 = arith.constant dense<0.000000e+00> : vector<17x128xf32>
    %63 = tpu.matmul %61, %62, %cst_33 {dimension_numbers = #tpu.dot_dimension_numbers<[1], [0], [0], [1], [0, 0, 1, 1], [], []>} : vector<17x8xf32>, vector<8x128xf32>, vector<17x128xf32> -> vector<17x128xf32>
    %64 = arith.addf %46, %63 : vector<17x128xf32>
    %65 = vector.extract_strided_slice %43 {offsets = [0, 8], sizes = [17, 8], strides = [1, 1]} : vector<17x384xf32> to vector<17x8xf32>
    %66 = vector.extract_strided_slice %43 {offsets = [0, 136], sizes = [17, 8], strides = [1, 1]} : vector<17x384xf32> to vector<17x8xf32>
    %67 = vector.extract_strided_slice %43 {offsets = [0, 264], sizes = [17, 8], strides = [1, 1]} : vector<17x384xf32> to vector<17x8xf32>
    %cst_34 = arith.constant dense<0.000000e+00> : vector<17x17xf32>
    %68 = tpu.matmul %65, %66, %cst_34 {dimension_numbers = #tpu.dot_dimension_numbers<[1], [1], [0], [0], [0, 0, 1, 0], [], []>} : vector<17x8xf32>, vector<17x8xf32>, vector<17x17xf32> -> vector<17x17xf32>
    %cst_35 = arith.constant dense<0xFF800000> : vector<17xf32>
    %69 = vector.multi_reduction <maximumf>, %68, %cst_35 [1] : vector<17x17xf32> to vector<17xf32>
    %70 = vector.shape_cast %69 : vector<17xf32> to vector<17x1xf32>
    %71 = vector.broadcast %70 : vector<17x1xf32> to vector<17x17xf32>
    %72 = arith.subf %68, %71 : vector<17x17xf32>
    %73 = math.exp %72 : vector<17x17xf32>
    %cst_36 = arith.constant dense<0.000000e+00> : vector<17xf32>
    %74 = vector.multi_reduction <add>, %73, %cst_36 [1] : vector<17x17xf32> to vector<17xf32>
    %75 = vector.shape_cast %74 : vector<17xf32> to vector<17x1xf32>
    %76 = tpu.reciprocal %75 {approx = true} : vector<17x1xf32> -> vector<17x1xf32>
    %77 = vector.broadcast %76 : vector<17x1xf32> to vector<17x17xf32>
    %78 = arith.mulf %73, %77 : vector<17x17xf32>
    %cst_37 = arith.constant dense<0.000000e+00> : vector<17x8xf32>
    %79 = tpu.matmul %78, %67, %cst_37 {dimension_numbers = #tpu.dot_dimension_numbers<[1], [0], [0], [1], [0, 0, 1, 1], [], []>} : vector<17x17xf32>, vector<17x8xf32>, vector<17x8xf32> -> vector<17x8xf32>
    %80 = vector.extract_strided_slice %45 {offsets = [8, 0], sizes = [8, 128], strides = [1, 1]} : vector<32x128xf32> to vector<8x128xf32>
    %cst_38 = arith.constant dense<0.000000e+00> : vector<17x128xf32>
    %81 = tpu.matmul %79, %80, %cst_38 {dimension_numbers = #tpu.dot_dimension_numbers<[1], [0], [0], [1], [0, 0, 1, 1], [], []>} : vector<17x8xf32>, vector<8x128xf32>, vector<17x128xf32> -> vector<17x128xf32>
    %82 = arith.addf %64, %81 : vector<17x128xf32>
    %83 = vector.extract_strided_slice %43 {offsets = [0, 16], sizes = [17, 8], strides = [1, 1]} : vector<17x384xf32> to vector<17x8xf32>
    %84 = vector.extract_strided_slice %43 {offsets = [0, 144], sizes = [17, 8], strides = [1, 1]} : vector<17x384xf32> to vector<17x8xf32>
    %85 = vector.extract_strided_slice %43 {offsets = [0, 272], sizes = [17, 8], strides = [1, 1]} : vector<17x384xf32> to vector<17x8xf32>
    %cst_39 = arith.constant dense<0.000000e+00> : vector<17x17xf32>
    %86 = tpu.matmul %83, %84, %cst_39 {dimension_numbers = #tpu.dot_dimension_numbers<[1], [1], [0], [0], [0, 0, 1, 0], [], []>} : vector<17x8xf32>, vector<17x8xf32>, vector<17x17xf32> -> vector<17x17xf32>
    %cst_40 = arith.constant dense<0xFF800000> : vector<17xf32>
    %87 = vector.multi_reduction <maximumf>, %86, %cst_40 [1] : vector<17x17xf32> to vector<17xf32>
    %88 = vector.shape_cast %87 : vector<17xf32> to vector<17x1xf32>
    %89 = vector.broadcast %88 : vector<17x1xf32> to vector<17x17xf32>
    %90 = arith.subf %86, %89 : vector<17x17xf32>
    %91 = math.exp %90 : vector<17x17xf32>
    %cst_41 = arith.constant dense<0.000000e+00> : vector<17xf32>
    %92 = vector.multi_reduction <add>, %91, %cst_41 [1] : vector<17x17xf32> to vector<17xf32>
    %93 = vector.shape_cast %92 : vector<17xf32> to vector<17x1xf32>
    %94 = tpu.reciprocal %93 {approx = true} : vector<17x1xf32> -> vector<17x1xf32>
    %95 = vector.broadcast %94 : vector<17x1xf32> to vector<17x17xf32>
    %96 = arith.mulf %91, %95 : vector<17x17xf32>
    %cst_42 = arith.constant dense<0.000000e+00> : vector<17x8xf32>
    %97 = tpu.matmul %96, %85, %cst_42 {dimension_numbers = #tpu.dot_dimension_numbers<[1], [0], [0], [1], [0, 0, 1, 1], [], []>} : vector<17x17xf32>, vector<17x8xf32>, vector<17x8xf32> -> vector<17x8xf32>
    %98 = vector.extract_strided_slice %45 {offsets = [16, 0], sizes = [8, 128], strides = [1, 1]} : vector<32x128xf32> to vector<8x128xf32>
    %cst_43 = arith.constant dense<0.000000e+00> : vector<17x128xf32>
    %99 = tpu.matmul %97, %98, %cst_43 {dimension_numbers = #tpu.dot_dimension_numbers<[1], [0], [0], [1], [0, 0, 1, 1], [], []>} : vector<17x8xf32>, vector<8x128xf32>, vector<17x128xf32> -> vector<17x128xf32>
    %100 = arith.addf %82, %99 : vector<17x128xf32>
    %101 = vector.extract_strided_slice %43 {offsets = [0, 24], sizes = [17, 8], strides = [1, 1]} : vector<17x384xf32> to vector<17x8xf32>
    %102 = vector.extract_strided_slice %43 {offsets = [0, 152], sizes = [17, 8], strides = [1, 1]} : vector<17x384xf32> to vector<17x8xf32>
    %103 = vector.extract_strided_slice %43 {offsets = [0, 280], sizes = [17, 8], strides = [1, 1]} : vector<17x384xf32> to vector<17x8xf32>
    %cst_44 = arith.constant dense<0.000000e+00> : vector<17x17xf32>
    %104 = tpu.matmul %101, %102, %cst_44 {dimension_numbers = #tpu.dot_dimension_numbers<[1], [1], [0], [0], [0, 0, 1, 0], [], []>} : vector<17x8xf32>, vector<17x8xf32>, vector<17x17xf32> -> vector<17x17xf32>
    %cst_45 = arith.constant dense<0xFF800000> : vector<17xf32>
    %105 = vector.multi_reduction <maximumf>, %104, %cst_45 [1] : vector<17x17xf32> to vector<17xf32>
    %106 = vector.shape_cast %105 : vector<17xf32> to vector<17x1xf32>
    %107 = vector.broadcast %106 : vector<17x1xf32> to vector<17x17xf32>
    %108 = arith.subf %104, %107 : vector<17x17xf32>
    %109 = math.exp %108 : vector<17x17xf32>
    %cst_46 = arith.constant dense<0.000000e+00> : vector<17xf32>
    %110 = vector.multi_reduction <add>, %109, %cst_46 [1] : vector<17x17xf32> to vector<17xf32>
    %111 = vector.shape_cast %110 : vector<17xf32> to vector<17x1xf32>
    %112 = tpu.reciprocal %111 {approx = true} : vector<17x1xf32> -> vector<17x1xf32>
    %113 = vector.broadcast %112 : vector<17x1xf32> to vector<17x17xf32>
    %114 = arith.mulf %109, %113 : vector<17x17xf32>
    %cst_47 = arith.constant dense<0.000000e+00> : vector<17x8xf32>
    %115 = tpu.matmul %114, %103, %cst_47 {dimension_numbers = #tpu.dot_dimension_numbers<[1], [0], [0], [1], [0, 0, 1, 1], [], []>} : vector<17x17xf32>, vector<17x8xf32>, vector<17x8xf32> -> vector<17x8xf32>
    %116 = vector.extract_strided_slice %45 {offsets = [24, 0], sizes = [8, 128], strides = [1, 1]} : vector<32x128xf32> to vector<8x128xf32>
    %cst_48 = arith.constant dense<0.000000e+00> : vector<17x128xf32>
    %117 = tpu.matmul %115, %116, %cst_48 {dimension_numbers = #tpu.dot_dimension_numbers<[1], [0], [0], [1], [0, 0, 1, 1], [], []>} : vector<17x8xf32>, vector<8x128xf32>, vector<17x128xf32> -> vector<17x128xf32>
    %118 = arith.addf %100, %117 : vector<17x128xf32>
    %119 = arith.addf %8, %118 : vector<17x128xf32>
    %c0_49 = arith.constant 0 : index
    %c0_50 = arith.constant 0 : index
    %c0_51 = arith.constant 0 : index
    %120 = vector.load %arg9[%c0_49, %c0_50, %c0_51] : memref<2x1x128xf32, #tpu.memory_space<vmem>>, vector<1x1x128xf32>
    %121 = vector.shape_cast %120 : vector<1x1x128xf32> to vector<1x128xf32>
    %122 = vector.broadcast %121 : vector<1x128xf32> to vector<17x128xf32>
    %123 = arith.addf %119, %122 : vector<17x128xf32>
    %c0_52 = arith.constant 0 : index
    %c0_53 = arith.constant 0 : index
    %c0_54 = arith.constant 0 : index
    %124 = vector.load %arg10[%c0_52, %c0_53, %c0_54] : memref<2x1x128xf32, #tpu.memory_space<vmem>>, vector<1x1x128xf32>
    %125 = vector.shape_cast %124 : vector<1x1x128xf32> to vector<1x128xf32>
    %c0_55 = arith.constant 0 : index
    %c0_56 = arith.constant 0 : index
    %c0_57 = arith.constant 0 : index
    %126 = vector.load %arg11[%c0_55, %c0_56, %c0_57] : memref<2x1x128xf32, #tpu.memory_space<vmem>>, vector<1x1x128xf32>
    %127 = vector.shape_cast %126 : vector<1x1x128xf32> to vector<1x128xf32>
    %cst_58 = arith.constant dense<0.000000e+00> : vector<17xf32>
    %128 = vector.multi_reduction <add>, %123, %cst_58 [1] : vector<17x128xf32> to vector<17xf32>
    %129 = vector.shape_cast %128 : vector<17xf32> to vector<17x1xf32>
    %cst_59 = arith.constant 3.125000e-02 : f32
    %130 = vector.broadcast %cst_59 : f32 to vector<17x1xf32>
    %131 = arith.mulf %129, %130 : vector<17x1xf32>
    %132 = vector.broadcast %131 : vector<17x1xf32> to vector<17x128xf32>
    %133 = arith.subf %123, %132 : vector<17x128xf32>
    %cst_60 = arith.constant 0.000000e+00 : f32
    %134 = vector.shape_cast %2 : vector<1x128xi1> to vector<1x128xi1>
    %135 = vector.broadcast %134 : vector<1x128xi1> to vector<17x128xi1>
    %136 = vector.broadcast %cst_60 : f32 to vector<17x128xf32>
    %137 = arith.select %135, %133, %136 : vector<17x128xi1>, vector<17x128xf32>
    %138 = arith.mulf %137, %137 : vector<17x128xf32>
    %cst_61 = arith.constant dense<0.000000e+00> : vector<17xf32>
    %139 = vector.multi_reduction <add>, %138, %cst_61 [1] : vector<17x128xf32> to vector<17xf32>
    %140 = vector.shape_cast %139 : vector<17xf32> to vector<17x1xf32>
    %cst_62 = arith.constant 3.125000e-02 : f32
    %141 = vector.broadcast %cst_62 : f32 to vector<17x1xf32>
    %142 = arith.mulf %140, %141 : vector<17x1xf32>
    %cst_63 = arith.constant 9.99999974E-6 : f32
    %143 = vector.broadcast %cst_63 : f32 to vector<17x1xf32>
    %144 = arith.addf %142, %143 : vector<17x1xf32>
    %145 = math.rsqrt %144 : vector<17x1xf32>
    %146 = vector.broadcast %145 : vector<17x1xf32> to vector<17x128xf32>
    %147 = arith.mulf %133, %146 : vector<17x128xf32>
    %148 = vector.broadcast %125 : vector<1x128xf32> to vector<17x128xf32>
    %149 = arith.mulf %147, %148 : vector<17x128xf32>
    %150 = vector.broadcast %127 : vector<1x128xf32> to vector<17x128xf32>
    %151 = arith.addf %149, %150 : vector<17x128xf32>
    %c0_64 = arith.constant 0 : index
    %c0_65 = arith.constant 0 : index
    %c0_66 = arith.constant 0 : index
    %152 = vector.load %arg12[%c0_64, %c0_65, %c0_66] : memref<2x128x128xf32, #tpu.memory_space<vmem>>, vector<1x128x128xf32>
    %153 = vector.shape_cast %152 : vector<1x128x128xf32> to vector<128x128xf32>
    %cst_67 = arith.constant dense<0.000000e+00> : vector<17x128xf32>
    %154 = tpu.matmul %151, %153, %cst_67 {dimension_numbers = #tpu.dot_dimension_numbers<[1], [0], [0], [1], [0, 0, 1, 1], [], []>} : vector<17x128xf32>, vector<128x128xf32>, vector<17x128xf32> -> vector<17x128xf32>
    %c0_68 = arith.constant 0 : index
    %c0_69 = arith.constant 0 : index
    %c0_70 = arith.constant 0 : index
    %155 = vector.load %arg13[%c0_68, %c0_69, %c0_70] : memref<2x1x128xf32, #tpu.memory_space<vmem>>, vector<1x1x128xf32>
    %156 = vector.shape_cast %155 : vector<1x1x128xf32> to vector<1x128xf32>
    %157 = vector.broadcast %156 : vector<1x128xf32> to vector<17x128xf32>
    %158 = arith.addf %154, %157 : vector<17x128xf32>
    %159 = arith.mulf %158, %158 : vector<17x128xf32>
    %160 = arith.mulf %158, %159 : vector<17x128xf32>
    %cst_71 = arith.constant 4.471500e-02 : f32
    %161 = vector.broadcast %cst_71 : f32 to vector<17x128xf32>
    %162 = arith.mulf %161, %160 : vector<17x128xf32>
    %163 = arith.addf %158, %162 : vector<17x128xf32>
    %cst_72 = arith.constant 0.797884583 : f32
    %164 = vector.broadcast %cst_72 : f32 to vector<17x128xf32>
    %165 = arith.mulf %164, %163 : vector<17x128xf32>
    %166 = math.tanh %165 : vector<17x128xf32>
    %cst_73 = arith.constant 1.000000e+00 : f32
    %167 = vector.broadcast %cst_73 : f32 to vector<17x128xf32>
    %168 = arith.addf %167, %166 : vector<17x128xf32>
    %cst_74 = arith.constant 5.000000e-01 : f32
    %169 = vector.broadcast %cst_74 : f32 to vector<17x128xf32>
    %170 = arith.mulf %169, %168 : vector<17x128xf32>
    %171 = arith.mulf %158, %170 : vector<17x128xf32>
    %c0_75 = arith.constant 0 : index
    %c0_76 = arith.constant 0 : index
    %c0_77 = arith.constant 0 : index
    %172 = vector.load %arg14[%c0_75, %c0_76, %c0_77] : memref<2x128x128xf32, #tpu.memory_space<vmem>>, vector<1x128x128xf32>
    %173 = vector.shape_cast %172 : vector<1x128x128xf32> to vector<128x128xf32>
    %cst_78 = arith.constant dense<0.000000e+00> : vector<17x128xf32>
    %174 = tpu.matmul %171, %173, %cst_78 {dimension_numbers = #tpu.dot_dimension_numbers<[1], [0], [0], [1], [0, 0, 1, 1], [], []>} : vector<17x128xf32>, vector<128x128xf32>, vector<17x128xf32> -> vector<17x128xf32>
    %175 = arith.addf %123, %174 : vector<17x128xf32>
    %c0_79 = arith.constant 0 : index
    %c0_80 = arith.constant 0 : index
    %c0_81 = arith.constant 0 : index
    %176 = vector.load %arg15[%c0_79, %c0_80, %c0_81] : memref<2x1x128xf32, #tpu.memory_space<vmem>>, vector<1x1x128xf32>
    %177 = vector.shape_cast %176 : vector<1x1x128xf32> to vector<1x128xf32>
    %178 = vector.broadcast %177 : vector<1x128xf32> to vector<17x128xf32>
    %179 = arith.addf %175, %178 : vector<17x128xf32>
    %c1 = arith.constant 1 : index
    %c0_82 = arith.constant 0 : index
    %c0_83 = arith.constant 0 : index
    %180 = vector.load %arg4[%c1, %c0_82, %c0_83] : memref<2x1x128xf32, #tpu.memory_space<vmem>>, vector<1x1x128xf32>
    %181 = vector.shape_cast %180 : vector<1x1x128xf32> to vector<1x128xf32>
    %c1_84 = arith.constant 1 : index
    %c0_85 = arith.constant 0 : index
    %c0_86 = arith.constant 0 : index
    %182 = vector.load %arg5[%c1_84, %c0_85, %c0_86] : memref<2x1x128xf32, #tpu.memory_space<vmem>>, vector<1x1x128xf32>
    %183 = vector.shape_cast %182 : vector<1x1x128xf32> to vector<1x128xf32>
    %cst_87 = arith.constant dense<0.000000e+00> : vector<17xf32>
    %184 = vector.multi_reduction <add>, %179, %cst_87 [1] : vector<17x128xf32> to vector<17xf32>
    %185 = vector.shape_cast %184 : vector<17xf32> to vector<17x1xf32>
    %cst_88 = arith.constant 3.125000e-02 : f32
    %186 = vector.broadcast %cst_88 : f32 to vector<17x1xf32>
    %187 = arith.mulf %185, %186 : vector<17x1xf32>
    %188 = vector.broadcast %187 : vector<17x1xf32> to vector<17x128xf32>
    %189 = arith.subf %179, %188 : vector<17x128xf32>
    %cst_89 = arith.constant 0.000000e+00 : f32
    %190 = vector.shape_cast %2 : vector<1x128xi1> to vector<1x128xi1>
    %191 = vector.broadcast %190 : vector<1x128xi1> to vector<17x128xi1>
    %192 = vector.broadcast %cst_89 : f32 to vector<17x128xf32>
    %193 = arith.select %191, %189, %192 : vector<17x128xi1>, vector<17x128xf32>
    %194 = arith.mulf %193, %193 : vector<17x128xf32>
    %cst_90 = arith.constant dense<0.000000e+00> : vector<17xf32>
    %195 = vector.multi_reduction <add>, %194, %cst_90 [1] : vector<17x128xf32> to vector<17xf32>
    %196 = vector.shape_cast %195 : vector<17xf32> to vector<17x1xf32>
    %cst_91 = arith.constant 3.125000e-02 : f32
    %197 = vector.broadcast %cst_91 : f32 to vector<17x1xf32>
    %198 = arith.mulf %196, %197 : vector<17x1xf32>
    %cst_92 = arith.constant 9.99999974E-6 : f32
    %199 = vector.broadcast %cst_92 : f32 to vector<17x1xf32>
    %200 = arith.addf %198, %199 : vector<17x1xf32>
    %201 = math.rsqrt %200 : vector<17x1xf32>
    %202 = vector.broadcast %201 : vector<17x1xf32> to vector<17x128xf32>
    %203 = arith.mulf %189, %202 : vector<17x128xf32>
    %204 = vector.broadcast %181 : vector<1x128xf32> to vector<17x128xf32>
    %205 = arith.mulf %203, %204 : vector<17x128xf32>
    %206 = vector.broadcast %183 : vector<1x128xf32> to vector<17x128xf32>
    %207 = arith.addf %205, %206 : vector<17x128xf32>
    %c1_93 = arith.constant 1 : index
    %c0_94 = arith.constant 0 : index
    %c0_95 = arith.constant 0 : index
    %208 = vector.load %arg6[%c1_93, %c0_94, %c0_95] : memref<2x128x384xf32, #tpu.memory_space<vmem>>, vector<1x128x384xf32>
    %209 = vector.shape_cast %208 : vector<1x128x384xf32> to vector<128x384xf32>
    %cst_96 = arith.constant dense<0.000000e+00> : vector<17x384xf32>
    %210 = tpu.matmul %207, %209, %cst_96 {dimension_numbers = #tpu.dot_dimension_numbers<[1], [0], [0], [1], [0, 0, 1, 1], [], []>} : vector<17x128xf32>, vector<128x384xf32>, vector<17x384xf32> -> vector<17x384xf32>
    %c1_97 = arith.constant 1 : index
    %c0_98 = arith.constant 0 : index
    %c0_99 = arith.constant 0 : index
    %211 = vector.load %arg7[%c1_97, %c0_98, %c0_99] : memref<2x1x384xf32, #tpu.memory_space<vmem>>, vector<1x1x384xf32>
    %212 = vector.shape_cast %211 : vector<1x1x384xf32> to vector<1x384xf32>
    %213 = vector.broadcast %212 : vector<1x384xf32> to vector<17x384xf32>
    %214 = arith.addf %210, %213 : vector<17x384xf32>
    %c1_100 = arith.constant 1 : index
    %c0_101 = arith.constant 0 : index
    %c0_102 = arith.constant 0 : index
    %215 = vector.load %arg8[%c1_100, %c0_101, %c0_102] : memref<2x32x128xf32, #tpu.memory_space<vmem>>, vector<1x32x128xf32>
    %216 = vector.shape_cast %215 : vector<1x32x128xf32> to vector<32x128xf32>
    %cst_103 = arith.constant 0.000000e+00 : f32
    %217 = vector.broadcast %cst_103 : f32 to vector<17x128xf32>
    %218 = vector.extract_strided_slice %214 {offsets = [0, 0], sizes = [17, 8], strides = [1, 1]} : vector<17x384xf32> to vector<17x8xf32>
    %219 = vector.extract_strided_slice %214 {offsets = [0, 128], sizes = [17, 8], strides = [1, 1]} : vector<17x384xf32> to vector<17x8xf32>
    %220 = vector.extract_strided_slice %214 {offsets = [0, 256], sizes = [17, 8], strides = [1, 1]} : vector<17x384xf32> to vector<17x8xf32>
    %cst_104 = arith.constant dense<0.000000e+00> : vector<17x17xf32>
    %221 = tpu.matmul %218, %219, %cst_104 {dimension_numbers = #tpu.dot_dimension_numbers<[1], [1], [0], [0], [0, 0, 1, 0], [], []>} : vector<17x8xf32>, vector<17x8xf32>, vector<17x17xf32> -> vector<17x17xf32>
    %cst_105 = arith.constant dense<0xFF800000> : vector<17xf32>
    %222 = vector.multi_reduction <maximumf>, %221, %cst_105 [1] : vector<17x17xf32> to vector<17xf32>
    %223 = vector.shape_cast %222 : vector<17xf32> to vector<17x1xf32>
    %224 = vector.broadcast %223 : vector<17x1xf32> to vector<17x17xf32>
    %225 = arith.subf %221, %224 : vector<17x17xf32>
    %226 = math.exp %225 : vector<17x17xf32>
    %cst_106 = arith.constant dense<0.000000e+00> : vector<17xf32>
    %227 = vector.multi_reduction <add>, %226, %cst_106 [1] : vector<17x17xf32> to vector<17xf32>
    %228 = vector.shape_cast %227 : vector<17xf32> to vector<17x1xf32>
    %229 = tpu.reciprocal %228 {approx = true} : vector<17x1xf32> -> vector<17x1xf32>
    %230 = vector.broadcast %229 : vector<17x1xf32> to vector<17x17xf32>
    %231 = arith.mulf %226, %230 : vector<17x17xf32>
    %cst_107 = arith.constant dense<0.000000e+00> : vector<17x8xf32>
    %232 = tpu.matmul %231, %220, %cst_107 {dimension_numbers = #tpu.dot_dimension_numbers<[1], [0], [0], [1], [0, 0, 1, 1], [], []>} : vector<17x17xf32>, vector<17x8xf32>, vector<17x8xf32> -> vector<17x8xf32>
    %233 = vector.extract_strided_slice %216 {offsets = [0, 0], sizes = [8, 128], strides = [1, 1]} : vector<32x128xf32> to vector<8x128xf32>
    %cst_108 = arith.constant dense<0.000000e+00> : vector<17x128xf32>
    %234 = tpu.matmul %232, %233, %cst_108 {dimension_numbers = #tpu.dot_dimension_numbers<[1], [0], [0], [1], [0, 0, 1, 1], [], []>} : vector<17x8xf32>, vector<8x128xf32>, vector<17x128xf32> -> vector<17x128xf32>
    %235 = arith.addf %217, %234 : vector<17x128xf32>
    %236 = vector.extract_strided_slice %214 {offsets = [0, 8], sizes = [17, 8], strides = [1, 1]} : vector<17x384xf32> to vector<17x8xf32>
    %237 = vector.extract_strided_slice %214 {offsets = [0, 136], sizes = [17, 8], strides = [1, 1]} : vector<17x384xf32> to vector<17x8xf32>
    %238 = vector.extract_strided_slice %214 {offsets = [0, 264], sizes = [17, 8], strides = [1, 1]} : vector<17x384xf32> to vector<17x8xf32>
    %cst_109 = arith.constant dense<0.000000e+00> : vector<17x17xf32>
    %239 = tpu.matmul %236, %237, %cst_109 {dimension_numbers = #tpu.dot_dimension_numbers<[1], [1], [0], [0], [0, 0, 1, 0], [], []>} : vector<17x8xf32>, vector<17x8xf32>, vector<17x17xf32> -> vector<17x17xf32>
    %cst_110 = arith.constant dense<0xFF800000> : vector<17xf32>
    %240 = vector.multi_reduction <maximumf>, %239, %cst_110 [1] : vector<17x17xf32> to vector<17xf32>
    %241 = vector.shape_cast %240 : vector<17xf32> to vector<17x1xf32>
    %242 = vector.broadcast %241 : vector<17x1xf32> to vector<17x17xf32>
    %243 = arith.subf %239, %242 : vector<17x17xf32>
    %244 = math.exp %243 : vector<17x17xf32>
    %cst_111 = arith.constant dense<0.000000e+00> : vector<17xf32>
    %245 = vector.multi_reduction <add>, %244, %cst_111 [1] : vector<17x17xf32> to vector<17xf32>
    %246 = vector.shape_cast %245 : vector<17xf32> to vector<17x1xf32>
    %247 = tpu.reciprocal %246 {approx = true} : vector<17x1xf32> -> vector<17x1xf32>
    %248 = vector.broadcast %247 : vector<17x1xf32> to vector<17x17xf32>
    %249 = arith.mulf %244, %248 : vector<17x17xf32>
    %cst_112 = arith.constant dense<0.000000e+00> : vector<17x8xf32>
    %250 = tpu.matmul %249, %238, %cst_112 {dimension_numbers = #tpu.dot_dimension_numbers<[1], [0], [0], [1], [0, 0, 1, 1], [], []>} : vector<17x17xf32>, vector<17x8xf32>, vector<17x8xf32> -> vector<17x8xf32>
    %251 = vector.extract_strided_slice %216 {offsets = [8, 0], sizes = [8, 128], strides = [1, 1]} : vector<32x128xf32> to vector<8x128xf32>
    %cst_113 = arith.constant dense<0.000000e+00> : vector<17x128xf32>
    %252 = tpu.matmul %250, %251, %cst_113 {dimension_numbers = #tpu.dot_dimension_numbers<[1], [0], [0], [1], [0, 0, 1, 1], [], []>} : vector<17x8xf32>, vector<8x128xf32>, vector<17x128xf32> -> vector<17x128xf32>
    %253 = arith.addf %235, %252 : vector<17x128xf32>
    %254 = vector.extract_strided_slice %214 {offsets = [0, 16], sizes = [17, 8], strides = [1, 1]} : vector<17x384xf32> to vector<17x8xf32>
    %255 = vector.extract_strided_slice %214 {offsets = [0, 144], sizes = [17, 8], strides = [1, 1]} : vector<17x384xf32> to vector<17x8xf32>
    %256 = vector.extract_strided_slice %214 {offsets = [0, 272], sizes = [17, 8], strides = [1, 1]} : vector<17x384xf32> to vector<17x8xf32>
    %cst_114 = arith.constant dense<0.000000e+00> : vector<17x17xf32>
    %257 = tpu.matmul %254, %255, %cst_114 {dimension_numbers = #tpu.dot_dimension_numbers<[1], [1], [0], [0], [0, 0, 1, 0], [], []>} : vector<17x8xf32>, vector<17x8xf32>, vector<17x17xf32> -> vector<17x17xf32>
    %cst_115 = arith.constant dense<0xFF800000> : vector<17xf32>
    %258 = vector.multi_reduction <maximumf>, %257, %cst_115 [1] : vector<17x17xf32> to vector<17xf32>
    %259 = vector.shape_cast %258 : vector<17xf32> to vector<17x1xf32>
    %260 = vector.broadcast %259 : vector<17x1xf32> to vector<17x17xf32>
    %261 = arith.subf %257, %260 : vector<17x17xf32>
    %262 = math.exp %261 : vector<17x17xf32>
    %cst_116 = arith.constant dense<0.000000e+00> : vector<17xf32>
    %263 = vector.multi_reduction <add>, %262, %cst_116 [1] : vector<17x17xf32> to vector<17xf32>
    %264 = vector.shape_cast %263 : vector<17xf32> to vector<17x1xf32>
    %265 = tpu.reciprocal %264 {approx = true} : vector<17x1xf32> -> vector<17x1xf32>
    %266 = vector.broadcast %265 : vector<17x1xf32> to vector<17x17xf32>
    %267 = arith.mulf %262, %266 : vector<17x17xf32>
    %cst_117 = arith.constant dense<0.000000e+00> : vector<17x8xf32>
    %268 = tpu.matmul %267, %256, %cst_117 {dimension_numbers = #tpu.dot_dimension_numbers<[1], [0], [0], [1], [0, 0, 1, 1], [], []>} : vector<17x17xf32>, vector<17x8xf32>, vector<17x8xf32> -> vector<17x8xf32>
    %269 = vector.extract_strided_slice %216 {offsets = [16, 0], sizes = [8, 128], strides = [1, 1]} : vector<32x128xf32> to vector<8x128xf32>
    %cst_118 = arith.constant dense<0.000000e+00> : vector<17x128xf32>
    %270 = tpu.matmul %268, %269, %cst_118 {dimension_numbers = #tpu.dot_dimension_numbers<[1], [0], [0], [1], [0, 0, 1, 1], [], []>} : vector<17x8xf32>, vector<8x128xf32>, vector<17x128xf32> -> vector<17x128xf32>
    %271 = arith.addf %253, %270 : vector<17x128xf32>
    %272 = vector.extract_strided_slice %214 {offsets = [0, 24], sizes = [17, 8], strides = [1, 1]} : vector<17x384xf32> to vector<17x8xf32>
    %273 = vector.extract_strided_slice %214 {offsets = [0, 152], sizes = [17, 8], strides = [1, 1]} : vector<17x384xf32> to vector<17x8xf32>
    %274 = vector.extract_strided_slice %214 {offsets = [0, 280], sizes = [17, 8], strides = [1, 1]} : vector<17x384xf32> to vector<17x8xf32>
    %cst_119 = arith.constant dense<0.000000e+00> : vector<17x17xf32>
    %275 = tpu.matmul %272, %273, %cst_119 {dimension_numbers = #tpu.dot_dimension_numbers<[1], [1], [0], [0], [0, 0, 1, 0], [], []>} : vector<17x8xf32>, vector<17x8xf32>, vector<17x17xf32> -> vector<17x17xf32>
    %cst_120 = arith.constant dense<0xFF800000> : vector<17xf32>
    %276 = vector.multi_reduction <maximumf>, %275, %cst_120 [1] : vector<17x17xf32> to vector<17xf32>
    %277 = vector.shape_cast %276 : vector<17xf32> to vector<17x1xf32>
    %278 = vector.broadcast %277 : vector<17x1xf32> to vector<17x17xf32>
    %279 = arith.subf %275, %278 : vector<17x17xf32>
    %280 = math.exp %279 : vector<17x17xf32>
    %cst_121 = arith.constant dense<0.000000e+00> : vector<17xf32>
    %281 = vector.multi_reduction <add>, %280, %cst_121 [1] : vector<17x17xf32> to vector<17xf32>
    %282 = vector.shape_cast %281 : vector<17xf32> to vector<17x1xf32>
    %283 = tpu.reciprocal %282 {approx = true} : vector<17x1xf32> -> vector<17x1xf32>
    %284 = vector.broadcast %283 : vector<17x1xf32> to vector<17x17xf32>
    %285 = arith.mulf %280, %284 : vector<17x17xf32>
    %cst_122 = arith.constant dense<0.000000e+00> : vector<17x8xf32>
    %286 = tpu.matmul %285, %274, %cst_122 {dimension_numbers = #tpu.dot_dimension_numbers<[1], [0], [0], [1], [0, 0, 1, 1], [], []>} : vector<17x17xf32>, vector<17x8xf32>, vector<17x8xf32> -> vector<17x8xf32>
    %287 = vector.extract_strided_slice %216 {offsets = [24, 0], sizes = [8, 128], strides = [1, 1]} : vector<32x128xf32> to vector<8x128xf32>
    %cst_123 = arith.constant dense<0.000000e+00> : vector<17x128xf32>
    %288 = tpu.matmul %286, %287, %cst_123 {dimension_numbers = #tpu.dot_dimension_numbers<[1], [0], [0], [1], [0, 0, 1, 1], [], []>} : vector<17x8xf32>, vector<8x128xf32>, vector<17x128xf32> -> vector<17x128xf32>
    %289 = arith.addf %271, %288 : vector<17x128xf32>
    %290 = arith.addf %179, %289 : vector<17x128xf32>
    %c1_124 = arith.constant 1 : index
    %c0_125 = arith.constant 0 : index
    %c0_126 = arith.constant 0 : index
    %291 = vector.load %arg9[%c1_124, %c0_125, %c0_126] : memref<2x1x128xf32, #tpu.memory_space<vmem>>, vector<1x1x128xf32>
    %292 = vector.shape_cast %291 : vector<1x1x128xf32> to vector<1x128xf32>
    %293 = vector.broadcast %292 : vector<1x128xf32> to vector<17x128xf32>
    %294 = arith.addf %290, %293 : vector<17x128xf32>
    %c1_127 = arith.constant 1 : index
    %c0_128 = arith.constant 0 : index
    %c0_129 = arith.constant 0 : index
    %295 = vector.load %arg10[%c1_127, %c0_128, %c0_129] : memref<2x1x128xf32, #tpu.memory_space<vmem>>, vector<1x1x128xf32>
    %296 = vector.shape_cast %295 : vector<1x1x128xf32> to vector<1x128xf32>
    %c1_130 = arith.constant 1 : index
    %c0_131 = arith.constant 0 : index
    %c0_132 = arith.constant 0 : index
    %297 = vector.load %arg11[%c1_130, %c0_131, %c0_132] : memref<2x1x128xf32, #tpu.memory_space<vmem>>, vector<1x1x128xf32>
    %298 = vector.shape_cast %297 : vector<1x1x128xf32> to vector<1x128xf32>
    %cst_133 = arith.constant dense<0.000000e+00> : vector<17xf32>
    %299 = vector.multi_reduction <add>, %294, %cst_133 [1] : vector<17x128xf32> to vector<17xf32>
    %300 = vector.shape_cast %299 : vector<17xf32> to vector<17x1xf32>
    %cst_134 = arith.constant 3.125000e-02 : f32
    %301 = vector.broadcast %cst_134 : f32 to vector<17x1xf32>
    %302 = arith.mulf %300, %301 : vector<17x1xf32>
    %303 = vector.broadcast %302 : vector<17x1xf32> to vector<17x128xf32>
    %304 = arith.subf %294, %303 : vector<17x128xf32>
    %cst_135 = arith.constant 0.000000e+00 : f32
    %305 = vector.shape_cast %2 : vector<1x128xi1> to vector<1x128xi1>
    %306 = vector.broadcast %305 : vector<1x128xi1> to vector<17x128xi1>
    %307 = vector.broadcast %cst_135 : f32 to vector<17x128xf32>
    %308 = arith.select %306, %304, %307 : vector<17x128xi1>, vector<17x128xf32>
    %309 = arith.mulf %308, %308 : vector<17x128xf32>
    %cst_136 = arith.constant dense<0.000000e+00> : vector<17xf32>
    %310 = vector.multi_reduction <add>, %309, %cst_136 [1] : vector<17x128xf32> to vector<17xf32>
    %311 = vector.shape_cast %310 : vector<17xf32> to vector<17x1xf32>
    %cst_137 = arith.constant 3.125000e-02 : f32
    %312 = vector.broadcast %cst_137 : f32 to vector<17x1xf32>
    %313 = arith.mulf %311, %312 : vector<17x1xf32>
    %cst_138 = arith.constant 9.99999974E-6 : f32
    %314 = vector.broadcast %cst_138 : f32 to vector<17x1xf32>
    %315 = arith.addf %313, %314 : vector<17x1xf32>
    %316 = math.rsqrt %315 : vector<17x1xf32>
    %317 = vector.broadcast %316 : vector<17x1xf32> to vector<17x128xf32>
    %318 = arith.mulf %304, %317 : vector<17x128xf32>
    %319 = vector.broadcast %296 : vector<1x128xf32> to vector<17x128xf32>
    %320 = arith.mulf %318, %319 : vector<17x128xf32>
    %321 = vector.broadcast %298 : vector<1x128xf32> to vector<17x128xf32>
    %322 = arith.addf %320, %321 : vector<17x128xf32>
    %c1_139 = arith.constant 1 : index
    %c0_140 = arith.constant 0 : index
    %c0_141 = arith.constant 0 : index
    %323 = vector.load %arg12[%c1_139, %c0_140, %c0_141] : memref<2x128x128xf32, #tpu.memory_space<vmem>>, vector<1x128x128xf32>
    %324 = vector.shape_cast %323 : vector<1x128x128xf32> to vector<128x128xf32>
    %cst_142 = arith.constant dense<0.000000e+00> : vector<17x128xf32>
    %325 = tpu.matmul %322, %324, %cst_142 {dimension_numbers = #tpu.dot_dimension_numbers<[1], [0], [0], [1], [0, 0, 1, 1], [], []>} : vector<17x128xf32>, vector<128x128xf32>, vector<17x128xf32> -> vector<17x128xf32>
    %c1_143 = arith.constant 1 : index
    %c0_144 = arith.constant 0 : index
    %c0_145 = arith.constant 0 : index
    %326 = vector.load %arg13[%c1_143, %c0_144, %c0_145] : memref<2x1x128xf32, #tpu.memory_space<vmem>>, vector<1x1x128xf32>
    %327 = vector.shape_cast %326 : vector<1x1x128xf32> to vector<1x128xf32>
    %328 = vector.broadcast %327 : vector<1x128xf32> to vector<17x128xf32>
    %329 = arith.addf %325, %328 : vector<17x128xf32>
    %330 = arith.mulf %329, %329 : vector<17x128xf32>
    %331 = arith.mulf %329, %330 : vector<17x128xf32>
    %cst_146 = arith.constant 4.471500e-02 : f32
    %332 = vector.broadcast %cst_146 : f32 to vector<17x128xf32>
    %333 = arith.mulf %332, %331 : vector<17x128xf32>
    %334 = arith.addf %329, %333 : vector<17x128xf32>
    %cst_147 = arith.constant 0.797884583 : f32
    %335 = vector.broadcast %cst_147 : f32 to vector<17x128xf32>
    %336 = arith.mulf %335, %334 : vector<17x128xf32>
    %337 = math.tanh %336 : vector<17x128xf32>
    %cst_148 = arith.constant 1.000000e+00 : f32
    %338 = vector.broadcast %cst_148 : f32 to vector<17x128xf32>
    %339 = arith.addf %338, %337 : vector<17x128xf32>
    %cst_149 = arith.constant 5.000000e-01 : f32
    %340 = vector.broadcast %cst_149 : f32 to vector<17x128xf32>
    %341 = arith.mulf %340, %339 : vector<17x128xf32>
    %342 = arith.mulf %329, %341 : vector<17x128xf32>
    %c1_150 = arith.constant 1 : index
    %c0_151 = arith.constant 0 : index
    %c0_152 = arith.constant 0 : index
    %343 = vector.load %arg14[%c1_150, %c0_151, %c0_152] : memref<2x128x128xf32, #tpu.memory_space<vmem>>, vector<1x128x128xf32>
    %344 = vector.shape_cast %343 : vector<1x128x128xf32> to vector<128x128xf32>
    %cst_153 = arith.constant dense<0.000000e+00> : vector<17x128xf32>
    %345 = tpu.matmul %342, %344, %cst_153 {dimension_numbers = #tpu.dot_dimension_numbers<[1], [0], [0], [1], [0, 0, 1, 1], [], []>} : vector<17x128xf32>, vector<128x128xf32>, vector<17x128xf32> -> vector<17x128xf32>
    %346 = arith.addf %294, %345 : vector<17x128xf32>
    %c1_154 = arith.constant 1 : index
    %c0_155 = arith.constant 0 : index
    %c0_156 = arith.constant 0 : index
    %347 = vector.load %arg15[%c1_154, %c0_155, %c0_156] : memref<2x1x128xf32, #tpu.memory_space<vmem>>, vector<1x1x128xf32>
    %348 = vector.shape_cast %347 : vector<1x1x128xf32> to vector<1x128xf32>
    %349 = vector.broadcast %348 : vector<1x128xf32> to vector<17x128xf32>
    %350 = arith.addf %346, %349 : vector<17x128xf32>
    %c0_157 = arith.constant 0 : index
    %c0_158 = arith.constant 0 : index
    %351 = vector.load %arg16[%c0_157, %c0_158] : memref<1x128xf32, #tpu.memory_space<vmem>>, vector<1x128xf32>
    %c0_159 = arith.constant 0 : index
    %c0_160 = arith.constant 0 : index
    %352 = vector.load %arg17[%c0_159, %c0_160] : memref<1x128xf32, #tpu.memory_space<vmem>>, vector<1x128xf32>
    %cst_161 = arith.constant dense<0.000000e+00> : vector<17xf32>
    %353 = vector.multi_reduction <add>, %350, %cst_161 [1] : vector<17x128xf32> to vector<17xf32>
    %354 = vector.shape_cast %353 : vector<17xf32> to vector<17x1xf32>
    %cst_162 = arith.constant 3.125000e-02 : f32
    %355 = vector.broadcast %cst_162 : f32 to vector<17x1xf32>
    %356 = arith.mulf %354, %355 : vector<17x1xf32>
    %357 = vector.broadcast %356 : vector<17x1xf32> to vector<17x128xf32>
    %358 = arith.subf %350, %357 : vector<17x128xf32>
    %cst_163 = arith.constant 0.000000e+00 : f32
    %359 = vector.shape_cast %2 : vector<1x128xi1> to vector<1x128xi1>
    %360 = vector.broadcast %359 : vector<1x128xi1> to vector<17x128xi1>
    %361 = vector.broadcast %cst_163 : f32 to vector<17x128xf32>
    %362 = arith.select %360, %358, %361 : vector<17x128xi1>, vector<17x128xf32>
    %363 = arith.mulf %362, %362 : vector<17x128xf32>
    %cst_164 = arith.constant dense<0.000000e+00> : vector<17xf32>
    %364 = vector.multi_reduction <add>, %363, %cst_164 [1] : vector<17x128xf32> to vector<17xf32>
    %365 = vector.shape_cast %364 : vector<17xf32> to vector<17x1xf32>
    %cst_165 = arith.constant 3.125000e-02 : f32
    %366 = vector.broadcast %cst_165 : f32 to vector<17x1xf32>
    %367 = arith.mulf %365, %366 : vector<17x1xf32>
    %cst_166 = arith.constant 9.99999974E-6 : f32
    %368 = vector.broadcast %cst_166 : f32 to vector<17x1xf32>
    %369 = arith.addf %367, %368 : vector<17x1xf32>
    %370 = math.rsqrt %369 : vector<17x1xf32>
    %371 = vector.broadcast %370 : vector<17x1xf32> to vector<17x128xf32>
    %372 = arith.mulf %358, %371 : vector<17x128xf32>
    %373 = vector.broadcast %351 : vector<1x128xf32> to vector<17x128xf32>
    %374 = arith.mulf %372, %373 : vector<17x128xf32>
    %375 = vector.broadcast %352 : vector<1x128xf32> to vector<17x128xf32>
    %376 = arith.addf %374, %375 : vector<17x128xf32>
    %377 = vector.extract_strided_slice %376 {offsets = [0, 0], sizes = [1, 128], strides = [1, 1]} : vector<17x128xf32> to vector<1x128xf32>
    %c0_167 = arith.constant 0 : index
    %c0_168 = arith.constant 0 : index
    %378 = vector.load %arg18[%c0_167, %c0_168] : memref<128x128xf32, #tpu.memory_space<vmem>>, vector<128x128xf32>
    %cst_169 = arith.constant dense<0.000000e+00> : vector<1x128xf32>
    %379 = tpu.matmul %377, %378, %cst_169 {dimension_numbers = #tpu.dot_dimension_numbers<[1], [0], [0], [1], [0, 0, 1, 1], [], []>} : vector<1x128xf32>, vector<128x128xf32>, vector<1x128xf32> -> vector<1x128xf32>
    %c0_170 = arith.constant 0 : index
    %c0_171 = arith.constant 0 : index
    %380 = vector.load %arg19[%c0_170, %c0_171] : memref<1x128xf32, #tpu.memory_space<vmem>>, vector<1x128xf32>
    %381 = arith.addf %379, %380 : vector<1x128xf32>
    %c0_172 = arith.constant 0 : index
    %c0_173 = arith.constant 0 : index
    %c0_174 = arith.constant 0 : index
    %382 = vector.load %arg20[%c0_172, %c0_173, %c0_174] : memref<1x1x128xf32, #tpu.memory_space<vmem>>, vector<1x1x128xf32>
    %383 = vector.shape_cast %382 : vector<1x1x128xf32> to vector<1x128xf32>
    %384 = vector.shape_cast %381 : vector<1x128xf32> to vector<1x1x128xf32>
    tpu.vector_store %arg20[%c0_172, %c0_173, %c0_174], %384 {strides = array<i32>} : memref<1x1x128xf32, #tpu.memory_space<vmem>>, vector<1x1x128xf32>,
    %385 = vector.extract_strided_slice %350 {offsets = [0, 0], sizes = [1, 128], strides = [1, 1]} : vector<17x128xf32> to vector<1x128xf32>
    %c0_175 = arith.constant 0 : index
    %c0_176 = arith.constant 0 : index
    %c0_177 = arith.constant 0 : index
    %386 = vector.load %arg21[%c0_175, %c0_176, %c0_177] : memref<1x1x128xf32, #tpu.memory_space<vmem>>, vector<1x1x128xf32>
    %387 = vector.shape_cast %386 : vector<1x1x128xf32> to vector<1x128xf32>
    %388 = vector.shape_cast %385 : vector<1x128xf32> to vector<1x1x128xf32>
    tpu.vector_store %arg21[%c0_175, %c0_176, %c0_177], %388 {strides = array<i32>} : memref<1x1x128xf32, #tpu.memory_space<vmem>>, vector<1x1x128xf32>,
    return
  }
  func.func @transform_0(%arg0: i32) -> (i32, i32, i32) {
    %c0_i32 = arith.constant 0 : i32
    %c0_i32_0 = arith.constant 0 : i32
    %c0_i32_1 = arith.constant 0 : i32
    return %arg0, %c0_i32, %c0_i32_0 : i32, i32, i32
  }
  func.func @transform_1(%arg0: i32) -> (i32, i32) {
    %c0_i32 = arith.constant 0 : i32
    %c0_i32_0 = arith.constant 0 : i32
    %c0_i32_1 = arith.constant 0 : i32
    return %c0_i32, %c0_i32_0 : i32, i32
  }
  func.func @transform_2(%arg0: i32) -> (i32, i32) {
    %c0_i32 = arith.constant 0 : i32
    %c0_i32_0 = arith.constant 0 : i32
    %c0_i32_1 = arith.constant 0 : i32
    return %c0_i32, %c0_i32_0 : i32, i32
  }
  func.func @transform_3(%arg0: i32) -> (i32, i32, i32) {
    %c0_i32 = arith.constant 0 : i32
    %c0_i32_0 = arith.constant 0 : i32
    %c0_i32_1 = arith.constant 0 : i32
    %c0_i32_2 = arith.constant 0 : i32
    return %c0_i32, %c0_i32_0, %c0_i32_1 : i32, i32, i32
  }
  func.func @transform_4(%arg0: i32) -> (i32, i32, i32) {
    %c0_i32 = arith.constant 0 : i32
    %c0_i32_0 = arith.constant 0 : i32
    %c0_i32_1 = arith.constant 0 : i32
    %c0_i32_2 = arith.constant 0 : i32
    return %c0_i32, %c0_i32_0, %c0_i32_1 : i32, i32, i32
  }
  func.func @transform_5(%arg0: i32) -> (i32, i32, i32) {
    %c0_i32 = arith.constant 0 : i32
    %c0_i32_0 = arith.constant 0 : i32
    %c0_i32_1 = arith.constant 0 : i32
    %c0_i32_2 = arith.constant 0 : i32
    return %c0_i32, %c0_i32_0, %c0_i32_1 : i32, i32, i32
  }
  func.func @transform_6(%arg0: i32) -> (i32, i32, i32) {
    %c0_i32 = arith.constant 0 : i32
    %c0_i32_0 = arith.constant 0 : i32
    %c0_i32_1 = arith.constant 0 : i32
    %c0_i32_2 = arith.constant 0 : i32
    return %c0_i32, %c0_i32_0, %c0_i32_1 : i32, i32, i32
  }
  func.func @transform_7(%arg0: i32) -> (i32, i32, i32) {
    %c0_i32 = arith.constant 0 : i32
    %c0_i32_0 = arith.constant 0 : i32
    %c0_i32_1 = arith.constant 0 : i32
    %c0_i32_2 = arith.constant 0 : i32
    return %c0_i32, %c0_i32_0, %c0_i32_1 : i32, i32, i32
  }
  func.func @transform_8(%arg0: i32) -> (i32, i32, i32) {
    %c0_i32 = arith.constant 0 : i32
    %c0_i32_0 = arith.constant 0 : i32
    %c0_i32_1 = arith.constant 0 : i32
    %c0_i32_2 = arith.constant 0 : i32
    return %c0_i32, %c0_i32_0, %c0_i32_1 : i32, i32, i32
  }
  func.func @transform_9(%arg0: i32) -> (i32, i32, i32) {
    %c0_i32 = arith.constant 0 : i32
    %c0_i32_0 = arith.constant 0 : i32
    %c0_i32_1 = arith.constant 0 : i32
    %c0_i32_2 = arith.constant 0 : i32
    return %c0_i32, %c0_i32_0, %c0_i32_1 : i32, i32, i32
  }
  func.func @transform_10(%arg0: i32) -> (i32, i32, i32) {
    %c0_i32 = arith.constant 0 : i32
    %c0_i32_0 = arith.constant 0 : i32
    %c0_i32_1 = arith.constant 0 : i32
    %c0_i32_2 = arith.constant 0 : i32
    return %c0_i32, %c0_i32_0, %c0_i32_1 : i32, i32, i32
  }
  func.func @transform_11(%arg0: i32) -> (i32, i32, i32) {
    %c0_i32 = arith.constant 0 : i32
    %c0_i32_0 = arith.constant 0 : i32
    %c0_i32_1 = arith.constant 0 : i32
    %c0_i32_2 = arith.constant 0 : i32
    return %c0_i32, %c0_i32_0, %c0_i32_1 : i32, i32, i32
  }
  func.func @transform_12(%arg0: i32) -> (i32, i32, i32) {
    %c0_i32 = arith.constant 0 : i32
    %c0_i32_0 = arith.constant 0 : i32
    %c0_i32_1 = arith.constant 0 : i32
    %c0_i32_2 = arith.constant 0 : i32
    return %c0_i32, %c0_i32_0, %c0_i32_1 : i32, i32, i32
  }
  func.func @transform_13(%arg0: i32) -> (i32, i32, i32) {
    %c0_i32 = arith.constant 0 : i32
    %c0_i32_0 = arith.constant 0 : i32
    %c0_i32_1 = arith.constant 0 : i32
    %c0_i32_2 = arith.constant 0 : i32
    return %c0_i32, %c0_i32_0, %c0_i32_1 : i32, i32, i32
  }
  func.func @transform_14(%arg0: i32) -> (i32, i32, i32) {
    %c0_i32 = arith.constant 0 : i32
    %c0_i32_0 = arith.constant 0 : i32
    %c0_i32_1 = arith.constant 0 : i32
    %c0_i32_2 = arith.constant 0 : i32
    return %c0_i32, %c0_i32_0, %c0_i32_1 : i32, i32, i32
  }
  func.func @transform_15(%arg0: i32) -> (i32, i32) {
    %c0_i32 = arith.constant 0 : i32
    %c0_i32_0 = arith.constant 0 : i32
    %c0_i32_1 = arith.constant 0 : i32
    return %c0_i32, %c0_i32_0 : i32, i32
  }
  func.func @transform_16(%arg0: i32) -> (i32, i32) {
    %c0_i32 = arith.constant 0 : i32
    %c0_i32_0 = arith.constant 0 : i32
    %c0_i32_1 = arith.constant 0 : i32
    return %c0_i32, %c0_i32_0 : i32, i32
  }
  func.func @transform_17(%arg0: i32) -> (i32, i32) {
    %c0_i32 = arith.constant 0 : i32
    %c0_i32_0 = arith.constant 0 : i32
    %c0_i32_1 = arith.constant 0 : i32
    return %c0_i32, %c0_i32_0 : i32, i32
  }
  func.func @transform_18(%arg0: i32) -> (i32, i32) {
    %c0_i32 = arith.constant 0 : i32
    %c0_i32_0 = arith.constant 0 : i32
    %c0_i32_1 = arith.constant 0 : i32
    return %c0_i32, %c0_i32_0 : i32, i32
  }
  func.func @transform_19(%arg0: i32) -> (i32, i32, i32) {
    %c0_i32 = arith.constant 0 : i32
    %c0_i32_0 = arith.constant 0 : i32
    %c0_i32_1 = arith.constant 0 : i32
    return %arg0, %c0_i32, %c0_i32_0 : i32, i32, i32
  }
  func.func @transform_20(%arg0: i32) -> (i32, i32, i32) {
    %c0_i32 = arith.constant 0 : i32
    %c0_i32_0 = arith.constant 0 : i32
    %c0_i32_1 = arith.constant 0 : i32
    return %arg0, %c0_i32, %c0_i32_0 : i32, i32, i32
  }
}

</mosaic_0001>

<bundles_post_ra>
// kernel: wrapped_backbone_forward.1
= control target key start
LH: loop header
LB: loop body
LE: loop exit
PB: predicated region body
PF: predicated region fallthrough
CT: control target
= control target key end

     0   :  { %s8030_s0 = inlined_call_operand.vmem [shape: f32[2,17,128], index: 0, kind: input, shape index: {}]   ;;  %s8031_s1 = inlined_call_operand.vmem [shape: f32[128,128], index: 1, kind: input, shape index: {}]   ;;  %s8032_s2 = inlined_call_operand.vmem [shape: f32[17,128], index: 2, kind: input, shape index: {}]   ;;  %s8033_s3 = inlined_call_operand.vmem [shape: f32[2,1,128], index: 3, kind: input, shape index: {}]   ;;  %s8034_s4 = inlined_call_operand.vmem [shape: f32[2,1,128], index: 4, kind: input, shape index: {}]   ;;  %s8035_s5 = inlined_call_operand.vmem [shape: f32[2,128,384], index: 5, kind: input, shape index: {}]   ;;  %s8036_s6 = inlined_call_operand.vmem [shape: f32[2,1,384], index: 6, kind: input, shape index: {}]   ;;  %s8037_s7 = inlined_call_operand.vmem [shape: f32[2,32,128], index: 7, kind: input, shape index: {}]   ;;  %s8038_s8 = inlined_call_operand.vmem [shape: f32[2,1,128], index: 8, kind: input, shape index: {}]   ;;  %s8039_s9 = inlined_call_operand.vmem [shape: f32[2,1,128], index: 9, kind: input, shape index: {}]   ;;  %s8040_s10 = inlined_call_operand.vmem [shape: f32[2,1,128], index: 10, kind: input, shape index: {}]   ;;  %s8041_s11 = inlined_call_operand.vmem [shape: f32[2,128,128], index: 11, kind: input, shape index: {}]   ;;  %s8042_s12 = inlined_call_operand.vmem [shape: f32[2,1,128], index: 12, kind: input, shape index: {}]   ;;  %s8043_s13 = inlined_call_operand.vmem [shape: f32[2,128,128], index: 13, kind: input, shape index: {}]   ;;  %s8044_s14 = inlined_call_operand.vmem [shape: f32[2,1,128], index: 14, kind: input, shape index: {}]   ;;  %s8045_s15 = inlined_call_operand.vmem [shape: f32[1,128], index: 15, kind: input, shape index: {}]   ;;  %s8046_s16 = inlined_call_operand.vmem [shape: f32[1,128], index: 16, kind: input, shape index: {}]   ;;  %s8047_s17 = inlined_call_operand.vmem [shape: f32[128,128], index: 17, kind: input, shape index: {}]   ;;  %s8048_s18 = inlined_call_operand.vmem [shape: f32[1,128], index: 18, kind: input, shape index: {}]   ;;  %s8049_s19 = inlined_call_operand.hbm [shape: f32[2,1,128], index: 19, kind: output, shape index: {0}]   ;;  %s8050_s20 = inlined_call_operand.hbm [shape: f32[2,1,128], index: 20, kind: output, shape index: {1}]  }
   0x1   :  { %8070 = sst [smem:[#allocation14_spill]] %s8030_s0 }
   0x2   :  { %8071 = sst [smem:[#allocation15_spill]] %s8031_s1 }
   0x3   :  { %8072 = sst [smem:[#allocation16_spill]] %s8032_s2 }
   0x4   :  { %8073 = sst [smem:[#allocation17_spill]] %s8033_s3 }
   0x5   :  { %8074 = sst [smem:[#allocation18_spill]] %s8034_s4 }
   0x6   :  { %8075 = sst [smem:[#allocation19_spill]] %s8035_s5 }
   0x7   :  { %8076 = sst [smem:[#allocation20_spill]] %s8036_s6 }
   0x8   :  { %8077 = sst [smem:[#allocation21_spill]] %s8037_s7 }
   0x9   :  { %8078 = sst [smem:[#allocation22_spill]] %s8038_s8 }
   0xa   :  { %26 = vsyncpa [#allocation3], 0 }
   0xb   :  { %28 = vsyncpa [#allocation3 + $0x1], 0 }
   0xc   :  { %29 = vsyncpa [#allocation5], 0 }
   0xd   :  { %31 = vsyncpa [#allocation5 + $0x1], 0  ;;  %s6317_s1 = smov 0   ;;  %s6319_s22 = smov 0  }
   0xe   :  { %s6321_s23 = smov 0   ;;  %s6323_s24 = smov 0  }
   0xf LB: > { %8079 = sst [smem:[#allocation8_spill]] %s6191_s1  ;;  %s6338_s2 = sadd.s32 4294967295, %s6203_s24   ;;  %s6203_s24 = sphi %s6323_s24, %s8103_s24   ;;  %s6199_s23 = sphi %s6321_s23, %s8105_s23   ;;  %s6195_s22 = sphi %s6319_s22, %s8107_s22   ;;  %s6191_s1 = sphi %s6317_s1, %s8106_s1  }
  0x10   : > { %8080 = sst [smem:[#allocation9_spill]] %s6199_s23  ;;  %s4774_s25 = sadd.s32 4294967294, %s6203_s24  }
  0x11   : > { %8081 = sst [smem:[#allocation10_spill]] %s6203_s24  ;;  %s6342_s3 = sadd.s32 1, %s6203_s24  }
  0x12   : > { %8082 = sst [smem:[#allocation11_spill]] %s6342_s3  ;;  %s448_s26 = sadd.s32 1, %s6199_s23 }
  0x13   : > { %s445_s27 = ssub.s32 %s6203_s24, %s6342_s3  ;;  %p458_p0 = scmp.ne.s32.totalorder %s6199_s23, %s6195_s22 }
  0x14   : > { %p446_p1 = scmp.eq.s32.totalorder %s445_s27, 0  ;;  %p459_p2 = scmp.eq.s32.totalorder %s6338_s2, 1 }
  0x15   : > { %p464_p3 = scmp.ne.s32.totalorder %s6195_s22, %s6191_s1  ;;  %p465_p4 = scmp.eq.s32.totalorder %s4774_s25, 1 }
  0x16   : > { %s6353_s28 = scalar_select %p446_p1, %s6199_s23, %s448_s26  }
  0x17   : > { %p6355_p5 = por %p459_p2, %p458_p0  ;;  %p6359_p6 = por %p465_p4, %p464_p3 }
  0x18   : > { %8083 = sst [smem:[#allocation12_spill]] %s6353_s28  ;;  %p4777_p7 = scmp.ge.s32.totalorder %s6203_s24, 1 }
  0x19   : > { %s8085_s29 = scalar_select %p6359_p6, 1, 0 }
  0x1a   : > { %p571_p8 = scmp.lt.s32.totalorder %s6203_s24, 3 }
  0x1b   : > { %8086 = sst [smem:[#allocation13_spill]] %s8085_s29 }
  0x1c   : > { %p572_p9 = pnand %p4777_p7, %p571_p8 }
  0x1d   : > { %s8087_s21 = sld [smem:[#allocation15_spill]] (!%p572_p9)  ;;  %p632_p10 = scmp.lt.s32.totalorder (!%p572_p9), %s6338_s2, 1 }
  0x1e   : > { %575 = sbr.rel (%p572_p9) target bundleno = 8258 (0x2042), region = 96  ;;  %s8088_s24 = sld [smem:[#allocation14_spill]] (!%p572_p9) }
  0x1f   : > { %s8090_s5 = sld [smem:[#allocation19_spill]] (!%p572_p9)  ;;  %s8065_s1 = smov (!%p572_p9), 120  }
  0x20   : > { %s8091_s26 = sld [smem:[#allocation17_spill]] (!%p572_p9)  ;;  %s8097_s29 = smov (!%p572_p9), 112  }
  0x21   : > { %s8093_s6 = sld [smem:[#allocation20_spill]] (!%p572_p9)  ;;  %s7873_s28 = sand.u32 (!%p572_p9), 1, %s6195_s22  }
  0x22   : > { %s8094_s7 = sld [smem:[#allocation21_spill]] (!%p572_p9)  ;;  %s4666_s0 = scalar_lea.sflag (!%p572_p9), [#allocation5], %s7873_s28 }
  0x23   : > { %v658_v0 = vld [vmem:[%s8087_s21 + $0x78] sm:$0xff]  ;;  %v6205_v1 = vmov 0.0   ;;  %v657_v2 = vld [vmem:[%s8087_s21 + $0x70] sm:$0xff]  ;;  %vm6206_vm0 = vmmov 0   ;;  %v656_v3 = vld [vmem:[%s8087_s21 + $0x68] sm:$0xff]  ;;  %s633_s23 = scalar_select %p632_p10, %s6338_s2, 1  ;;  %v637_v45 = vlaneseq }
  0x24   : > { %5273 = vmatprep.subr.mxu0 %v6205_v1  ;;  %5305 = vmatprep.mubr.msk.f32.mxu0 %vm6206_vm0, %v6205_v1  ;;  %v655_v4 = vld [vmem:[%s8087_s21 + $0x60] sm:$0xff]  ;;  %v654_v5 = vld [vmem:[%s8087_s21 + $0x58] sm:$0xff]  ;;  %v653_v6 = vld [vmem:[%s8087_s21 + $0x50] sm:$0xff]  ;;  %vm748_vm1 = vcmask 1040384   ;;  %vm1035_vm3 = vcmask 64512   ;;  %vm1134_vm4 = vcmask 138240  }
  0x25   : > { %5274 = vmatpush3.msra.mxu0 %v658_v0  ;;  %932 = vmatprep.mubr.f32.mxu1 %v6205_v1  ;;  %v652_v7 = vld [vmem:[%s8087_s21 + $0x48] sm:$0xff]  ;;  %v651_v8 = vld [vmem:[%s8087_s21 + $0x40] sm:$0xff]  ;;  %v650_v9 = vld [vmem:[%s8087_s21 + $0x38] sm:$0xff]  ;;  %s5929_s3 = smul.u32 24, %s633_s23  ;;  %v6504_v46 = vand.u32 127, %v637_v45  ;;  %vm1141_vm5 = vcmask 131072  }
  0x26   : > { %5275 = vmatprep.subr.mxu0 %v6205_v1  ;;  %v649_v10 = vld [vmem:[%s8087_s21 + $0x30] sm:$0xff]  ;;  %v648_v11 = vld [vmem:[%s8087_s21 + $0x28] sm:$0xff]  ;;  %v647_v12 = vld [vmem:[%s8087_s21 + $0x20] sm:$0xff]  ;;  %s8061_s23 = smov 104   ;;  %s8095_s8 = sld [smem:[#allocation22_spill]] }
  0x27   : > { %5276 = vmatpush3.msra.mxu0 %v657_v2  ;;  %v646_v13 = vld [vmem:[%s8087_s21 + $0x18] sm:$0xff]  ;;  %v645_v14 = vld [vmem:[%s8087_s21 + $0x10] sm:$0xff]  ;;  %v644_v15 = vld [vmem:[%s8087_s21 + $0x8] sm:$0xff]  ;;  %s636_s30 = scalar_lea.vmem %s8088_s24, %s5929_s3  ;;  %s8089_s3 = sld [smem:[#allocation16_spill]]  ;;  %vm639_vm2 = vcmp.lt.s32.totalorder %v6504_v46, 32 }
  0x28   : > { %5277 = vmatprep.subr.mxu0 %v6205_v1  ;;  %v643_v16 = vld [vmem:[%s8087_s21] sm:$0xff]  ;;  %v641_v18 = vld [vmem:[%s636_s30 + $0x8] sm:$0xff]  ;;  %v642_v19 = vld [vmem:[%s636_s30 + $0x10] sm:$0x1]  ;;  %s8063_s24 = smov 112  }
  0x29   : > { %5278 = vmatpush3.msra.mxu0 %v656_v3  ;;  %v640_v17 = vld [vmem:[%s636_s30] sm:$0xff]  ;;  %v849_v33 = vld [vmem:[%s8090_s5 + $0x170] sm:$0xff]  ;;  %v848_v34 = vld [vmem:[%s8090_s5 + $0x168] sm:$0xff]  ;;  %s8092_s30 = sld [smem:[#allocation18_spill]] }
  0x2a   : > { %5279 = vmatprep.subr.mxu0 %v6205_v1  ;;  %v850_v35 = vld [vmem:[%s8090_s5 + $0x178] sm:$0xff]  ;;  %868 = vmatprep.subr.mxu1 %v849_v33  ;;  %v845_v37 = vld [vmem:[%s8090_s5 + $0x150] sm:$0xff]  ;;  %v847_v38 = vld [vmem:[%s8090_s5 + $0x160] sm:$0xff] }
  0x2b   : > { %5280 = vmatpush3.msra.mxu0 %v655_v4  ;;  %v846_v36 = vld [vmem:[%s8090_s5 + $0x158] sm:$0xff]  ;;  %869 = vmatpush1.msra.mxu1 %v848_v34  ;;  %v843_v39 = vld [vmem:[%s8090_s5 + $0x140] sm:$0xff]  ;;  %v844_v40 = vld [vmem:[%s8090_s5 + $0x148] sm:$0xff] }
  0x2c   : > { %5281 = vmatprep.subr.mxu0 %v6205_v1  ;;  %870 = vmatprep.subr.mxu1 %v846_v36  ;;  %v842_v41 = vld [vmem:[%s8090_s5 + $0x138] sm:$0xff]  ;;  %v840_v42 = vld [vmem:[%s8090_s5 + $0x128] sm:$0xff]  ;;  %v841_v43 = vld [vmem:[%s8090_s5 + $0x130] sm:$0xff] }
  0x2d   : > { %5282 = vmatpush3.msra.mxu0 %v654_v5  ;;  %v659_v20 = vld [vmem:[%s8089_s3] sm:$0xff]  ;;  %v660_v24 = vld [vmem:[%s8089_s3 + $0x8] sm:$0xff]  ;;  %v661_v28 = vld [vmem:[%s8089_s3 + $0x10] sm:$0x1]  ;;  %871 = vmatpush1.msra.mxu1 %v845_v37  ;;  %s8098_s3 = smov 104  }
  0x2e   : > { %5283 = vmatprep.subr.mxu0 %v6205_v1  ;;  %872 = vmatprep.subr.mxu1 %v843_v39  ;;  %v839_v44 = vld [vmem:[%s8090_s5 + $0x120] sm:$0xff]  ;;  %v837_v63 = vld [vmem:[%s8090_s5 + $0x110] sm:$0xff]  ;;  %v836_v0 = vld [vmem:[%s8090_s5 + $0x108] sm:$0xff] }
  0x2f   : > { %5284 = vmatpush3.msra.mxu0 %v653_v6  ;;  %873 = vmatpush1.msra.mxu1 %v842_v41  ;;  %v838_v2 = vld [vmem:[%s8090_s5 + $0x118] sm:$0xff]  ;;  %v833_v4 = vld [vmem:[%s8090_s5 + $0xf0] sm:$0xff]  ;;  %v835_v5 = vld [vmem:[%s8090_s5 + $0x100] sm:$0xff] }
  0x30   : > { %5285 = vmatprep.subr.mxu0 %v6205_v1  ;;  %874 = vmatprep.subr.mxu1 %v840_v42  ;;  %v834_v3 = vld [vmem:[%s8090_s5 + $0xf8] sm:$0xff]  ;;  %v831_v6 = vld [vmem:[%s8090_s5 + $0xe0] sm:$0xff]  ;;  %v804_v36 = vld [vmem:[%s8090_s5 + $0x8] sm:$0xff] }
  0x31   : > { %5286 = vmatpush3.msra.mxu0 %v652_v7  ;;  %875 = vmatpush1.msra.mxu1 %v839_v44  ;;  %v830_v7 = vld [vmem:[%s8090_s5 + $0xd8] sm:$0xff]  ;;  %v807_v33 = vld [vmem:[%s8090_s5 + $0x20] sm:$0xff] }
  0x32   : > { %5287 = vmatprep.subr.mxu0 %v6205_v1  ;;  %876 = vmatprep.subr.mxu1 %v837_v63  ;;  %v806_v34 = vld [vmem:[%s8090_s5 + $0x18] sm:$0xff]  ;;  %v803_v37 = vld [vmem:[%s8090_s5] sm:$0xff] }
  0x33   : > { %5288 = vmatpush3.msra.mxu0 %v651_v8  ;;  %877 = vmatpush1.msra.mxu1 %v836_v0  ;;  %v832_v8 = vld [vmem:[%s8090_s5 + $0xe8] sm:$0xff]  ;;  %v4584_v46 = vld [vmem:[%s8047_s17 + $0x60] sm:$0xff] }
  0x34   : > { %5289 = vmatprep.subr.mxu0 %v6205_v1  ;;  %878 = vmatprep.subr.mxu1 %v834_v3 }
  0x35   : > { %5290 = vmatpush3.msra.mxu0 %v650_v9  ;;  %879 = vmatpush1.msra.mxu1 %v833_v4  ;;  %v828_v9 = vld [vmem:[%s8090_s5 + $0xc8] sm:$0xff] }
  0x36   : > { %5291 = vmatprep.subr.mxu0 %v6205_v1  ;;  %880 = vmatprep.subr.mxu1 %v831_v6 }
  0x37   : > { %5292 = vmatpush3.msra.mxu0 %v649_v10  ;;  %881 = vmatpush1.msra.mxu1 %v830_v7  ;;  %v827_v10 = vld [vmem:[%s8090_s5 + $0xc0] sm:$0xff]  ;;  %v6667_v7 = vshrl.u32 %v637_v45, 7 }
  0x38   : > { %5293 = vmatprep.subr.mxu0 %v6205_v1  ;;  %882 = vmatprep.subr.mxu1 %v828_v9 }
  0x39   : > { %5294 = vmatpush3.msra.mxu0 %v648_v11  ;;  %v829_v11 = vld [vmem:[%s8090_s5 + $0xd0] sm:$0xff]  ;;  %883 = vmatpush1.msra.mxu1 %v827_v10  ;;  %v859_v9 = vsub.s32 1, %v6667_v7  ;;  %v855_v45 = vsub.s32 0, %v6667_v7 }
  0x3a   : > { %5295 = vmatprep.subr.mxu0 %v6205_v1 }
  0x3b   : > { %5296 = vmatpush3.msra.mxu0 %v647_v12  ;;  %v825_v12 = vld [vmem:[%s8090_s5 + $0xb0] sm:$0xff] }
  0x3c   : > { %5297 = vmatprep.subr.mxu0 %v6205_v1  ;;  %884 = vmatprep.subr.mxu1 %v825_v12 }
  0x3d   : > { %5298 = vmatpush3.msra.mxu0 %v646_v13  ;;  %v824_v13 = vld [vmem:[%s8090_s5 + $0xa8] sm:$0xff] }
  0x3e   : > { %5299 = vmatprep.subr.mxu0 %v6205_v1  ;;  %885 = vmatpush1.msra.mxu1 %v824_v13 }
  0x3f   : > { %5300 = vmatpush3.msra.mxu0 %v645_v14  ;;  %v826_v14 = vld [vmem:[%s8090_s5 + $0xb8] sm:$0xff] }
  0x40   : > { %5301 = vmatprep.subr.mxu0 %v6205_v1 }
  0x41   : > { %5302 = vmatpush3.msra.mxu0 %v644_v15  ;;  %v822_v15 = vld [vmem:[%s8090_s5 + $0x98] sm:$0xff] }
  0x42   : > { %5303 = vmatprep.subr.mxu0 %v6205_v1  ;;  %886 = vmatprep.subr.mxu1 %v822_v15 }
  0x43   : > { %5304 = vmatpush3.msra.mxu0 %v643_v16  ;;  %v821_v16 = vld [vmem:[%s8090_s5 + $0x90] sm:$0xff] }
  0x44   : > { %5306 = vmatmul.mubr.f32.vlgmr.msra.gmra.mxu0 %v640_v17  ;;  %5314 = vmatprep.subr.mxu0 %v6205_v1  ;;  %v823_v17 = vld [vmem:[%s8090_s5 + $0xa0] sm:$0xff] }
  0x45   : > { %5308 = vmatprep.mubr.msk.f32.mxu0 %vm6206_vm0, %v6205_v1  ;;  %5315 = vmatpush3.msra.mxu0 %v850_v35  ;;  %v808_v35 = vld [vmem:[%s8090_s5 + $0x28] sm:$0xff] }
  0x46   : > { %5316 = vmatprep.subr.mxu0 %v6205_v1  ;;  %887 = vmatpush1.msra.mxu1 %v821_v16 }
  0x47   : > { %5317 = vmatpush3.msra.mxu0 %v847_v38  ;;  %v805_v38 = vld [vmem:[%s8090_s5 + $0x10] sm:$0xff] }
  0x48   : > { %5309 = vmatmul.mubr.f32.gmra.mxu0 %v641_v18  ;;  %5318 = vmatprep.subr.mxu0 %v6205_v1  ;;  %v819_v18 = vld [vmem:[%s8090_s5 + $0x80] sm:$0xff] }
  0x49   : > { %5311 = vmatprep.mubr.msk.f32.mxu0 %vm6206_vm0, %v6205_v1  ;;  %5319 = vmatpush3.msra.mxu0 %v844_v40 }
  0x4a   : > { %5320 = vmatprep.subr.mxu0 %v6205_v1  ;;  %888 = vmatprep.subr.mxu1 %v819_v18 }
  0x4b   : > { %5321 = vmatpush3.msra.mxu0 %v841_v43 }
  0x4c   : > { %5312 = vmatmul.mubr.f32.gmra.mxu0 %v642_v19  ;;  %5322 = vmatprep.subr.mxu0 %v6205_v1  ;;  %v818_v19 = vld [vmem:[%s8090_s5 + $0x78] sm:$0xff] }
  0x4d   : > { %5346 = vmatprep.mubr.msk.f32.mxu0 %vm6206_vm0, %v6205_v1  ;;  %5323 = vmatpush3.msra.mxu0 %v838_v2 }
  0x4e   : > { %5324 = vmatprep.subr.mxu0 %v6205_v1  ;;  %889 = vmatpush1.msra.mxu1 %v818_v19  ;;  %v863_v19 = vsub.s32 2, %v6667_v7 }
  0x4f   : > { %5325 = vmatpush3.msra.mxu0 %v835_v5 }
  0x50   : > { %5326 = vmatprep.subr.mxu0 %v6205_v1 }
  0x51   : > { %5327 = vmatpush3.msra.mxu0 %v832_v8 }
  0x52   : > { %5328 = vmatprep.subr.mxu0 %v6205_v1 }
  0x53   : > { %5329 = vmatpush3.msra.mxu0 %v829_v11  ;;  %v851_v11 = vld [vmem:[%s8093_s6] sm:$0x7] }
  0x54   : > { %5330 = vmatprep.subr.mxu0 %v6205_v1 }
  0x55   : > { %5331 = vmatpush3.msra.mxu0 %v826_v14  ;;  %v860_v14 = vrot.slane %v851_v11, %v859_v9 }
  0x56   : > { %5332 = vmatprep.subr.mxu0 %v6205_v1 }
  0x57   : > { %5333 = vmatpush3.msra.mxu0 %v823_v17 }
  0x58   : > { %5334 = vmatprep.subr.mxu0 %v6205_v1 }
 0x104   : > { %v728_v21 = vpop.f32.mrf.mxu0 }
 0x105   : > { %v6447_v22 = vadd.f32 %v728_v21, %v659_v20  ;;  %v820_v20 = vld [vmem:[%s8090_s5 + $0x88] sm:$0xff] }
 0x106   : > { %v5307_v23 = vpop.f32.mrf.mxu0  ;;  %5335 = vmatpush3.msra.mxu0 %v820_v20  ;;  %v816_v21 = vld [vmem:[%s8090_s5 + $0x68] sm:$0xff]  ;;  %v856_v20 = vrot.slane %v851_v11, %v855_v45 }
 0x107   : > { %744 = vadd.xlane.f32.xlu0 %v6447_v22  ;;  %890 = vmatprep.subr.mxu1 %v816_v21  ;;  %v815_v23 = vld [vmem:[%s8090_s5 + $0x60] sm:$0xff] }
 0x108   : > { %v733_v25 = vpop.f32.mrf.mxu0  ;;  %5336 = vmatprep.subr.mxu0 %v6205_v1  ;;  %891 = vmatpush1.msra.mxu1 %v815_v23  ;;  %v864_v23 = vrot.slane %v851_v11, %v863_v19 }
 0x109   : > { %v6453_v26 = vadd.f32 %v733_v25, %v660_v24  ;;  %v817_v24 = vld [vmem:[%s8090_s5 + $0x70] sm:$0xff] }
 0x10a   : > { %v5310_v27 = vpop.f32.mrf.mxu0  ;;  %v813_v25 = vld [vmem:[%s8090_s5 + $0x50] sm:$0xff]  ;;  %5337 = vmatpush3.msra.mxu0 %v817_v24 }
 0x10b   : > { %746 = vadd.xlane.f32.xlu0 %v6453_v26  ;;  %v812_v27 = vld [vmem:[%s8090_s5 + $0x48] sm:$0xff]  ;;  %892 = vmatprep.subr.mxu1 %v813_v25 }
 0x10c   : > { %v738_v29 = vpop.f32.mrf.mxu0  ;;  %5338 = vmatprep.subr.mxu0 %v6205_v1  ;;  %893 = vmatpush1.msra.mxu1 %v812_v27 }
 0x10d   : > { %v6459_v30 = vadd.f32 %v738_v29, %v661_v28  ;;  %v814_v28 = vld [vmem:[%s8090_s5 + $0x58] sm:$0xff] }
 0x10e   : > { %v5313_v31 = vpop.f32.mrf.mxu0  ;;  %v810_v29 = vld [vmem:[%s8090_s5 + $0x38] sm:$0xff]  ;;  %5339 = vmatpush3.msra.mxu0 %v814_v28 }
 0x10f   : > { %v749_v32 = vsel %vm748_vm1, %v6459_v30, 0.0  ;;  %v809_v31 = vld [vmem:[%s8090_s5 + $0x30] sm:$0xff]  ;;  %894 = vmatprep.subr.mxu1 %v810_v29  ;;  %5340 = vmatprep.subr.mxu0 %v6205_v1 }
 0x110   : > { %750 = vadd.xlane.f32.xlu1 %v749_v32  ;;  %v811_v32 = vld [vmem:[%s8090_s5 + $0x40] sm:$0xff]  ;;  %895 = vmatpush1.msra.mxu1 %v809_v31 }
 0x111   : > { %5341 = vmatpush3.msra.mxu0 %v811_v32  ;;  %896 = vmatprep.subr.mxu1 %v807_v33 }
 0x112   : > { %5342 = vmatprep.subr.mxu0 %v6205_v1  ;;  %897 = vmatpush1.msra.mxu1 %v806_v34 }
 0x113   : > { %5343 = vmatpush3.msra.mxu0 %v808_v35  ;;  %898 = vmatprep.subr.mxu1 %v804_v36 }
 0x114   : > { %5344 = vmatprep.subr.mxu0 %v6205_v1  ;;  %899 = vmatpush1.msra.mxu1 %v803_v37 }
 0x115   : > { %5345 = vmatpush3.msra.mxu0 %v805_v38  ;;  %5355 = vmatprep.subr.mxu1 %v6205_v1 }
 0x116   : > { %5385 = vmatprep.subr.mxu0 %v6205_v1 }
 0x190   : > { %v745_v47 = vpop.xlane.xlu0 %744 }
 0x191   : > { %v752_v48 = vmul.f32 0.03125, %v745_v47 }
 0x193   : > { %v6508_v49 = vsub.f32 %v6447_v22, %v752_v48 }
 0x194   : > { %v747_v50 = vpop.xlane.xlu0 %746 }
 0x195   : > { %v753_v51 = vmul.f32 0.03125, %v747_v50  ;;  %v760_v52 = vsel %vm639_vm2, %v6508_v49, 0.0 }
 0x196   : > { %v763_v53 = vmul.f32 %v760_v52, %v760_v52  ;;  %v4779_v52 = vld [vmem:[%s8091_s26] ss:$0 sm:$0xff] }
 0x197   : > { %v6514_v54 = vsub.f32 %v6453_v26, %v753_v51 }
 0x198   : > { %766 = vadd.xlane.f32.xlu1 %v763_v53 }
 0x199   : > { %v751_v55 = vpop.xlane.xlu1 %750  ;;  %v761_v56 = vsel %vm639_vm2, %v6514_v54, 0.0 }
 0x19a   : > { %v754_v57 = vmul.f32 0.03125, %v751_v55  ;;  %v764_v58 = vmul.f32 %v761_v56, %v761_v56  ;;  %v4780_v55 = vld [vmem:[%s8092_s30] ss:$0 sm:$0xff] }
 0x19c   : > { %v6520_v59 = vsub.f32 %v6459_v30, %v754_v57  ;;  %768 = vadd.xlane.f32.xlu0 %v764_v58 }
 0x19e   : > { %v762_v60 = vsel %vm639_vm2, %v6520_v59, 0.0 }
 0x19f   : > { %v765_v61 = vmul.f32 %v762_v60, %v762_v60 }
 0x1a1   : > { %v770_v62 = vsel %vm748_vm1, %v765_v61, 0.0 }
 0x1a2   : > { %771 = vadd.xlane.f32.xlu1 %v770_v62 }
 0x221   : > { %v767_v39 = vpop.xlane.xlu1 %766 }
 0x222   : > { %v773_v40 = vmul.f32 0.03125, %v767_v39 }
 0x224   : > { %v776_v41 = vadd.f32 1e-05, %v773_v40 }
 0x225   : > { %v769_v42 = vpop.xlane.xlu0 %768 }
 0x226   : > { %5979 = vrsqrt.f32 %v776_v41  ;;  %v774_v43 = vmul.f32 0.03125, %v769_v42 }
 0x228   : > { %v777_v44 = vadd.f32 1e-05, %v774_v43 }
 0x22a   : > { %5981 = vrsqrt.f32 %v777_v44 }
 0x22b   : > { %v772_v47 = vpop.xlane.xlu1 %771 }
 0x22c   : > { %v775_v48 = vmul.f32 0.03125, %v772_v47 }
 0x22e   : > { %v778_v50 = vadd.f32 1e-05, %v775_v48 }
 0x230   : > { %5983 = vrsqrt.f32 %v778_v50 }
 0x233   : > { %v5980_v51 = vpop.eup %5979 }
 0x234   : > { %v782_v53 = vmul.f32 %v5980_v51, %v6508_v49 }
 0x236   : > { %v791_v56 = vmul.f32 %v4779_v52, %v782_v53 }
 0x237   : > { %v5982_v57 = vpop.eup %5981 }
 0x238   : > { %v800_v58 = vadd.f32 %v4780_v55, %v791_v56  ;;  %v783_v60 = vmul.f32 %v5982_v57, %v6514_v54 }
 0x23a   : > { %933 = vmatmul.mubr.f32.vlgmr.msra.gmra.mxu1 %v800_v58  ;;  %5347 = vmatmul.mubr.f32.vlgmr.msra.gmra.mxu0 %v800_v58  ;;  %v792_v61 = vmul.f32 %v4779_v52, %v783_v60 }
 0x23b   : > { %938 = vmatprep.mubr.f32.mxu1 %v6205_v1  ;;  %5349 = vmatprep.mubr.msk.f32.mxu0 %vm6206_vm0, %v6205_v1 }
 0x23c   : > { %v801_v62 = vadd.f32 %v4780_v55, %v792_v61 }
 0x23d   : > { %v5984_v63 = vpop.eup %5983 }
 0x23e   : > { %939 = vmatmul.mubr.f32.gmra.mxu1 %v801_v62  ;;  %5350 = vmatmul.mubr.f32.gmra.mxu0 %v801_v62  ;;  %v784_v49 = vmul.f32 %v5984_v63, %v6520_v59 }
 0x23f   : > { %944 = vmatprep.mubr.f32.mxu1 %v6205_v1  ;;  %5352 = vmatprep.mubr.msk.f32.mxu0 %vm6206_vm0, %v6205_v1 }
 0x240   : > { %v793_v54 = vmul.f32 %v4779_v52, %v784_v49 }
 0x242   : > { %v802_v0 = vadd.f32 %v4780_v55, %v793_v54 }
 0x244   : > { %945 = vmatmul.mubr.f32.gmra.mxu1 %v802_v0  ;;  %5353 = vmatmul.mubr.f32.gmra.mxu0 %v802_v0 }
 0x245   : > { %5361 = vmatprep.mubr.msk.f32.mxu1 %vm6206_vm0, %v6205_v1  ;;  %5391 = vmatprep.mubr.msk.f32.mxu0 %vm6206_vm0, %v6205_v1 }
 0x2fa   : > { %v934_v2 = vpop.f32.mrf.mxu1  ;;  %v1017_v3 = vpop.f32.mrf.mxu0 }
 0x2fb   : > { %v6695_v24 = vadd.f32 %v934_v2, %v856_v20  ;;  %v6711_v29 = vadd.f32 %v1017_v3, %v864_v23 }
 0x2fc   : > { %v936_v4 = vpop.f32.mrf.mxu1  ;;  %v5348_v5 = vpop.f32.mrf.mxu0 }
 0x2fd   : > { %v6689_v21 = vadd.f32 %v936_v4, %v860_v14 }
 0x2fe   : > { %v940_v59 = vpop.f32.mrf.mxu1  ;;  %v1022_v6 = vpop.f32.mrf.mxu0 }
 0x2ff   : > { %v6702_v27 = vadd.f32 %v1022_v6, %v864_v23  ;;  %v6708_v28 = vadd.f32 %v940_v59, %v856_v20 }
 0x300   : > { %v5351_v8 = vpop.f32.mrf.mxu0  ;;  %v942_v10 = vpop.f32.mrf.mxu1 }
 0x301   : > { %v6681_v18 = vadd.f32 %v942_v10, %v860_v14 }
 0x304   : > { %v946_v12 = vpop.f32.mrf.mxu1  ;;  %v1027_v13 = vpop.f32.mrf.mxu0 }
 0x305   : > { %v6698_v25 = vadd.f32 %v1027_v13, %v864_v23  ;;  %v6720_v31 = vadd.f32 %v946_v12, %v856_v20 }
 0x306   : > { %v948_v15 = vpop.f32.mrf.mxu1  ;;  %v5354_v16 = vpop.f32.mrf.mxu0 }
 0x307   : > { %v6675_v17 = vadd.f32 %v948_v15, %v860_v14 }
 0x309   : > { %5356 = vmatpush3.xpose.msk.msra.mxu1 %vm1035_vm3, %v6675_v17 }
 0x30a   : > { %5357 = vmatprep.subr.mxu1 %v6205_v1 }
 0x30d   : > { %5358 = vmatpush3.xpose.msk.msra.mxu1 %vm1035_vm3, %v6681_v18 }
 0x30e   : > { %5359 = vmatprep.subr.mxu1 %v6205_v1 }
 0x311   : > { %5360 = vmatpush3.xpose.msk.msra.mxu1 %vm1035_vm3, %v6689_v21 }
 0x312   : > { %5370 = vmatprep.subr.mxu1 %v6205_v1 }
 0x314   : > { %5362 = vmatmul.mubr.msk.f32.vlgmr.msra.gmra.mxu1 %vm1035_vm3, %v6695_v24 }
 0x315   : > { %5371 = vmatpush3.msk.msra.mxu1 %vm748_vm1, %v6698_v25  ;;  %5364 = vmatprep.mubr.msk.f32.mxu1 %vm6206_vm0, %v6205_v1 }
 0x316   : > { %5372 = vmatprep.subr.mxu1 %v6205_v1 }
 0x317   : > { %5373 = vmatpush3.msra.mxu1 %v6702_v27 }
 0x318   : > { %5365 = vmatmul.mubr.msk.f32.gmra.mxu1 %vm1035_vm3, %v6708_v28  ;;  %5374 = vmatprep.subr.mxu1 %v6205_v1 }
 0x319   : > { %5375 = vmatpush3.msra.mxu1 %v6711_v29  ;;  %5367 = vmatprep.mubr.msk.f32.mxu1 %vm6206_vm0, %v6205_v1 }
 0x31a   : > { %5923 = vmatprep.subr.mxu1 %v6205_v1 }
 0x31c   : > { %5368 = vmatmul.mubr.msk.f32.gmra.mxu1 %vm1035_vm3, %v6720_v31 }
 0x31d   : > { %5376 = vmatprep.mubr.msk.f32.mxu1 %vm6206_vm0, %v6205_v1 }
 0x3d4   : > { %v1120_v32 = vpop.f32.mrf.mxu1 }
 0x3d5   : > { %v1135_v33 = vsel %vm1134_vm4, %v1120_v32, -inf }
 0x3d6   : > { %1136 = vmax.xlane.f32.xlu0 %v1135_v33  ;;  %v5363_v34 = vpop.f32.mrf.mxu1 }
 0x3d8   : > { %v1125_v35 = vpop.f32.mrf.mxu1 }
 0x3d9   : > { %v1138_v36 = vsel %vm1134_vm4, %v1125_v35, -inf }
 0x3da   : > { %1139 = vmax.xlane.f32.xlu1 %v1138_v36  ;;  %v5366_v37 = vpop.f32.mrf.mxu1 }
 0x3dc   : > { %v1130_v38 = vpop.f32.mrf.mxu1 }
 0x3dd   : > { %v1142_v39 = vsel %vm1141_vm5, %v1130_v38, -inf }
 0x3de   : > { %1143 = vmax.xlane.f32.xlu0 %v1142_v39  ;;  %v5369_v40 = vpop.f32.mrf.mxu1 }
 0x45f   : > { %v1137_v41 = vpop.xlane.xlu0 %1136 }
 0x460   : > { %v1145_v42 = vsub.f32 %v1120_v32, %v1137_v41 }
 0x462   : > { %v1148_v43 = vmul.f32 1.442695, %v1145_v42 }
 0x463   : > { %v1140_v44 = vpop.xlane.xlu1 %1139 }
 0x464   : > { %5985 = vpow2.f32 %v1148_v43  ;;  %v1146_v47 = vsub.f32 %v1125_v35, %v1140_v44 }
 0x466   : > { %v1150_v48 = vmul.f32 1.442695, %v1146_v47 }
 0x467   : > { %v1144_v55 = vpop.xlane.xlu0 %1143 }
 0x468   : > { %5987 = vpow2.f32 %v1150_v48  ;;  %v1147_v56 = vsub.f32 %v1130_v38, %v1144_v55 }
 0x46a   : > { %v1152_v57 = vmul.f32 1.442695, %v1147_v56 }
 0x46c   : > { %5989 = vpow2.f32 %v1152_v57 }
 0x471   : > { %v5986_v50 = vpop.eup %5985 }
 0x472   : > { %v1154_v51 = vsel %vm1134_vm4, %v5986_v50, 0.0 }
 0x473   : > { %1155 = vadd.xlane.f32.xlu1 %v1154_v51 }
 0x475   : > { %v5988_v52 = vpop.eup %5987 }
 0x476   : > { %v1157_v53 = vsel %vm1134_vm4, %v5988_v52, 0.0 }
 0x477   : > { %1158 = vadd.xlane.f32.xlu0 %v1157_v53 }
 0x479   : > { %v5990_v58 = vpop.eup %5989 }
 0x47a   : > { %v1160_v60 = vsel %vm1141_vm5, %v5990_v58, 0.0 }
 0x484   : > { %1269 = vrot.lane.b32.xlu1 %v6681_v18, %s8065_s1 }
 0x488   : > { %1267 = vrot.lane.b32.xlu1 %v6689_v21, %s8065_s1 }
 0x48c   : > { %1261 = vrot.lane.b32.xlu1 %v6695_v24, %s8065_s1 }
 0x48d   : > { %1271 = vrot.lane.b32.xlu0 %v6675_v17, %s8065_s1 }
 0x491   : > { %1263 = vrot.lane.b32.xlu0 %v6708_v28, %s8065_s1 }
 0x4b0   : > { %1161 = vadd.xlane.f32.xlu1 %v1160_v60  ;;  %v1032_v60 = vld [vmem:[%s8094_s7 + $0x8] sm:$0xff] }
 0x4c1   : > { %1265 = vrot.lane.b32.xlu1 %v6720_v31, %s8065_s1 }
 0x4fc   : > { %v1156_v61 = vpop.xlane.xlu1 %1155 }
 0x4fd   : > { %5991 = vrcp.f32 %v1156_v61 }
 0x500   : > { %v1159_v62 = vpop.xlane.xlu0 %1158  ;;  %v1270_v63 = vpop.permute.xlu1 %1269 }
 0x501   : > { %5993 = vrcp.f32 %v1159_v62 }
 0x504   : > { %v1272_v49 = vpop.permute.xlu0 %1271  ;;  %v1268_v54 = vpop.permute.xlu1 %1267 }
 0x505   : > { %5386 = vmatpush3.xpose.msk.msra.mxu0 %vm1035_vm3, %v1272_v49 }
 0x506   : > { %5387 = vmatprep.subr.mxu0 %v6205_v1 }
 0x508   : > { %v1262_v4 = vpop.permute.xlu1 %1261  ;;  %v1264_v59 = vpop.permute.xlu0 %1263 }
 0x509   : > { %5388 = vmatpush3.xpose.msk.msra.mxu0 %vm1035_vm3, %v1270_v63 }
 0x50a   : > { %v5992_v0 = vpop.eup %5991  ;;  %5389 = vmatprep.subr.mxu0 %v6205_v1 }
 0x50b   : > { %v1166_v2 = vmul.f32 %v5992_v0, %v5986_v50 }
 0x50d   : > { %5377 = vmatmul.mubr.msk.f32.vlgmr.msra.gmra.mxu1 %vm1134_vm4, %v1166_v2  ;;  %5390 = vmatpush3.xpose.msk.msra.mxu0 %vm1035_vm3, %v1268_v54 }
 0x50e   : > { %v5994_v3 = vpop.eup %5993  ;;  %5926 = vmatpush3.xpose.msk.msra.mxu1 %vm1035_vm3, %v1272_v49  ;;  %5379 = vmatprep.mubr.msk.f32.mxu1 %vm6206_vm0, %v6205_v1 }
 0x50f   : > { %5924 = vmatprep.subr.mxu1 %v6205_v1  ;;  %v1167_v5 = vmul.f32 %v5994_v3, %v5988_v52  ;;  %5400 = vmatprep.subr.mxu0 %v6205_v1 }
 0x510   : > { %5392 = vmatmul.mubr.msk.f32.vlgmr.msra.gmra.mxu0 %vm1035_vm3, %v1262_v4  ;;  %v1031_v4 = vld [vmem:[%s8094_s7] sm:$0xff] }
 0x511   : > { %5380 = vmatmul.mubr.msk.f32.gmra.mxu1 %vm1134_vm4, %v1167_v5  ;;  %5394 = vmatprep.mubr.msk.f32.mxu0 %vm6206_vm0, %v6205_v1 }
 0x512   : > { %5927 = vmatpush3.xpose.msk.msra.mxu1 %vm1035_vm3, %v1270_v63  ;;  %5382 = vmatprep.mubr.msk.f32.mxu1 %vm6206_vm0, %v6205_v1 }
 0x513   : > { %5925 = vmatprep.subr.mxu1 %v6205_v1 }
 0x514   : > { %5395 = vmatmul.mubr.msk.f32.gmra.mxu0 %vm1035_vm3, %v1264_v59 }
 0x515   : > { %5406 = vmatprep.mubr.msk.f32.mxu0 %vm6206_vm0, %v6205_v1 }
 0x516   : > { %5928 = vmatpush3.xpose.msk.msra.mxu1 %vm1035_vm3, %v1268_v54 }
 0x517   : > { %5415 = vmatprep.subr.mxu1 %v6205_v1 }
 0x539   : > { %v1162_v6 = vpop.xlane.xlu1 %1161 }
 0x53a   : > { %5995 = vrcp.f32 %v1162_v6 }
 0x53d   : > { %v1266_v11 = vpop.permute.xlu1 %1265 }
 0x547   : > { %v5996_v8 = vpop.eup %5995 }
 0x548   : > { %v1168_v10 = vmul.f32 %v5996_v8, %v5990_v58 }
 0x54a   : > { %5383 = vmatmul.mubr.msk.f32.gmra.mxu1 %vm1134_vm4, %v1168_v10 }
 0x54b   : > { %5397 = vmatprep.mubr.msk.f32.mxu1 %vm6206_vm0, %v6205_v1 }
 0x54e   : > { %5398 = vmatmul.mubr.msk.f32.vlgmr.msra.gmra.mxu1 %vm1035_vm3, %v1266_v11 }
 0x54f   : > { %5417 = vmatprep.mubr.msk.f32.mxu1 %vm6206_vm0, %v6205_v1  ;;  %5416 = vmatpush3.msra.mxu1 %v1032_v60 }
 0x550   : > { %5437 = vmatprep.subr.mxu1 %v6205_v1 }
 0x5cd   : > { %v6775_v12 = vpop.f32.mrf.mxu1 }
 0x5cf   : > { %v5378_v13 = vpop.f32.mrf.mxu1 }
 0x5d0   : > { %v1351_v14 = vpop.f32.mrf.mxu0 }
 0x5d1   : > { %v6777_v15 = vpop.f32.mrf.mxu1  ;;  %v1365_v16 = vsel %vm1134_vm4, %v1351_v14, -inf }
 0x5d2   : > { %1366 = vmax.xlane.f32.xlu0 %v1365_v16  ;;  %v5393_v20 = vpop.f32.mrf.mxu0 }
 0x5d3   : > { %v5381_v23 = vpop.f32.mrf.mxu1 }
 0x5d4   : > { %v1356_v32 = vpop.f32.mrf.mxu0 }
 0x5d5   : > { %v1368_v33 = vsel %vm1134_vm4, %v1356_v32, -inf }
 0x5d6   : > { %1369 = vmax.xlane.f32.xlu1 %v1368_v33  ;;  %v5396_v34 = vpop.f32.mrf.mxu0 }
 0x5e7   : > { %1402 = vrot.lane.b32.xlu1 %v6702_v27, %s8065_s1 }
 0x60a   : > { %v6783_v35 = vpop.f32.mrf.mxu1 }
 0x60c   : > { %v5384_v36 = vpop.f32.mrf.mxu1 }
 0x60e   : > { %v1361_v37 = vpop.f32.mrf.mxu1 }
 0x60f   : > { %v1371_v38 = vsel %vm1141_vm5, %v1361_v37, -inf }
 0x610   : > { %v5399_v39 = vpop.f32.mrf.mxu1  ;;  %1372 = vmax.xlane.f32.xlu0 %v1371_v38 }
 0x65b   : > { %v1367_v40 = vpop.xlane.xlu0 %1366 }
 0x65c   : > { %v1374_v41 = vsub.f32 %v1351_v14, %v1367_v40 }
 0x65e   : > { %v1377_v42 = vmul.f32 1.442695, %v1374_v41 }
 0x65f   : > { %v1370_v43 = vpop.xlane.xlu1 %1369 }
 0x660   : > { %5997 = vpow2.f32 %v1377_v42  ;;  %v1375_v44 = vsub.f32 %v1356_v32, %v1370_v43 }
 0x662   : > { %v1379_v47 = vmul.f32 1.442695, %v1375_v44 }
 0x663   : > { %v1403_v49 = vpop.permute.xlu1 %1402 }
 0x664   : > { %5999 = vpow2.f32 %v1379_v47 }
 0x66d   : > { %v5998_v48 = vpop.eup %5997 }
 0x66e   : > { %v1383_v50 = vsel %vm1134_vm4, %v5998_v48, 0.0 }
 0x66f   : > { %1384 = vadd.xlane.f32.xlu0 %v1383_v50 }
 0x671   : > { %v6000_v51 = vpop.eup %5999 }
 0x672   : > { %v1386_v52 = vsel %vm1134_vm4, %v6000_v51, 0.0 }
 0x673   : > { %1387 = vadd.xlane.f32.xlu0 %v1386_v52 }
 0x689   : > { %1404 = vrot.lane.b32.xlu0 %v6698_v25, %s8065_s1 }
 0x68d   : > { %1685 = vrot.lane.b32.xlu0 %v6681_v18, %s8063_s24 }
 0x691   : > { %1677 = vrot.lane.b32.xlu0 %v6695_v24, %s8063_s24 }
 0x695   : > { %1681 = vrot.lane.b32.xlu0 %v6720_v31, %s8063_s24 }
 0x699   : > { %v1373_v53 = vpop.xlane.xlu0 %1372 }
 0x69a   : > { %v1376_v55 = vsub.f32 %v1361_v37, %v1373_v53 }
 0x69c   : > { %v1381_v56 = vmul.f32 1.442695, %v1376_v55 }
 0x69e   : > { %6001 = vpow2.f32 %v1381_v56 }
 0x6ab   : > { %v6002_v57 = vpop.eup %6001 }
 0x6ac   : > { %v1389_v58 = vsel %vm1141_vm5, %v6002_v57, 0.0 }
 0x6ad   : > { %1390 = vadd.xlane.f32.xlu1 %v1389_v58 }
 0x6be   : > { %1400 = vrot.lane.b32.xlu1 %v6711_v29, %s8065_s1 }
 0x6c2   : > { %1687 = vrot.lane.b32.xlu1 %v6675_v17, %s8063_s24 }
 0x6c6   : > { %1683 = vrot.lane.b32.xlu1 %v6689_v21, %s8063_s24 }
 0x6ca   : > { %1679 = vrot.lane.b32.xlu1 %v6708_v28, %s8063_s24 }
 0x6f8   : > { %v1385_v61 = vpop.xlane.xlu0 %1384 }
 0x6f9   : > { %6003 = vrcp.f32 %v1385_v61 }
 0x6fc   : > { %v1388_v62 = vpop.xlane.xlu0 %1387 }
 0x6fd   : > { %6005 = vrcp.f32 %v1388_v62 }
 0x700   : > { %v1405_v63 = vpop.permute.xlu0 %1404 }
 0x701   : > { %5401 = vmatpush3.msk.msra.mxu0 %vm748_vm1, %v1405_v63 }
 0x702   : > { %5402 = vmatprep.subr.mxu0 %v6205_v1 }
 0x703   : > { %5403 = vmatpush3.msra.mxu0 %v1403_v49 }
 0x704   : > { %5404 = vmatprep.subr.mxu0 %v6205_v1  ;;  %v1686_v14 = vpop.permute.xlu0 %1685 }
 0x706   : > { %v6004_v0 = vpop.eup %6003 }
 0x707   : > { %v1395_v2 = vmul.f32 %v6004_v0, %v5998_v48 }
 0x708   : > { %v1678_v32 = vpop.permute.xlu0 %1677 }
 0x70a   : > { %v6006_v5 = vpop.eup %6005 }
 0x70b   : > { %v1396_v59 = vmul.f32 %v6006_v5, %v6000_v51 }
 0x70c   : > { %v1682_v38 = vpop.permute.xlu0 %1681 }
 0x736   : > { %v1391_v54 = vpop.xlane.xlu1 %1390 }
 0x737   : > { %6007 = vrcp.f32 %v1391_v54 }
 0x73a   : > { %v1401_v3 = vpop.permute.xlu1 %1400 }
 0x73b   : > { %5405 = vmatpush3.msra.mxu0 %v1401_v3 }
 0x73c   : > { %5407 = vmatmul.mubr.msk.f32.vlgmr.msra.gmra.mxu0 %vm1134_vm4, %v1395_v2  ;;  %5426 = vmatprep.subr.mxu0 %v6205_v1 }
 0x73d   : > { %5409 = vmatprep.mubr.msk.f32.mxu0 %vm6206_vm0, %v6205_v1  ;;  %5427 = vmatpush3.msra.mxu0 %v1031_v4 }
 0x73e   : > { %5452 = vmatprep.subr.mxu0 %v6205_v1  ;;  %v1688_v11 = vpop.permute.xlu1 %1687 }
 0x740   : > { %5410 = vmatmul.mubr.msk.f32.gmra.mxu0 %vm1134_vm4, %v1396_v59 }
 0x741   : > { %5412 = vmatprep.mubr.msk.f32.mxu0 %vm6206_vm0, %v6205_v1 }
 0x742   : > { %v1684_v16 = vpop.permute.xlu1 %1683 }
 0x744   : > { %v6008_v6 = vpop.eup %6007 }
 0x745   : > { %v1397_v8 = vmul.f32 %v6008_v6, %v6002_v57 }
 0x747   : > { %5413 = vmatmul.mubr.msk.f32.gmra.mxu0 %vm1134_vm4, %v1397_v8 }
 0x748   : > { %5428 = vmatprep.mubr.msk.f32.mxu0 %vm6206_vm0, %v6205_v1 }
 0x74b   : > { %5429 = vmatmul.mubr.msk.f32.vlgmr.msra.gmra.mxu0 %vm1035_vm3, %v6775_v12 }
 0x74c   : > { %5431 = vmatprep.mubr.msk.f32.mxu0 %vm6206_vm0, %v6205_v1 }
 0x74f   : > { %5432 = vmatmul.mubr.msk.f32.gmra.mxu0 %vm1035_vm3, %v6777_v15 }
 0x750   : > { %5434 = vmatprep.mubr.msk.f32.mxu0 %vm6206_vm0, %v6205_v1 }
 0x753   : > { %5435 = vmatmul.mubr.msk.f32.gmra.mxu0 %vm1035_vm3, %v6783_v35  ;;  %v1680_v35 = vpop.permute.xlu1 %1679 }
 0x754   : > { %5458 = vmatprep.mubr.msk.f32.mxu0 %vm6206_vm0, %v6205_v1 }
 0x7fc   : > { %v1485_v10 = vpop.f32.mrf.mxu0 }
 0x7fd   : > { %5418 = vmatmul.mubr.msk.f32.vlgmr.msra.gmra.mxu1 %vm1035_vm3, %v1485_v10 }
 0x7fe   : > { %5438 = vmatpush3.xpose.msk.msra.mxu1 %vm1035_vm3, %v1688_v11  ;;  %v5408_v12 = vpop.f32.mrf.mxu0  ;;  %5420 = vmatprep.mubr.msk.f32.mxu1 %vm6206_vm0, %v6205_v1 }
 0x7ff   : > { %5439 = vmatprep.subr.mxu1 %v6205_v1 }
 0x800   : > { %v1490_v13 = vpop.f32.mrf.mxu0 }
 0x801   : > { %5421 = vmatmul.mubr.msk.f32.gmra.mxu1 %vm1035_vm3, %v1490_v13 }
 0x802   : > { %5440 = vmatpush3.xpose.msk.msra.mxu1 %vm1035_vm3, %v1686_v14  ;;  %v5411_v15 = vpop.f32.mrf.mxu0  ;;  %5423 = vmatprep.mubr.msk.f32.mxu1 %vm6206_vm0, %v6205_v1 }
 0x803   : > { %5441 = vmatprep.subr.mxu1 %v6205_v1 }
 0x806   : > { %5442 = vmatpush3.xpose.msk.msra.mxu1 %vm1035_vm3, %v1684_v16 }
 0x807   : > { %v1495_v20 = vpop.f32.mrf.mxu0  ;;  %5467 = vmatprep.subr.mxu1 %v6205_v1 }
 0x808   : > { %5424 = vmatmul.mubr.msk.f32.gmra.mxu1 %vm1035_vm3, %v1495_v20 }
 0x809   : > { %v5414_v23 = vpop.f32.mrf.mxu0  ;;  %5443 = vmatprep.mubr.msk.f32.mxu1 %vm6206_vm0, %v6205_v1 }
 0x80b   : > { %v6853_v33 = vpop.f32.mrf.mxu0 }
 0x80c   : > { %5444 = vmatmul.mubr.msk.f32.vlgmr.msra.gmra.mxu1 %vm1035_vm3, %v1678_v32 }
 0x80d   : > { %v5430_v34 = vpop.f32.mrf.mxu0  ;;  %5446 = vmatprep.mubr.msk.f32.mxu1 %vm6206_vm0, %v6205_v1 }
 0x80f   : > { %v6858_v36 = vpop.f32.mrf.mxu0 }
 0x810   : > { %5447 = vmatmul.mubr.msk.f32.gmra.mxu1 %vm1035_vm3, %v1680_v35 }
 0x811   : > { %v5433_v37 = vpop.f32.mrf.mxu0  ;;  %5449 = vmatprep.mubr.msk.f32.mxu1 %vm6206_vm0, %v6205_v1 }
 0x813   : > { %v6863_v39 = vpop.f32.mrf.mxu0 }
 0x814   : > { %5450 = vmatmul.mubr.msk.f32.gmra.mxu1 %vm1035_vm3, %v1682_v38 }
 0x815   : > { %v5436_v40 = vpop.f32.mrf.mxu0  ;;  %5469 = vmatprep.mubr.msk.f32.mxu1 %vm6206_vm0, %v6205_v1 }
 0x816   : > { %v1033_v40 = vld [vmem:[%s8094_s7 + $0x10] sm:$0xff] }
 0x817   : > { %5468 = vmatpush3.msra.mxu1 %v1033_v40 }
 0x818   : > { %5493 = vmatprep.subr.mxu1 %v6205_v1 }
 0x8bd   : > { %v6868_v41 = vpop.f32.mrf.mxu1 }
 0x8bf   : > { %v5419_v42 = vpop.f32.mrf.mxu1 }
 0x8c1   : > { %v6870_v43 = vpop.f32.mrf.mxu1 }
 0x8c3   : > { %v5422_v44 = vpop.f32.mrf.mxu1 }
 0x8c8   : > { %v6872_v47 = vpop.f32.mrf.mxu1 }
 0x8ca   : > { %v5425_v48 = vpop.f32.mrf.mxu1 }
 0x8cc   : > { %v1767_v50 = vpop.f32.mrf.mxu1 }
 0x8cd   : > { %v1781_v51 = vsel %vm1134_vm4, %v1767_v50, -inf }
 0x8ce   : > { %1782 = vmax.xlane.f32.xlu1 %v1781_v51  ;;  %v5445_v52 = vpop.f32.mrf.mxu1 }
 0x8d0   : > { %v1772_v53 = vpop.f32.mrf.mxu1 }
 0x8d1   : > { %v1784_v55 = vsel %vm1134_vm4, %v1772_v53, -inf }
 0x8d2   : > { %1785 = vmax.xlane.f32.xlu0 %v1784_v55  ;;  %v5448_v56 = vpop.f32.mrf.mxu1 }
 0x8d4   : > { %v1777_v57 = vpop.f32.mrf.mxu1 }
 0x8d5   : > { %v1787_v58 = vsel %vm1141_vm5, %v1777_v57, -inf }
 0x8d6   : > { %1788 = vmax.xlane.f32.xlu0 %v1787_v58  ;;  %v5451_v60 = vpop.f32.mrf.mxu1 }
 0x8df   : > { %1818 = vrot.lane.b32.xlu1 %v6698_v25, %s8063_s24 }
 0x8e3   : > { %1814 = vrot.lane.b32.xlu1 %v6711_v29, %s8063_s24 }
 0x8e7   : > { %2015 = vrot.lane.b32.xlu1 %v6675_v17, %s8061_s23 }
 0x8eb   : > { %2013 = vrot.lane.b32.xlu1 %v6681_v18, %s8061_s23 }
 0x957   : > { %v1783_v61 = vpop.xlane.xlu1 %1782 }
 0x958   : > { %v1790_v62 = vsub.f32 %v1767_v50, %v1783_v61 }
 0x95a   : > { %v1793_v63 = vmul.f32 1.442695, %v1790_v62 }
 0x95b   : > { %v1819_v49 = vpop.permute.xlu1 %1818  ;;  %v1786_v54 = vpop.xlane.xlu0 %1785 }
 0x95c   : > { %6009 = vpow2.f32 %v1793_v63  ;;  %v1791_v0 = vsub.f32 %v1772_v53, %v1786_v54  ;;  %5453 = vmatpush3.msk.msra.mxu0 %vm748_vm1, %v1819_v49  ;;  %v1664_v49 = vadd.f32 %v6853_v33, %v6868_v41 }
 0x95d   : > { %5454 = vmatprep.subr.mxu0 %v6205_v1 }
 0x95e   : > { %v1795_v2 = vmul.f32 1.442695, %v1791_v0 }
 0x95f   : > { %v1789_v5 = vpop.xlane.xlu0 %1788 }
 0x960   : > { %6011 = vpow2.f32 %v1795_v2  ;;  %v1792_v59 = vsub.f32 %v1777_v57, %v1789_v5 }
 0x962   : > { %v1797_v6 = vmul.f32 1.442695, %v1792_v59 }
 0x964   : > { %6013 = vpow2.f32 %v1797_v6 }
 0x969   : > { %v6010_v3 = vpop.eup %6009 }
 0x96a   : > { %v1799_v4 = vsel %vm1134_vm4, %v6010_v3, 0.0 }
 0x96b   : > { %1800 = vadd.xlane.f32.xlu0 %v1799_v4 }
 0x96d   : > { %v6012_v17 = vpop.eup %6011 }
 0x96e   : > { %v1802_v18 = vsel %vm1134_vm4, %v6012_v17, 0.0 }
 0x96f   : > { %1803 = vadd.xlane.f32.xlu1 %v1802_v18 }
 0x971   : > { %v6014_v8 = vpop.eup %6013 }
 0x972   : > { %v1805_v10 = vsel %vm1141_vm5, %v6014_v8, 0.0 }
 0x980   : > { %2005 = vrot.lane.b32.xlu1 %v6695_v24, %s8061_s23  ;;  %v1815_v24 = vpop.permute.xlu1 %1814 }
 0x981   : > { %1816 = vrot.lane.b32.xlu0 %v6702_v27, %s8063_s24  ;;  %s6210_s24 = smov [#allocation4]  }
 0x984   : > { %2009 = vrot.lane.b32.xlu1 %v6720_v31, %s8061_s23  ;;  %v2016_v11 = vpop.permute.xlu1 %2015 }
 0x988   : > { %v2014_v12 = vpop.permute.xlu1 %2013 }
 0x9a0   : > { %1806 = vadd.xlane.f32.xlu0 %v1805_v10 }
 0x9b6   : > { %2011 = vrot.lane.b32.xlu0 %v6689_v21, %s8061_s23 }
 0x9ba   : > { %2007 = vrot.lane.b32.xlu0 %v6708_v28, %s8061_s23 }
 0x9f4   : > { %v1801_v13 = vpop.xlane.xlu0 %1800 }
 0x9f5   : > { %6015 = vrcp.f32 %v1801_v13 }
 0x9f8   : > { %v1804_v14 = vpop.xlane.xlu1 %1803  ;;  %v1817_v31 = vpop.permute.xlu0 %1816 }
 0x9f9   : > { %6017 = vrcp.f32 %v1804_v14  ;;  %5455 = vmatpush3.msra.mxu0 %v1817_v31  ;;  %v1674_v31 = vadd.f32 %v6863_v39, %v6872_v47 }
 0x9fa   : > { %5456 = vmatprep.subr.mxu0 %v6205_v1 }
 0x9fb   : > { %5457 = vmatpush3.msra.mxu0 %v1815_v24 }
 0x9fc   : > { %5478 = vmatprep.subr.mxu0 %v6205_v1  ;;  %v2006_v35 = vpop.permute.xlu1 %2005 }
 0xa00   : > { %v2010_v38 = vpop.permute.xlu1 %2009 }
 0xa02   : > { %v6016_v15 = vpop.eup %6015 }
 0xa03   : > { %v1811_v16 = vmul.f32 %v6016_v15, %v6010_v3  ;;  %v1669_v3 = vadd.f32 %v6858_v36, %v6870_v43 }
 0xa05   : > { %5459 = vmatmul.mubr.msk.f32.vlgmr.msra.gmra.mxu0 %vm1134_vm4, %v1811_v16 }
 0xa06   : > { %v6018_v21 = vpop.eup %6017  ;;  %5479 = vmatpush3.xpose.msk.msra.mxu0 %vm1035_vm3, %v2016_v11  ;;  %5461 = vmatprep.mubr.msk.f32.mxu0 %vm6206_vm0, %v6205_v1 }
 0xa07   : > { %5480 = vmatprep.subr.mxu0 %v6205_v1  ;;  %v1812_v28 = vmul.f32 %v6018_v21, %v6012_v17 }
 0xa09   : > { %5462 = vmatmul.mubr.msk.f32.gmra.mxu0 %vm1134_vm4, %v1812_v28  ;;  %v1034_v28 = vld [vmem:[%s8094_s7 + $0x18] sm:$0xff] }
 0xa0a   : > { %5481 = vmatpush3.xpose.msk.msra.mxu0 %vm1035_vm3, %v2014_v12  ;;  %5464 = vmatprep.mubr.msk.f32.mxu0 %vm6206_vm0, %v6205_v1 }
 0xa0b   : > { %5482 = vmatprep.subr.mxu0 %v6205_v1 }
 0xa29   : > { %v1807_v20 = vpop.xlane.xlu0 %1806 }
 0xa2a   : > { %6019 = vrcp.f32 %v1807_v20 }
 0xa2d   : > { %v2012_v23 = vpop.permute.xlu0 %2011 }
 0xa2e   : > { %5483 = vmatpush3.xpose.msk.msra.mxu0 %vm1035_vm3, %v2012_v23 }
 0xa2f   : > { %5508 = vmatprep.subr.mxu0 %v6205_v1 }
 0xa31   : > { %v2008_v37 = vpop.permute.xlu0 %2007 }
 0xa37   : > { %v6020_v32 = vpop.eup %6019 }
 0xa38   : > { %v1813_v34 = vmul.f32 %v6020_v32, %v6014_v8 }
 0xa3a   : > { %5465 = vmatmul.mubr.msk.f32.gmra.mxu0 %vm1134_vm4, %v1813_v34 }
 0xa3b   : > { %5484 = vmatprep.mubr.msk.f32.mxu0 %vm6206_vm0, %v6205_v1 }
 0xa3e   : > { %5485 = vmatmul.mubr.msk.f32.vlgmr.msra.gmra.mxu0 %vm1035_vm3, %v2006_v35 }
 0xa3f   : > { %5487 = vmatprep.mubr.msk.f32.mxu0 %vm6206_vm0, %v6205_v1  ;;  %5509 = vmatpush3.msra.mxu0 %v1034_v28  ;;  %v2413_v28 = vld [vmem:[%s8041_s11 + $0x48] sm:$0xff] }
 0xa40   : > { %5560 = vmatprep.subr.mxu0 %v6205_v1 }
 0xa42   : > { %5488 = vmatmul.mubr.msk.f32.gmra.mxu0 %vm1035_vm3, %v2008_v37 }
 0xa43   : > { %5490 = vmatprep.mubr.msk.f32.mxu0 %vm6206_vm0, %v6205_v1 }
 0xa46   : > { %5491 = vmatmul.mubr.msk.f32.gmra.mxu0 %vm1035_vm3, %v2010_v38 }
 0xa47   : > { %5510 = vmatprep.mubr.msk.f32.mxu0 %vm6206_vm0, %v6205_v1 }
 0xac5   : > { %v1899_v42 = vpop.f32.mrf.mxu0 }
 0xac6   : > { %5470 = vmatmul.mubr.msk.f32.vlgmr.msra.gmra.mxu1 %vm1035_vm3, %v1899_v42 }
 0xac7   : > { %v5460_v44 = vpop.f32.mrf.mxu0  ;;  %5472 = vmatprep.mubr.msk.f32.mxu1 %vm6206_vm0, %v6205_v1 }
 0xac9   : > { %v1904_v48 = vpop.f32.mrf.mxu0 }
 0xaca   : > { %5473 = vmatmul.mubr.msk.f32.gmra.mxu1 %vm1035_vm3, %v1904_v48 }
 0xacb   : > { %v5463_v50 = vpop.f32.mrf.mxu0  ;;  %5475 = vmatprep.mubr.msk.f32.mxu1 %vm6206_vm0, %v6205_v1 }
 0xafa   : > { %v1909_v51 = vpop.f32.mrf.mxu0 }
 0xafb   : > { %5476 = vmatmul.mubr.msk.f32.gmra.mxu1 %vm1035_vm3, %v1909_v51 }
 0xafc   : > { %v5466_v52 = vpop.f32.mrf.mxu0  ;;  %5499 = vmatprep.mubr.msk.f32.mxu1 %vm6206_vm0, %v6205_v1 }
 0xafe   : > { %v2095_v53 = vpop.f32.mrf.mxu0 }
 0xaff   : > { %v2109_v55 = vsel %vm1134_vm4, %v2095_v53, -inf }
 0xb00   : > { %2110 = vmax.xlane.f32.xlu0 %v2109_v55  ;;  %v5486_v56 = vpop.f32.mrf.mxu0 }
 0xb02   : > { %v2100_v57 = vpop.f32.mrf.mxu0 }
 0xb03   : > { %v2112_v58 = vsel %vm1134_vm4, %v2100_v57, -inf }
 0xb04   : > { %2113 = vmax.xlane.f32.xlu1 %v2112_v58  ;;  %v5489_v60 = vpop.f32.mrf.mxu0 }
 0xb06   : > { %v2105_v61 = vpop.f32.mrf.mxu0 }
 0xb07   : > { %v2115_v62 = vsel %vm1141_vm5, %v2105_v61, -inf }
 0xb08   : > { %2116 = vmax.xlane.f32.xlu0 %v2115_v62  ;;  %v5492_v63 = vpop.f32.mrf.mxu0 }
 0xb15   : > { %2144 = vrot.lane.b32.xlu1 %v6702_v27, %s8061_s23 }
 0xb86   : > { %v1988_v54 = vpop.f32.mrf.mxu1 }
 0xb87   : > { %v6946_v0 = vadd.f32 %v1988_v54, %v1664_v49 }
 0xb88   : > { %v5471_v2 = vpop.f32.mrf.mxu1 }
 0xb89   : > { %v2111_v4 = vpop.xlane.xlu0 %2110 }
 0xb8a   : > { %v2118_v17 = vsub.f32 %v2095_v53, %v2111_v4  ;;  %v1993_v18 = vpop.f32.mrf.mxu1 }
 0xb8b   : > { %v6950_v5 = vadd.f32 %v1993_v18, %v1669_v3  ;;  %v2418_v18 = vld [vmem:[%s8041_s11 + $0x70] sm:$0xff] }
 0xb8c   : > { %v2121_v59 = vmul.f32 1.442695, %v2118_v17  ;;  %v5474_v6 = vpop.f32.mrf.mxu1 }
 0xb8d   : > { %v2114_v8 = vpop.xlane.xlu1 %2113 }
 0xb8e   : > { %6021 = vpow2.f32 %v2121_v59  ;;  %v2119_v27 = vsub.f32 %v2100_v57, %v2114_v8  ;;  %v4833_v57 = vld [vmem:[%s8095_s8] ss:$0 sm:$0xff] }
 0xb90   : > { %v2123_v10 = vmul.f32 1.442695, %v2119_v27 }
 0xb91   : > { %v2117_v24 = vpop.xlane.xlu0 %2116  ;;  %v2145_v23 = vpop.permute.xlu1 %2144 }
 0xb92   : > { %6023 = vpow2.f32 %v2123_v10  ;;  %v2120_v33 = vsub.f32 %v2105_v61, %v2117_v24 }
 0xb94   : > { %v2125_v41 = vmul.f32 1.442695, %v2120_v33 }
 0xb96   : > { %6025 = vpow2.f32 %v2125_v41 }
 0xb9b   : > { %v6022_v11 = vpop.eup %6021 }
 0xb9c   : > { %v2127_v12 = vsel %vm1134_vm4, %v6022_v11, 0.0 }
 0xb9d   : > { %2128 = vadd.xlane.f32.xlu0 %v2127_v12 }
 0xb9f   : > { %v6024_v36 = vpop.eup %6023 }
 0xba0   : > { %v2130_v43 = vsel %vm1134_vm4, %v6024_v36, 0.0 }
 0xba1   : > { %2131 = vadd.xlane.f32.xlu0 %v2130_v43 }
 0xba3   : > { %v6026_v13 = vpop.eup %6025 }
 0xba4   : > { %v2133_v14 = vsel %vm1141_vm5, %v6026_v13, 0.0 }
 0xba5   : > { %2134 = vadd.xlane.f32.xlu1 %v2133_v14 }
 0xbb6   : > { %2142 = vrot.lane.b32.xlu1 %v6711_v29, %s8061_s23 }
 0xbb7   : > { %2146 = vrot.lane.b32.xlu0 %v6698_v25, %s8061_s23  ;;  %s8096_s23 = smov 120  }
 0xbbb   : > { %v1998_v15 = vpop.f32.mrf.mxu1 }
 0xbbc   : > { %v2004_v16 = vadd.f32 %v1998_v15, %v1674_v31 }
 0xbbd   : > { %v5477_v21 = vpop.f32.mrf.mxu1 }
 0xbbe   : > { %v2414_v21 = vld [vmem:[%s8041_s11 + $0x50] sm:$0xff] }
 0xc26   : > { %v2129_v20 = vpop.xlane.xlu0 %2128 }
 0xc27   : > { %6027 = vrcp.f32 %v2129_v20  ;;  %v2412_v20 = vld [vmem:[%s8041_s11 + $0x40] sm:$0xff] }
 0xc2a   : > { %v2132_v29 = vpop.xlane.xlu0 %2131 }
 0xc2b   : > { %6029 = vrcp.f32 %v2132_v29  ;;  %v2410_v29 = vld [vmem:[%s8041_s11 + $0x30] sm:$0xff] }
 0xc2e   : > { %v2135_v32 = vpop.xlane.xlu1 %2134  ;;  %v2147_v25 = vpop.permute.xlu0 %2146 }
 0xc2f   : > { %6031 = vrcp.f32 %v2135_v32  ;;  %5494 = vmatpush3.msk.msra.mxu1 %vm748_vm1, %v2147_v25  ;;  %v2409_v32 = vld [vmem:[%s8041_s11 + $0x28] sm:$0xff]  ;;  %v2408_v25 = vld [vmem:[%s8041_s11 + $0x20] sm:$0xff] }
 0xc30   : > { %5495 = vmatprep.subr.mxu1 %v6205_v1 }
 0xc31   : > { %5496 = vmatpush3.msra.mxu1 %v2145_v23  ;;  %v2411_v23 = vld [vmem:[%s8041_s11 + $0x38] sm:$0xff] }
 0xc32   : > { %v2143_v39 = vpop.permute.xlu1 %2142  ;;  %5497 = vmatprep.subr.mxu1 %v6205_v1 }
 0xc33   : > { %5498 = vmatpush3.msra.mxu1 %v2143_v39  ;;  %v2407_v39 = vld [vmem:[%s8041_s11 + $0x18] sm:$0xff] }
 0xc34   : > { %v6028_v47 = vpop.eup %6027  ;;  %5519 = vmatprep.subr.mxu1 %v6205_v1 }
 0xc35   : > { %v2139_v34 = vmul.f32 %v6028_v47, %v6022_v11  ;;  %v2406_v47 = vld [vmem:[%s8041_s11 + $0x10] sm:$0xff] }
 0xc37   : > { %5500 = vmatmul.mubr.msk.f32.vlgmr.msra.gmra.mxu1 %vm1134_vm4, %v2139_v34  ;;  %v2405_v34 = vld [vmem:[%s8041_s11 + $0x8] sm:$0xff] }
 0xc38   : > { %v6030_v35 = vpop.eup %6029  ;;  %5502 = vmatprep.mubr.msk.f32.mxu1 %vm6206_vm0, %v6205_v1 }
 0xc39   : > { %v2140_v37 = vmul.f32 %v6030_v35, %v6024_v36  ;;  %v2404_v35 = vld [vmem:[%s8041_s11] sm:$0xff] }
 0xc3b   : > { %5503 = vmatmul.mubr.msk.f32.gmra.mxu1 %vm1134_vm4, %v2140_v37 }
 0xc3c   : > { %v6032_v38 = vpop.eup %6031  ;;  %5505 = vmatprep.mubr.msk.f32.mxu1 %vm6206_vm0, %v6205_v1 }
 0xc3d   : > { %v2141_v40 = vmul.f32 %v6032_v38, %v6026_v13 }
 0xc3f   : > { %5506 = vmatmul.mubr.msk.f32.gmra.mxu1 %vm1134_vm4, %v2141_v40 }
 0xc40   : > { %5551 = vmatprep.mubr.msk.f32.mxu1 %vm6206_vm0, %v6205_v1 }
 0xcf7   : > { %v2227_v42 = vpop.f32.mrf.mxu1 }
 0xcf8   : > { %5511 = vmatmul.mubr.msk.f32.vlgmr.msra.gmra.mxu0 %vm1035_vm3, %v2227_v42 }
 0xcf9   : > { %v5501_v44 = vpop.f32.mrf.mxu1  ;;  %5513 = vmatprep.mubr.msk.f32.mxu0 %vm6206_vm0, %v6205_v1 }
 0xcfb   : > { %v2232_v48 = vpop.f32.mrf.mxu1 }
 0xcfc   : > { %5514 = vmatmul.mubr.msk.f32.gmra.mxu0 %vm1035_vm3, %v2232_v48 }
 0xcfd   : > { %v5504_v50 = vpop.f32.mrf.mxu1  ;;  %5516 = vmatprep.mubr.msk.f32.mxu0 %vm6206_vm0, %v6205_v1 }
 0xcff   : > { %v2237_v51 = vpop.f32.mrf.mxu1 }
 0xd00   : > { %5517 = vmatmul.mubr.msk.f32.gmra.mxu0 %vm1035_vm3, %v2237_v51 }
 0xd01   : > { %v5507_v52 = vpop.f32.mrf.mxu1  ;;  %5592 = vmatprep.mubr.msk.f32.mxu0 %vm6206_vm0, %v6205_v1 }
 0xdb8   : > { %v2316_v53 = vpop.f32.mrf.mxu0 }
 0xdb9   : > { %v2330_v55 = vadd.f32 %v2316_v53, %v6946_v0 }
 0xdba   : > { %v5512_v56 = vpop.f32.mrf.mxu0 }
 0xdbb   : > { %v2333_v58 = vadd.f32 %v2330_v55, %v6447_v22  ;;  %v4834_v55 = vld [vmem:[%s8039_s9] ss:$0 sm:$0xff] }
 0xdbc   : > { %v2321_v60 = vpop.f32.mrf.mxu0 }
 0xdbd   : > { %v2331_v61 = vadd.f32 %v2321_v60, %v6950_v5  ;;  %v6993_v62 = vadd.f32 %v4833_v57, %v2333_v58  ;;  %v2416_v5 = vld [vmem:[%s8041_s11 + $0x60] sm:$0xff] }
 0xdbe   : > { %v5515_v63 = vpop.f32.mrf.mxu0 }
 0xdbf   : > { %v2334_v49 = vadd.f32 %v2331_v61, %v6453_v26  ;;  %2348 = vadd.xlane.f32.xlu1 %v6993_v62  ;;  %v2419_v26 = vld [vmem:[%s8041_s11 + $0x78] sm:$0xff] }
 0xdc0   : > { %v2326_v54 = vpop.f32.mrf.mxu0  ;;  %5520 = vmatpush3.msra.mxu1 %v2419_v26  ;;  %v2549_v26 = vld [vmem:[%s8043_s13 + $0x78] sm:$0xff] }
 0xdc1   : > { %v2332_v2 = vadd.f32 %v2326_v54, %v2004_v16  ;;  %v6997_v0 = vadd.f32 %v4833_v57, %v2334_v49  ;;  %5521 = vmatprep.subr.mxu1 %v6205_v1  ;;  %v2415_v16 = vld [vmem:[%s8041_s11 + $0x58] sm:$0xff]  ;;  %5561 = vmatpush3.msra.mxu0 %v2549_v26 }
 0xdc2   : > { %v5518_v3 = vpop.f32.mrf.mxu0  ;;  %5522 = vmatpush3.msra.mxu1 %v2418_v18  ;;  %5562 = vmatprep.subr.mxu0 %v6205_v1  ;;  %v2548_v18 = vld [vmem:[%s8043_s13 + $0x70] sm:$0xff] }
 0xdc3   : > { %v2335_v4 = vadd.f32 %v2332_v2, %v6459_v30  ;;  %2350 = vadd.xlane.f32.xlu0 %v6997_v0  ;;  %v2417_v30 = vld [vmem:[%s8041_s11 + $0x68] sm:$0xff]  ;;  %5523 = vmatprep.subr.mxu1 %v6205_v1 }
 0xdc4   : > { %5524 = vmatpush3.msra.mxu1 %v2417_v30  ;;  %5563 = vmatpush3.msra.mxu0 %v2548_v18  ;;  %v2547_v30 = vld [vmem:[%s8043_s13 + $0x68] sm:$0xff] }
 0xdc5   : > { %v7001_v22 = vadd.f32 %v4833_v57, %v2335_v4  ;;  %5525 = vmatprep.subr.mxu1 %v6205_v1  ;;  %v4835_v57 = vld [vmem:[%s8040_s10] ss:$0 sm:$0xff]  ;;  %5564 = vmatprep.subr.mxu0 %v6205_v1 }
 0xdc6   : > { %5526 = vmatpush3.msra.mxu1 %v2416_v5  ;;  %5565 = vmatpush3.msra.mxu0 %v2547_v30  ;;  %v2546_v5 = vld [vmem:[%s8043_s13 + $0x60] sm:$0xff] }
 0xdc7   : > { %v2352_v17 = vsel %vm748_vm1, %v7001_v22, 0.0  ;;  %5527 = vmatprep.subr.mxu1 %v6205_v1  ;;  %5566 = vmatprep.subr.mxu0 %v6205_v1 }
 0xdc8   : > { %2353 = vadd.xlane.f32.xlu0 %v2352_v17  ;;  %5528 = vmatpush3.msra.mxu1 %v2415_v16 }
 0xdc9   : > { %5529 = vmatprep.subr.mxu1 %v6205_v1  ;;  %5567 = vmatpush3.msra.mxu0 %v2546_v5 }
 0xdca   : > { %5530 = vmatpush3.msra.mxu1 %v2414_v21  ;;  %5568 = vmatprep.subr.mxu0 %v6205_v1 }
 0xdcb   : > { %5531 = vmatprep.subr.mxu1 %v6205_v1 }
 0xdcc   : > { %5532 = vmatpush3.msra.mxu1 %v2413_v28 }
 0xdcd   : > { %5533 = vmatprep.subr.mxu1 %v6205_v1 }
 0xdce   : > { %5534 = vmatpush3.msra.mxu1 %v2412_v20 }
 0xdcf   : > { %5535 = vmatprep.subr.mxu1 %v6205_v1 }
 0xdd0   : > { %5536 = vmatpush3.msra.mxu1 %v2411_v23 }
 0xdd1   : > { %5537 = vmatprep.subr.mxu1 %v6205_v1 }
 0xdd2   : > { %5538 = vmatpush3.msra.mxu1 %v2410_v29 }
 0xdd3   : > { %5539 = vmatprep.subr.mxu1 %v6205_v1 }
 0xdd4   : > { %5540 = vmatpush3.msra.mxu1 %v2409_v32 }
 0xdd5   : > { %5541 = vmatprep.subr.mxu1 %v6205_v1 }
 0xdd6   : > { %5542 = vmatpush3.msra.mxu1 %v2408_v25 }
 0xdd7   : > { %5543 = vmatprep.subr.mxu1 %v6205_v1 }
 0xdd8   : > { %5544 = vmatpush3.msra.mxu1 %v2407_v39 }
 0xdd9   : > { %5545 = vmatprep.subr.mxu1 %v6205_v1 }
 0xdda   : > { %5546 = vmatpush3.msra.mxu1 %v2406_v47 }
 0xddb   : > { %5547 = vmatprep.subr.mxu1 %v6205_v1 }
 0xddc   : > { %5548 = vmatpush3.msra.mxu1 %v2405_v34 }
 0xddd   : > { %5549 = vmatprep.subr.mxu1 %v6205_v1 }
 0xdde   : > { %5550 = vmatpush3.msra.mxu1 %v2404_v35 }
 0xe48   : > { %v2349_v59 = vpop.xlane.xlu1 %2348 }
 0xe49   : > { %v2355_v6 = vmul.f32 0.03125, %v2349_v59  ;;  %v2545_v59 = vld [vmem:[%s8043_s13 + $0x58] sm:$0xff] }
 0xe4a   : > { %5569 = vmatpush3.msra.mxu0 %v2545_v59 }
 0xe4b   : > { %v7022_v8 = vsub.f32 %v6993_v62, %v2355_v6  ;;  %5570 = vmatprep.subr.mxu0 %v6205_v1  ;;  %v2544_v6 = vld [vmem:[%s8043_s13 + $0x50] sm:$0xff] }
 0xe4c   : > { %v2351_v27 = vpop.xlane.xlu0 %2350  ;;  %5571 = vmatpush3.msra.mxu0 %v2544_v6 }
 0xe4d   : > { %v2356_v10 = vmul.f32 0.03125, %v2351_v27  ;;  %v2361_v24 = vsel %vm639_vm2, %v7022_v8, 0.0  ;;  %5572 = vmatprep.subr.mxu0 %v6205_v1  ;;  %v2542_v27 = vld [vmem:[%s8043_s13 + $0x40] sm:$0xff] }
 0xe4e   : > { %v2364_v33 = vmul.f32 %v2361_v24, %v2361_v24  ;;  %v2540_v24 = vld [vmem:[%s8043_s13 + $0x30] sm:$0xff] }
 0xe4f   : > { %v7028_v41 = vsub.f32 %v6997_v0, %v2356_v10  ;;  %v2541_v10 = vld [vmem:[%s8043_s13 + $0x38] sm:$0xff] }
 0xe50   : > { %2367 = vadd.xlane.f32.xlu0 %v2364_v33  ;;  %v2539_v33 = vld [vmem:[%s8043_s13 + $0x28] sm:$0xff] }
 0xe51   : > { %v2354_v11 = vpop.xlane.xlu0 %2353  ;;  %v2362_v12 = vsel %vm639_vm2, %v7028_v41, 0.0 }
 0xe52   : > { %v2357_v36 = vmul.f32 0.03125, %v2354_v11  ;;  %v2365_v43 = vmul.f32 %v2362_v12, %v2362_v12  ;;  %v2537_v11 = vld [vmem:[%s8043_s13 + $0x18] sm:$0xff]  ;;  %v2536_v12 = vld [vmem:[%s8043_s13 + $0x10] sm:$0xff] }
 0xe54   : > { %v7034_v13 = vsub.f32 %v7001_v22, %v2357_v36  ;;  %2369 = vadd.xlane.f32.xlu1 %v2365_v43  ;;  %v2535_v36 = vld [vmem:[%s8043_s13 + $0x8] sm:$0xff]  ;;  %v2534_v43 = vld [vmem:[%s8043_s13] sm:$0xff] }
 0xe56   : > { %v2363_v14 = vsel %vm639_vm2, %v7034_v13, 0.0 }
 0xe57   : > { %v2366_v31 = vmul.f32 %v2363_v14, %v2363_v14 }
 0xe59   : > { %v2371_v15 = vsel %vm748_vm1, %v2366_v31, 0.0 }
 0xe5a   : > { %2372 = vadd.xlane.f32.xlu0 %v2371_v15 }
 0xed9   : > { %v2368_v37 = vpop.xlane.xlu0 %2367 }
 0xeda   : > { %v2374_v38 = vmul.f32 0.03125, %v2368_v37 }
 0xedc   : > { %v2377_v40 = vadd.f32 1e-05, %v2374_v38 }
 0xedd   : > { %v2370_v42 = vpop.xlane.xlu1 %2369 }
 0xede   : > { %6033 = vrsqrt.f32 %v2377_v40  ;;  %v2375_v44 = vmul.f32 0.03125, %v2370_v42 }
 0xee0   : > { %v2378_v48 = vadd.f32 1e-05, %v2375_v44 }
 0xee2   : > { %6035 = vrsqrt.f32 %v2378_v48 }
 0xee3   : > { %v2373_v50 = vpop.xlane.xlu0 %2372 }
 0xee4   : > { %v2376_v51 = vmul.f32 0.03125, %v2373_v50 }
 0xee6   : > { %v2379_v52 = vadd.f32 1e-05, %v2376_v51 }
 0xee8   : > { %6037 = vrsqrt.f32 %v2379_v52 }
 0xeeb   : > { %v6034_v53 = vpop.eup %6033 }
 0xeec   : > { %v2383_v56 = vmul.f32 %v6034_v53, %v7022_v8  ;;  %v2543_v8 = vld [vmem:[%s8043_s13 + $0x48] sm:$0xff] }
 0xeed   : > { %5573 = vmatpush3.msra.mxu0 %v2543_v8 }
 0xeee   : > { %v2392_v58 = vmul.f32 %v4834_v55, %v2383_v56  ;;  %5574 = vmatprep.subr.mxu0 %v6205_v1 }
 0xeef   : > { %v6036_v60 = vpop.eup %6035  ;;  %5575 = vmatpush3.msra.mxu0 %v2542_v27 }
 0xef0   : > { %v2401_v61 = vadd.f32 %v4835_v57, %v2392_v58  ;;  %v2384_v63 = vmul.f32 %v6036_v60, %v7028_v41  ;;  %5576 = vmatprep.subr.mxu0 %v6205_v1  ;;  %v2538_v41 = vld [vmem:[%s8043_s13 + $0x20] sm:$0xff] }
 0xef1   : > { %5577 = vmatpush3.msra.mxu0 %v2541_v10 }
 0xef2   : > { %5552 = vmatmul.mubr.f32.vlgmr.msra.gmra.mxu1 %v2401_v61  ;;  %v2393_v49 = vmul.f32 %v4834_v55, %v2384_v63  ;;  %5578 = vmatprep.subr.mxu0 %v6205_v1 }
 0xef3   : > { %5554 = vmatprep.mubr.msk.f32.mxu1 %vm6206_vm0, %v6205_v1  ;;  %5579 = vmatpush3.msra.mxu0 %v2540_v24 }
 0xef4   : > { %v2402_v54 = vadd.f32 %v4835_v57, %v2393_v49  ;;  %5580 = vmatprep.subr.mxu0 %v6205_v1 }
 0xef5   : > { %v6038_v2 = vpop.eup %6037  ;;  %5581 = vmatpush3.msra.mxu0 %v2539_v33 }
 0xef6   : > { %5555 = vmatmul.mubr.f32.gmra.mxu1 %v2402_v54  ;;  %v2385_v3 = vmul.f32 %v6038_v2, %v7034_v13  ;;  %5582 = vmatprep.subr.mxu0 %v6205_v1  ;;  %v4836_v13 = vld [vmem:[%s8042_s12] ss:$0 sm:$0xff] }
 0xef7   : > { %5557 = vmatprep.mubr.msk.f32.mxu1 %vm6206_vm0, %v6205_v1  ;;  %5583 = vmatpush3.msra.mxu0 %v2538_v41  ;;  %v4887_v41 = vld [vmem:[%s8090_s5 + $0x2e8] sm:$0xff] }
 0xef8   : > { %v2394_v4 = vmul.f32 %v4834_v55, %v2385_v3  ;;  %5584 = vmatprep.subr.mxu0 %v6205_v1 }
 0xef9   : > { %5585 = vmatpush3.msra.mxu0 %v2537_v11  ;;  %v4889_v11 = vld [vmem:[%s8090_s5 + $0x2f8] sm:$0xff] }
 0xefa   : > { %v2403_v17 = vadd.f32 %v4835_v57, %v2394_v4  ;;  %5586 = vmatprep.subr.mxu0 %v6205_v1 }
 0xefb   : > { %5587 = vmatpush3.msra.mxu0 %v2536_v12  ;;  %v4884_v12 = vld [vmem:[%s8090_s5 + $0x2d0] sm:$0xff] }
 0xefc   : > { %5558 = vmatmul.mubr.f32.gmra.mxu1 %v2403_v17  ;;  %5588 = vmatprep.subr.mxu0 %v6205_v1  ;;  %v4837_v17 = vld [vmem:[%s8044_s14] ss:$0 sm:$0xff] }
 0xefd   : > { %2834 = vmatprep.mubr.f32.mxu1 %v6205_v1  ;;  %5589 = vmatpush3.msra.mxu0 %v2535_v36  ;;  %v4886_v36 = vld [vmem:[%s8090_s5 + $0x2e0] sm:$0xff] }
 0xefe   : > { %5590 = vmatprep.subr.mxu0 %v6205_v1 }
 0xeff   : > { %5591 = vmatpush3.msra.mxu0 %v2534_v43  ;;  %v4882_v43 = vld [vmem:[%s8090_s5 + $0x2c0] sm:$0xff] }
 0xf00   : > { %5601 = vmatprep.subr.mxu0 %v6205_v1 }
 0xfb2   : > { %v2493_v14 = vpop.f32.mrf.mxu1 }
 0xfb3   : > { %v2494_v31 = vadd.f32 %v4836_v13, %v2493_v14  ;;  %v4881_v14 = vld [vmem:[%s8090_s5 + $0x2b8] sm:$0xff] }
 0xfb4   : > { %v5553_v15 = vpop.f32.mrf.mxu1 }
 0xfb5   : > { %v2507_v16 = vmul.f32 %v2494_v31, %v2494_v31  ;;  %v4880_v15 = vld [vmem:[%s8090_s5 + $0x2b0] sm:$0xff] }
 0xfb6   : > { %v2498_v21 = vpop.f32.mrf.mxu1 }
 0xfb7   : > { %v2510_v28 = vmul.f32 %v2507_v16, %v2494_v31  ;;  %v2499_v20 = vadd.f32 %v4836_v13, %v2498_v21  ;;  %v4878_v16 = vld [vmem:[%s8090_s5 + $0x2a0] sm:$0xff] }
 0xfb8   : > { %v5556_v23 = vpop.f32.mrf.mxu1 }
 0xfb9   : > { %v2513_v29 = vmul.f32 0.044715, %v2510_v28  ;;  %v2508_v32 = vmul.f32 %v2499_v20, %v2499_v20 }
 0xfbb   : > { %v2516_v25 = vadd.f32 %v2513_v29, %v2494_v31  ;;  %v2511_v39 = vmul.f32 %v2508_v32, %v2499_v20 }
 0xfbc   : > { %v2503_v47 = vpop.f32.mrf.mxu1 }
 0xfbd   : > { %v2519_v34 = vmul.f32 0.7978846, %v2516_v25  ;;  %v2514_v35 = vmul.f32 0.044715, %v2511_v39  ;;  %v2504_v37 = vadd.f32 %v4836_v13, %v2503_v47  ;;  %v4883_v13 = vld [vmem:[%s8090_s5 + $0x2c8] sm:$0xff] }
 0xfbe   : > { %v5559_v38 = vpop.f32.mrf.mxu1 }
 0xfbf   : > { %6039 = vtanh.f32 %v2519_v34  ;;  %v2517_v40 = vadd.f32 %v2514_v35, %v2499_v20  ;;  %v2509_v42 = vmul.f32 %v2504_v37, %v2504_v37 }
 0xfc1   : > { %v2520_v44 = vmul.f32 0.7978846, %v2517_v40  ;;  %v2512_v48 = vmul.f32 %v2509_v42, %v2504_v37 }
 0xfc3   : > { %6041 = vtanh.f32 %v2520_v44  ;;  %v2515_v50 = vmul.f32 0.044715, %v2512_v48  ;;  %v4876_v44 = vld [vmem:[%s8090_s5 + $0x290] sm:$0xff] }
 0xfc5   : > { %v2518_v51 = vadd.f32 %v2515_v50, %v2504_v37  ;;  %v4875_v50 = vld [vmem:[%s8090_s5 + $0x288] sm:$0xff] }
 0xfc7   : > { %v2521_v52 = vmul.f32 0.7978846, %v2518_v51  ;;  %v4877_v51 = vld [vmem:[%s8090_s5 + $0x298] sm:$0xff] }
 0xfc9   : > { %6043 = vtanh.f32 %v2521_v52  ;;  %v4873_v52 = vld [vmem:[%s8090_s5 + $0x278] sm:$0xff] }
 0xfcc   : > { %v6040_v53 = vpop.eup %6039 }
 0xfcd   : > { %v2525_v55 = vadd.f32 1.0, %v6040_v53  ;;  %v4872_v53 = vld [vmem:[%s8090_s5 + $0x270] sm:$0xff] }
 0xfcf   : > { %v2528_v56 = vmul.f32 0.5, %v2525_v55  ;;  %v4874_v55 = vld [vmem:[%s8090_s5 + $0x280] sm:$0xff] }
 0xfd0   : > { %v6042_v57 = vpop.eup %6041 }
 0xfd1   : > { %v2531_v58 = vmul.f32 %v2528_v56, %v2494_v31  ;;  %v2526_v60 = vadd.f32 1.0, %v6042_v57  ;;  %v4879_v31 = vld [vmem:[%s8090_s5 + $0x2a8] sm:$0xff]  ;;  %v4870_v56 = vld [vmem:[%s8090_s5 + $0x260] sm:$0xff]  ;;  %v4869_v57 = vld [vmem:[%s8090_s5 + $0x258] sm:$0xff] }
 0xfd3   : > { %5593 = vmatmul.mubr.f32.vlgmr.msra.gmra.mxu0 %v2531_v58  ;;  %v2529_v61 = vmul.f32 0.5, %v2526_v60  ;;  %v4871_v58 = vld [vmem:[%s8090_s5 + $0x268] sm:$0xff] }
 0xfd4   : > { %5595 = vmatprep.mubr.msk.f32.mxu0 %vm6206_vm0, %v6205_v1  ;;  %5602 = vmatpush3.msra.mxu0 %v4889_v11  ;;  %v4867_v60 = vld [vmem:[%s8090_s5 + $0x248] sm:$0xff]  ;;  %v4850_v11 = vld [vmem:[%s8090_s5 + $0x1c0] sm:$0xff] }
 0xfd5   : > { %v2532_v63 = vmul.f32 %v2529_v61, %v2499_v20  ;;  %5603 = vmatprep.subr.mxu0 %v6205_v1  ;;  %v4866_v61 = vld [vmem:[%s8090_s5 + $0x240] sm:$0xff] }
 0xfd6   : > { %v6044_v49 = vpop.eup %6043  ;;  %5604 = vmatpush3.msra.mxu0 %v4886_v36  ;;  %v4847_v36 = vld [vmem:[%s8090_s5 + $0x1a8] sm:$0xff] }
 0xfd7   : > { %5596 = vmatmul.mubr.f32.gmra.mxu0 %v2532_v63  ;;  %v2527_v54 = vadd.f32 1.0, %v6044_v49  ;;  %5605 = vmatprep.subr.mxu0 %v6205_v1  ;;  %v4868_v63 = vld [vmem:[%s8090_s5 + $0x250] sm:$0xff] }
 0xfd8   : > { %5598 = vmatprep.mubr.msk.f32.mxu0 %vm6206_vm0, %v6205_v1  ;;  %5606 = vmatpush3.msra.mxu0 %v4883_v13  ;;  %v4864_v49 = vld [vmem:[%s8090_s5 + $0x230] sm:$0xff]  ;;  %v4842_v13 = vld [vmem:[%s8090_s5 + $0x180] sm:$0xff] }
 0xfd9   : > { %v2530_v2 = vmul.f32 0.5, %v2527_v54  ;;  %5607 = vmatprep.subr.mxu0 %v6205_v1  ;;  %v4863_v54 = vld [vmem:[%s8090_s5 + $0x228] sm:$0xff] }
 0xfda   : > { %5608 = vmatpush3.msra.mxu0 %v4880_v15 }
 0xfdb   : > { %v2533_v3 = vmul.f32 %v2530_v2, %v2504_v37  ;;  %5609 = vmatprep.subr.mxu0 %v6205_v1  ;;  %v4865_v2 = vld [vmem:[%s8090_s5 + $0x238] sm:$0xff] }
 0xfdc   : > { %5610 = vmatpush3.msra.mxu0 %v4877_v51 }
 0xfdd   : > { %5599 = vmatmul.mubr.f32.gmra.mxu0 %v2533_v3  ;;  %5611 = vmatprep.subr.mxu0 %v6205_v1  ;;  %v4861_v3 = vld [vmem:[%s8090_s5 + $0x218] sm:$0xff] }
 0xfde   : > { %5633 = vmatprep.mubr.msk.f32.mxu0 %vm6206_vm0, %v6205_v1  ;;  %5612 = vmatpush3.msra.mxu0 %v4874_v55 }
 0xfdf   : > { %5613 = vmatprep.subr.mxu0 %v6205_v1 }
 0xfe0   : > { %5614 = vmatpush3.msra.mxu0 %v4871_v58 }
 0xfe1   : > { %5615 = vmatprep.subr.mxu0 %v6205_v1 }
 0xfe2   : > { %5616 = vmatpush3.msra.mxu0 %v4868_v63 }
 0xfe3   : > { %5617 = vmatprep.subr.mxu0 %v6205_v1 }
 0xfe4   : > { %5618 = vmatpush3.msra.mxu0 %v4865_v2 }
 0xfe5   : > { %5619 = vmatprep.subr.mxu0 %v6205_v1 }
0x1093   : > { %v2616_v4 = vpop.f32.mrf.mxu0 }
0x1094   : > { %v2630_v26 = vadd.f32 %v2616_v4, %v6993_v62  ;;  %v4860_v4 = vld [vmem:[%s8090_s5 + $0x210] sm:$0xff] }
0x1095   : > { %v5594_v18 = vpop.f32.mrf.mxu0 }
0x1096   : > { %v7178_v30 = vadd.f32 %v4837_v17, %v2630_v26  ;;  %v4858_v26 = vld [vmem:[%s8090_s5 + $0x200] sm:$0xff]  ;;  %v4857_v18 = vld [vmem:[%s8090_s5 + $0x1f8] sm:$0xff] }
0x1097   : > { %v2621_v5 = vpop.f32.mrf.mxu0 }
0x1098   : > { %v2631_v59 = vadd.f32 %v2621_v5, %v6997_v0  ;;  %2647 = vadd.xlane.f32.xlu1 %v7178_v30  ;;  %v4888_v0 = vld [vmem:[%s8090_s5 + $0x2f0] sm:$0xff]  ;;  %v4859_v5 = vld [vmem:[%s8090_s5 + $0x208] sm:$0xff] }
0x1099   : > { %v5597_v6 = vpop.f32.mrf.mxu0  ;;  %2770 = vmatprep.subr.mxu1 %v4888_v0  ;;  %v4849_v0 = vld [vmem:[%s8090_s5 + $0x1b8] sm:$0xff] }
0x109a   : > { %v7182_v8 = vadd.f32 %v4837_v17, %v2631_v59  ;;  %2771 = vmatpush1.msra.mxu1 %v4887_v41  ;;  %v4855_v59 = vld [vmem:[%s8090_s5 + $0x1e8] sm:$0xff]  ;;  %v4854_v6 = vld [vmem:[%s8090_s5 + $0x1e0] sm:$0xff]  ;;  %v4848_v41 = vld [vmem:[%s8090_s5 + $0x1b0] sm:$0xff] }
0x109c   : > { %2649 = vadd.xlane.f32.xlu0 %v7182_v8 }
0x109d   : > { %v2626_v27 = vpop.f32.mrf.mxu0 }
0x109e   : > { %v2632_v10 = vadd.f32 %v2626_v27, %v7001_v22  ;;  %v4885_v22 = vld [vmem:[%s8090_s5 + $0x2d8] sm:$0xff]  ;;  %v4856_v27 = vld [vmem:[%s8090_s5 + $0x1f0] sm:$0xff] }
0x109f   : > { %v5600_v24 = vpop.f32.mrf.mxu0  ;;  %2772 = vmatprep.subr.mxu1 %v4885_v22  ;;  %v4846_v22 = vld [vmem:[%s8090_s5 + $0x1a0] sm:$0xff] }
0x10a0   : > { %v7186_v33 = vadd.f32 %v4837_v17, %v2632_v10  ;;  %2773 = vmatpush1.msra.mxu1 %v4884_v12  ;;  %v4862_v17 = vld [vmem:[%s8090_s5 + $0x220] sm:$0xff]  ;;  %v4852_v10 = vld [vmem:[%s8090_s5 + $0x1d0] sm:$0xff]  ;;  %v4851_v24 = vld [vmem:[%s8090_s5 + $0x1c8] sm:$0xff] }
0x10a1   : > { %2774 = vmatprep.subr.mxu1 %v4882_v43  ;;  %5620 = vmatpush3.msra.mxu0 %v4862_v17  ;;  %v4845_v12 = vld [vmem:[%s8090_s5 + $0x198] sm:$0xff]  ;;  %v4843_v43 = vld [vmem:[%s8090_s5 + $0x188] sm:$0xff] }
0x10a2   : > { %v2651_v62 = vsel %vm748_vm1, %v7186_v33, 0.0  ;;  %2775 = vmatpush1.msra.mxu1 %v4881_v14  ;;  %5621 = vmatprep.subr.mxu0 %v6205_v1  ;;  %v4844_v14 = vld [vmem:[%s8090_s5 + $0x190] sm:$0xff] }
0x10a3   : > { %2652 = vadd.xlane.f32.xlu1 %v2651_v62  ;;  %2776 = vmatprep.subr.mxu1 %v4879_v31  ;;  %v4853_v62 = vld [vmem:[%s8090_s5 + $0x1d8] sm:$0xff] }
0x10a4   : > { %2777 = vmatpush1.msra.mxu1 %v4878_v16  ;;  %5622 = vmatpush3.msra.mxu0 %v4859_v5 }
0x10a5   : > { %2778 = vmatprep.subr.mxu1 %v4876_v44  ;;  %5623 = vmatprep.subr.mxu0 %v6205_v1 }
0x10a6   : > { %2779 = vmatpush1.msra.mxu1 %v4875_v50  ;;  %5624 = vmatpush3.msra.mxu0 %v4856_v27 }
0x10a7   : > { %2780 = vmatprep.subr.mxu1 %v4873_v52  ;;  %5625 = vmatprep.subr.mxu0 %v6205_v1 }
0x10a8   : > { %2781 = vmatpush1.msra.mxu1 %v4872_v53  ;;  %5626 = vmatpush3.msra.mxu0 %v4853_v62 }
0x10a9   : > { %2782 = vmatprep.subr.mxu1 %v4870_v56  ;;  %5627 = vmatprep.subr.mxu0 %v6205_v1 }
0x10aa   : > { %2783 = vmatpush1.msra.mxu1 %v4869_v57  ;;  %5628 = vmatpush3.msra.mxu0 %v4850_v11 }
0x10ab   : > { %2784 = vmatprep.subr.mxu1 %v4867_v60  ;;  %5629 = vmatprep.subr.mxu0 %v6205_v1  ;;  %v4890_v60 = vld [vmem:[%s8093_s6 + $0x3] sm:$0x7] }
0x10ac   : > { %2785 = vmatpush1.msra.mxu1 %v4866_v61  ;;  %5630 = vmatpush3.msra.mxu0 %v4847_v36  ;;  %v2762_v63 = vrot.slane %v4890_v60, %v859_v9 }
0x10ad   : > { %2786 = vmatprep.subr.mxu1 %v4864_v49  ;;  %5631 = vmatprep.subr.mxu0 %v6205_v1 }
0x10ae   : > { %2787 = vmatpush1.msra.mxu1 %v4863_v54  ;;  %5632 = vmatpush3.msra.mxu0 %v4844_v14 }
0x10af   : > { %2788 = vmatprep.subr.mxu1 %v4861_v3  ;;  %5657 = vmatprep.subr.mxu0 %v6205_v1  ;;  %v2758_v3 = vrot.slane %v4890_v60, %v855_v45 }
0x10b0   : > { %2789 = vmatpush1.msra.mxu1 %v4860_v4  ;;  %v2766_v4 = vrot.slane %v4890_v60, %v863_v19 }
0x10b1   : > { %2790 = vmatprep.subr.mxu1 %v4858_v26 }
0x10b2   : > { %2791 = vmatpush1.msra.mxu1 %v4857_v18 }
0x10b3   : > { %2792 = vmatprep.subr.mxu1 %v4855_v59 }
0x10b4   : > { %2793 = vmatpush1.msra.mxu1 %v4854_v6 }
0x10b5   : > { %2794 = vmatprep.subr.mxu1 %v4852_v10 }
0x10b6   : > { %2795 = vmatpush1.msra.mxu1 %v4851_v24 }
0x10b7   : > { %2796 = vmatprep.subr.mxu1 %v4849_v0 }
0x10b8   : > { %2797 = vmatpush1.msra.mxu1 %v4848_v41 }
0x10b9   : > { %2798 = vmatprep.subr.mxu1 %v4846_v22 }
0x10ba   : > { %2799 = vmatpush1.msra.mxu1 %v4845_v12 }
0x10bb   : > { %2800 = vmatprep.subr.mxu1 %v4843_v43 }
0x10bc   : > { %2801 = vmatpush1.msra.mxu1 %v4842_v13 }
0x10bd   : > { %5642 = vmatprep.subr.mxu1 %v6205_v1 }
0x1121   : > { %v2648_v21 = vpop.xlane.xlu1 %2647 }
0x1122   : > { %v2654_v28 = vmul.f32 0.03125, %v2648_v21 }
0x1124   : > { %v7231_v20 = vsub.f32 %v7178_v30, %v2654_v28 }
0x1125   : > { %v2650_v23 = vpop.xlane.xlu0 %2649 }
0x1126   : > { %v2655_v29 = vmul.f32 0.03125, %v2650_v23  ;;  %v2660_v32 = vsel %vm639_vm2, %v7231_v20, 0.0 }
0x1127   : > { %v2663_v25 = vmul.f32 %v2660_v32, %v2660_v32 }
0x1128   : > { %v7237_v39 = vsub.f32 %v7182_v8, %v2655_v29 }
0x1129   : > { %2666 = vadd.xlane.f32.xlu0 %v2663_v25 }
0x112a   : > { %v2661_v47 = vsel %vm639_vm2, %v7237_v39, 0.0 }
0x112b   : > { %v2664_v34 = vmul.f32 %v2661_v47, %v2661_v47 }
0x112c   : > { %v2653_v35 = vpop.xlane.xlu1 %2652 }
0x112d   : > { %v2656_v37 = vmul.f32 0.03125, %v2653_v35  ;;  %2668 = vadd.xlane.f32.xlu1 %v2664_v34  ;;  %v4840_v34 = vld [vmem:[%s8091_s26 + $0x1] ss:$0 sm:$0xff] }
0x112f   : > { %v7243_v38 = vsub.f32 %v7186_v33, %v2656_v37  ;;  %v4841_v37 = vld [vmem:[%s8092_s30 + $0x1] ss:$0 sm:$0xff] }
0x1131   : > { %v2662_v40 = vsel %vm639_vm2, %v7243_v38, 0.0 }
0x1132   : > { %v2665_v42 = vmul.f32 %v2662_v40, %v2662_v40 }
0x1134   : > { %v2670_v48 = vsel %vm748_vm1, %v2665_v42, 0.0 }
0x1135   : > { %2671 = vadd.xlane.f32.xlu0 %v2670_v48 }
0x11b2   : > { %v2667_v31 = vpop.xlane.xlu0 %2666 }
0x11b3   : > { %v2673_v15 = vmul.f32 0.03125, %v2667_v31 }
0x11b5   : > { %v2676_v16 = vadd.f32 1e-05, %v2673_v15 }
0x11b6   : > { %v2669_v21 = vpop.xlane.xlu1 %2668 }
0x11b7   : > { %6045 = vrsqrt.f32 %v2676_v16  ;;  %v2674_v28 = vmul.f32 0.03125, %v2669_v21 }
0x11b9   : > { %v2677_v23 = vadd.f32 1e-05, %v2674_v28 }
0x11bb   : > { %6047 = vrsqrt.f32 %v2677_v23 }
0x11be   : > { %v2672_v29 = vpop.xlane.xlu0 %2671 }
0x11bf   : > { %v2675_v32 = vmul.f32 0.03125, %v2672_v29 }
0x11c1   : > { %v2678_v25 = vadd.f32 1e-05, %v2675_v32 }
0x11c3   : > { %6049 = vrsqrt.f32 %v2678_v25 }
0x11c4   : > { %v6046_v47 = vpop.eup %6045 }
0x11c5   : > { %v2682_v35 = vmul.f32 %v6046_v47, %v7231_v20 }
0x11c7   : > { %v2691_v40 = vmul.f32 %v4840_v34, %v2682_v35 }
0x11c8   : > { %v6048_v42 = vpop.eup %6047 }
0x11c9   : > { %v2700_v44 = vadd.f32 %v4841_v37, %v2691_v40  ;;  %v2683_v48 = vmul.f32 %v6048_v42, %v7237_v39 }
0x11cb   : > { %2835 = vmatmul.mubr.f32.vlgmr.msra.gmra.mxu1 %v2700_v44  ;;  %5634 = vmatmul.mubr.f32.vlgmr.msra.gmra.mxu0 %v2700_v44  ;;  %v2692_v50 = vmul.f32 %v4840_v34, %v2683_v48 }
0x11cc   : > { %2840 = vmatprep.mubr.f32.mxu1 %v6205_v1  ;;  %5636 = vmatprep.mubr.msk.f32.mxu0 %vm6206_vm0, %v6205_v1 }
0x11cd   : > { %v2701_v51 = vadd.f32 %v4841_v37, %v2692_v50 }
0x11cf   : > { %2841 = vmatmul.mubr.f32.gmra.mxu1 %v2701_v51  ;;  %5637 = vmatmul.mubr.f32.gmra.mxu0 %v2701_v51 }
0x11d0   : > { %v6050_v20 = vpop.eup %6049  ;;  %2846 = vmatprep.mubr.f32.mxu1 %v6205_v1  ;;  %5639 = vmatprep.mubr.msk.f32.mxu0 %vm6206_vm0, %v6205_v1 }
0x11d1   : > { %v2684_v52 = vmul.f32 %v6050_v20, %v7243_v38 }
0x11d3   : > { %v2693_v39 = vmul.f32 %v4840_v34, %v2684_v52 }
0x11d5   : > { %v2702_v53 = vadd.f32 %v4841_v37, %v2693_v39 }
0x11d7   : > { %2847 = vmatmul.mubr.f32.gmra.mxu1 %v2702_v53  ;;  %5640 = vmatmul.mubr.f32.gmra.mxu0 %v2702_v53 }
0x11d8   : > { %5648 = vmatprep.mubr.msk.f32.mxu1 %vm6206_vm0, %v6205_v1  ;;  %5663 = vmatprep.mubr.msk.f32.mxu0 %vm6206_vm0, %v6205_v1 }
0x128b   : > { %v2836_v55 = vpop.f32.mrf.mxu1  ;;  %v2919_v56 = vpop.f32.mrf.mxu0 }
0x128c   : > { %v7419_v7 = vadd.f32 %v2919_v56, %v2766_v4  ;;  %v7433_v27 = vadd.f32 %v2836_v55, %v2758_v3 }
0x128d   : > { %v2838_v57 = vpop.f32.mrf.mxu1  ;;  %v5635_v58 = vpop.f32.mrf.mxu0 }
0x128e   : > { %v7423_v19 = vadd.f32 %v2838_v57, %v2762_v63 }
0x128f   : > { %v2842_v61 = vpop.f32.mrf.mxu1  ;;  %v2924_v38 = vpop.f32.mrf.mxu0 }
0x1290   : > { %v7412_v45 = vadd.f32 %v2924_v38, %v2766_v4  ;;  %v7440_v10 = vadd.f32 %v2842_v61, %v2758_v3 }
0x1291   : > { %v2844_v49 = vpop.f32.mrf.mxu1  ;;  %v5638_v54 = vpop.f32.mrf.mxu0 }
0x1292   : > { %v7394_v2 = vadd.f32 %v2844_v49, %v2762_v63 }
0x1294   : > { %3169 = vrot.lane.b32.xlu0 %v7394_v2, %s8096_s23 }
0x1297   : > { %v2848_v17 = vpop.f32.mrf.mxu1  ;;  %v2929_v26 = vpop.f32.mrf.mxu0 }
0x1298   : > { %v7402_v18 = vadd.f32 %v2848_v17, %v2758_v3  ;;  %v7404_v5 = vadd.f32 %v2929_v26, %v2766_v4 }
0x1299   : > { %v2850_v9 = vpop.f32.mrf.mxu1  ;;  %v5641_v59 = vpop.f32.mrf.mxu0 }
0x129a   : > { %v7406_v6 = vadd.f32 %v2850_v9, %v2762_v63  ;;  %3165 = vrot.lane.b32.xlu0 %v7402_v18, %s8096_s23  ;;  %5658 = vmatpush3.msk.msra.mxu0 %vm748_vm1, %v7404_v5 }
0x129b   : > { %5659 = vmatprep.subr.mxu0 %v6205_v1 }
0x129c   : > { %3171 = vrot.lane.b32.xlu1 %v7406_v6, %s8096_s23  ;;  %5643 = vmatpush3.xpose.msk.msra.mxu1 %vm1035_vm3, %v7406_v6 }
0x129d   : > { %5660 = vmatpush3.msra.mxu0 %v7412_v45  ;;  %5644 = vmatprep.subr.mxu1 %v6205_v1 }
0x129e   : > { %5661 = vmatprep.subr.mxu0 %v6205_v1 }
0x129f   : > { %5662 = vmatpush3.msra.mxu0 %v7419_v7 }
0x12a0   : > { %3167 = vrot.lane.b32.xlu1 %v7423_v19, %s8096_s23  ;;  %5645 = vmatpush3.xpose.msk.msra.mxu1 %vm1035_vm3, %v7394_v2 }
0x12a1   : > { %5646 = vmatprep.subr.mxu1 %v6205_v1  ;;  %5687 = vmatprep.subr.mxu0 %v6205_v1 }
0x12a4   : > { %3161 = vrot.lane.b32.xlu1 %v7433_v27, %s8096_s23  ;;  %5647 = vmatpush3.xpose.msk.msra.mxu1 %vm1035_vm3, %v7423_v19 }
0x12a5   : > { %5672 = vmatprep.subr.mxu1 %v6205_v1 }
0x12a7   : > { %5649 = vmatmul.mubr.msk.f32.vlgmr.msra.gmra.mxu1 %vm1035_vm3, %v7433_v27 }
0x12a8   : > { %3163 = vrot.lane.b32.xlu1 %v7440_v10, %s8096_s23  ;;  %5651 = vmatprep.mubr.msk.f32.mxu1 %vm6206_vm0, %v6205_v1 }
0x12ab   : > { %5652 = vmatmul.mubr.msk.f32.gmra.mxu1 %vm1035_vm3, %v7440_v10 }
0x12ac   : > { %5654 = vmatprep.mubr.msk.f32.mxu1 %vm6206_vm0, %v6205_v1 }
0x12af   : > { %5655 = vmatmul.mubr.msk.f32.gmra.mxu1 %vm1035_vm3, %v7402_v18 }
0x12b0   : > { %5678 = vmatprep.mubr.msk.f32.mxu1 %vm6206_vm0, %v6205_v1 }
0x1306   : > { %v3170_v62 = vpop.permute.xlu0 %3169 }
0x130c   : > { %v3166_v22 = vpop.permute.xlu0 %3165 }
0x130e   : > { %v3172_v24 = vpop.permute.xlu1 %3171 }
0x130f   : > { %5673 = vmatpush3.xpose.msk.msra.mxu1 %vm1035_vm3, %v3172_v24 }
0x1310   : > { %5674 = vmatprep.subr.mxu1 %v6205_v1 }
0x1312   : > { %v3168_v0 = vpop.permute.xlu1 %3167 }
0x1313   : > { %5675 = vmatpush3.xpose.msk.msra.mxu1 %vm1035_vm3, %v3170_v62 }
0x1314   : > { %5676 = vmatprep.subr.mxu1 %v6205_v1 }
0x1316   : > { %v3162_v41 = vpop.permute.xlu1 %3161 }
0x1317   : > { %5677 = vmatpush3.xpose.msk.msra.mxu1 %vm1035_vm3, %v3168_v0 }
0x1318   : > { %5702 = vmatprep.subr.mxu1 %v6205_v1 }
0x131a   : > { %5679 = vmatmul.mubr.msk.f32.vlgmr.msra.gmra.mxu1 %vm1035_vm3, %v3162_v41  ;;  %v3164_v11 = vpop.permute.xlu1 %3163 }
0x131b   : > { %5681 = vmatprep.mubr.msk.f32.mxu1 %vm6206_vm0, %v6205_v1 }
0x131e   : > { %5682 = vmatmul.mubr.msk.f32.gmra.mxu1 %vm1035_vm3, %v3164_v11 }
0x131f   : > { %5684 = vmatprep.mubr.msk.f32.mxu1 %vm6206_vm0, %v6205_v1 }
0x1322   : > { %5685 = vmatmul.mubr.msk.f32.gmra.mxu1 %vm1035_vm3, %v3166_v22 }
0x1323   : > { %5704 = vmatprep.mubr.msk.f32.mxu1 %vm6206_vm0, %v6205_v1 }
0x1367   : > { %v3022_v12 = vpop.f32.mrf.mxu1 }
0x1368   : > { %v3036_v36 = vsel %vm1134_vm4, %v3022_v12, -inf }
0x1369   : > { %v5650_v43 = vpop.f32.mrf.mxu1  ;;  %3037 = vmax.xlane.f32.xlu1 %v3036_v36 }
0x136b   : > { %v3027_v13 = vpop.f32.mrf.mxu1 }
0x136c   : > { %v3039_v14 = vsel %vm1134_vm4, %v3027_v13, -inf }
0x136d   : > { %3040 = vmax.xlane.f32.xlu0 %v3039_v14  ;;  %v5653_v31 = vpop.f32.mrf.mxu1 }
0x136f   : > { %v3032_v15 = vpop.f32.mrf.mxu1 }
0x1370   : > { %v3042_v16 = vsel %vm1141_vm5, %v3032_v15, -inf }
0x1371   : > { %3043 = vmax.xlane.f32.xlu0 %v3042_v16  ;;  %v5656_v21 = vpop.f32.mrf.mxu1 }
0x1372   : > { %v4892_v21 = vld [vmem:[%s8094_s7 + $0x28] sm:$0xff] }
0x1373   : > { %5703 = vmatpush3.msra.mxu1 %v4892_v21 }
0x1374   : > { %5724 = vmatprep.subr.mxu1 %v6205_v1 }
0x13da   : > { %v3251_v28 = vpop.f32.mrf.mxu1 }
0x13db   : > { %v3265_v23 = vsel %vm1134_vm4, %v3251_v28, -inf }
0x13dc   : > { %3266 = vmax.xlane.f32.xlu0 %v3265_v23  ;;  %v5680_v29 = vpop.f32.mrf.mxu1 }
0x13de   : > { %v3256_v32 = vpop.f32.mrf.mxu1 }
0x13df   : > { %v3268_v25 = vsel %vm1134_vm4, %v3256_v32, -inf }
0x13e0   : > { %3269 = vmax.xlane.f32.xlu1 %v3268_v25  ;;  %v5683_v47 = vpop.f32.mrf.mxu1 }
0x13e2   : > { %v3261_v34 = vpop.f32.mrf.mxu1 }
0x13e3   : > { %v3271_v35 = vsel %vm1141_vm5, %v3261_v34, -inf }
0x13e4   : > { %3272 = vmax.xlane.f32.xlu0 %v3271_v35  ;;  %v5686_v37 = vpop.f32.mrf.mxu1  ;;  %v4891_v35 = vld [vmem:[%s8094_s7 + $0x20] sm:$0xff] }
0x13f1   : > { %3304 = vrot.lane.b32.xlu1 %v7404_v5, %s8096_s23 }
0x13f2   : > { %v3038_v44 = vpop.xlane.xlu1 %3037 }
0x13f3   : > { %v3045_v50 = vsub.f32 %v3022_v12, %v3038_v44 }
0x13f5   : > { %v3048_v20 = vmul.f32 1.442695, %v3045_v50 }
0x13f6   : > { %v3041_v40 = vpop.xlane.xlu0 %3040 }
0x13f7   : > { %v3046_v42 = vsub.f32 %v3027_v13, %v3041_v40 }
0x13f9   : > { %v3050_v48 = vmul.f32 1.442695, %v3046_v42 }
0x13fa   : > { %v3044_v51 = vpop.xlane.xlu0 %3043 }
0x13fb   : > { %6051 = vpow2.f32 %v3050_v48  ;;  %v3047_v52 = vsub.f32 %v3032_v15, %v3044_v51 }
0x13fc   : > { %6053 = vpow2.f32 %v3048_v20 }
0x13fd   : > { %v3052_v39 = vmul.f32 1.442695, %v3047_v52 }
0x13ff   : > { %6055 = vpow2.f32 %v3052_v39 }
0x1408   : > { %v6052_v53 = vpop.eup %6051 }
0x1409   : > { %v3057_v55 = vsel %vm1134_vm4, %v6052_v53, 0.0  ;;  %v6054_v56 = vpop.eup %6053 }
0x140a   : > { %3058 = vadd.xlane.f32.xlu0 %v3057_v55  ;;  %v3054_v57 = vsel %vm1134_vm4, %v6054_v56, 0.0 }
0x140c   : > { %v6056_v58 = vpop.eup %6055 }
0x140d   : > { %v3060_v60 = vsel %vm1141_vm5, %v6056_v58, 0.0 }
0x1415   : > { %3055 = vadd.xlane.f32.xlu1 %v3054_v57 }
0x1419   : > { %3061 = vadd.xlane.f32.xlu1 %v3060_v60 }
0x1465   : > { %v3267_v61 = vpop.xlane.xlu0 %3266 }
0x1466   : > { %v3274_v38 = vsub.f32 %v3251_v28, %v3267_v61 }
0x1468   : > { %v3277_v63 = vmul.f32 1.442695, %v3274_v38 }
0x1469   : > { %v3270_v49 = vpop.xlane.xlu1 %3269 }
0x146a   : > { %6057 = vpow2.f32 %v3277_v63  ;;  %v3275_v54 = vsub.f32 %v3256_v32, %v3270_v49 }
0x146c   : > { %v3279_v3 = vmul.f32 1.442695, %v3275_v54 }
0x146d   : > { %v3273_v4 = vpop.xlane.xlu0 %3272  ;;  %v3305_v11 = vpop.permute.xlu1 %3304 }
0x146e   : > { %6059 = vpow2.f32 %v3279_v3  ;;  %v3276_v17 = vsub.f32 %v3261_v34, %v3273_v4 }
0x1470   : > { %v3281_v26 = vmul.f32 1.442695, %v3276_v17 }
0x1472   : > { %6061 = vpow2.f32 %v3281_v26 }
0x1477   : > { %v6058_v9 = vpop.eup %6057 }
0x1478   : > { %v3283_v59 = vsel %vm1134_vm4, %v6058_v9, 0.0 }
0x1479   : > { %3284 = vadd.xlane.f32.xlu0 %v3283_v59 }
0x147b   : > { %v6060_v24 = vpop.eup %6059 }
0x147c   : > { %v3286_v62 = vsel %vm1134_vm4, %v6060_v24, 0.0 }
0x147d   : > { %3287 = vadd.xlane.f32.xlu1 %v3286_v62 }
0x147f   : > { %v6062_v0 = vpop.eup %6061 }
0x1480   : > { %v3289_v41 = vsel %vm1141_vm5, %v6062_v0, 0.0 }
0x1481   : > { %3290 = vadd.xlane.f32.xlu0 %v3289_v41 }
0x148e   : > { %3300 = vrot.lane.b32.xlu1 %v7419_v7, %s8096_s23 }
0x1492   : > { %3587 = vrot.lane.b32.xlu1 %v7406_v6, %s8097_s29 }
0x1493   : > { %v3059_v22 = vpop.xlane.xlu0 %3058 }
0x1496   : > { %3585 = vrot.lane.b32.xlu1 %v7394_v2, %s8097_s29 }
0x1497   : > { %3302 = vrot.lane.b32.xlu0 %v7412_v45, %s8096_s23  ;;  %s6117_s23 = sshll.u32 %s6210_s24, 4  ;;  %s6118_s23 = int_to_ptr.vmem [resolvable:$false] %s6117_s23 }
0x1498   : > { %s6119_s6 = scalar_lea.vmem %s6118_s23, 32 }
0x149a   : > { %3577 = vrot.lane.b32.xlu1 %v7433_v27, %s8097_s29 }
0x149b   : > { %3583 = vrot.lane.b32.xlu0 %v7423_v19, %s8097_s29 }
0x149e   : > { %3581 = vrot.lane.b32.xlu1 %v7402_v18, %s8097_s29  ;;  %v3056_v12 = vpop.xlane.xlu1 %3055 }
0x149f   : > { %6063 = vrcp.f32 %v3056_v12  ;;  %3579 = vrot.lane.b32.xlu0 %v7440_v10, %s8097_s29 }
0x14a0   : > { %6065 = vrcp.f32 %v3059_v22 }
0x14a2   : > { %v3062_v36 = vpop.xlane.xlu1 %3061 }
0x14a3   : > { %6067 = vrcp.f32 %v3062_v36 }
0x14ac   : > { %v6064_v43 = vpop.eup %6063 }
0x14ad   : > { %v3066_v13 = vmul.f32 %v6064_v43, %v6054_v56  ;;  %v6066_v14 = vpop.eup %6065 }
0x14ae   : > { %v3067_v31 = vmul.f32 %v6066_v14, %v6052_v53 }
0x14af   : > { %5664 = vmatmul.mubr.msk.f32.vlgmr.msra.gmra.mxu0 %vm1134_vm4, %v3066_v13 }
0x14b0   : > { %5688 = vmatpush3.msk.msra.mxu0 %vm748_vm1, %v3305_v11  ;;  %5666 = vmatprep.mubr.msk.f32.mxu0 %vm6206_vm0, %v6205_v1  ;;  %v6068_v15 = vpop.eup %6067 }
0x14b1   : > { %5689 = vmatprep.subr.mxu0 %v6205_v1  ;;  %v3068_v16 = vmul.f32 %v6068_v15, %v6056_v58 }
0x14b3   : > { %5667 = vmatmul.mubr.msk.f32.gmra.mxu0 %vm1134_vm4, %v3067_v31 }
0x14b4   : > { %5669 = vmatprep.mubr.msk.f32.mxu0 %vm6206_vm0, %v6205_v1 }
0x14b7   : > { %5670 = vmatmul.mubr.msk.f32.gmra.mxu0 %vm1134_vm4, %v3068_v16 }
0x14b8   : > { %5693 = vmatprep.mubr.msk.f32.mxu0 %vm6206_vm0, %v6205_v1 }
0x1502   : > { %v3285_v28 = vpop.xlane.xlu0 %3284 }
0x1503   : > { %6069 = vrcp.f32 %v3285_v28 }
0x1506   : > { %v3288_v23 = vpop.xlane.xlu1 %3287 }
0x1507   : > { %6071 = vrcp.f32 %v3288_v23 }
0x150a   : > { %v3291_v29 = vpop.xlane.xlu0 %3290  ;;  %v3301_v47 = vpop.permute.xlu1 %3300 }
0x150b   : > { %6073 = vrcp.f32 %v3291_v29 }
0x150e   : > { %v3303_v32 = vpop.permute.xlu0 %3302  ;;  %v3588_v53 = vpop.permute.xlu1 %3587 }
0x150f   : > { %5690 = vmatpush3.msra.mxu0 %v3303_v32 }
0x1510   : > { %v6070_v25 = vpop.eup %6069  ;;  %5691 = vmatprep.subr.mxu0 %v6205_v1 }
0x1511   : > { %v3295_v34 = vmul.f32 %v6070_v25, %v6058_v9  ;;  %5692 = vmatpush3.msra.mxu0 %v3301_v47 }
0x1512   : > { %5713 = vmatprep.subr.mxu0 %v6205_v1  ;;  %v3586_v58 = vpop.permute.xlu1 %3585  ;;  %v3584_v38 = vpop.permute.xlu0 %3583 }
0x1513   : > { %5694 = vmatmul.mubr.msk.f32.vlgmr.msra.gmra.mxu0 %vm1134_vm4, %v3295_v34 }
0x1514   : > { %v6072_v37 = vpop.eup %6071  ;;  %5696 = vmatprep.mubr.msk.f32.mxu0 %vm6206_vm0, %v6205_v1  ;;  %5714 = vmatpush3.msra.mxu0 %v4891_v35 }
0x1515   : > { %v3296_v40 = vmul.f32 %v6072_v37, %v6060_v24  ;;  %5739 = vmatprep.subr.mxu0 %v6205_v1 }
0x1516   : > { %v3578_v49 = vpop.permute.xlu1 %3577  ;;  %v3580_v54 = vpop.permute.xlu0 %3579 }
0x1517   : > { %5697 = vmatmul.mubr.msk.f32.gmra.mxu0 %vm1134_vm4, %v3296_v40 }
0x1518   : > { %v6074_v42 = vpop.eup %6073  ;;  %5699 = vmatprep.mubr.msk.f32.mxu0 %vm6206_vm0, %v6205_v1 }
0x1519   : > { %v3297_v44 = vmul.f32 %v6074_v42, %v6062_v0 }
0x151a   : > { %v3582_v3 = vpop.permute.xlu1 %3581 }
0x151b   : > { %5700 = vmatmul.mubr.msk.f32.gmra.mxu0 %vm1134_vm4, %v3297_v44 }
0x151c   : > { %5715 = vmatprep.mubr.msk.f32.mxu0 %vm6206_vm0, %v6205_v1 }
0x156f   : > { %v3147_v48 = vpop.f32.mrf.mxu0 }
0x1570   : > { %5716 = vmatmul.mubr.msk.f32.vlgmr.msra.gmra.mxu0 %vm1035_vm3, %v3147_v48 }
0x1571   : > { %v5665_v50 = vpop.f32.mrf.mxu0  ;;  %5718 = vmatprep.mubr.msk.f32.mxu0 %vm6206_vm0, %v6205_v1 }
0x1573   : > { %v3152_v51 = vpop.f32.mrf.mxu0 }
0x1574   : > { %5719 = vmatmul.mubr.msk.f32.gmra.mxu0 %vm1035_vm3, %v3152_v51 }
0x1575   : > { %v5668_v20 = vpop.f32.mrf.mxu0  ;;  %5721 = vmatprep.mubr.msk.f32.mxu0 %vm6206_vm0, %v6205_v1 }
0x1577   : > { %v3157_v52 = vpop.f32.mrf.mxu0 }
0x1578   : > { %5722 = vmatmul.mubr.msk.f32.gmra.mxu0 %vm1035_vm3, %v3157_v52 }
0x1579   : > { %v5671_v39 = vpop.f32.mrf.mxu0  ;;  %5745 = vmatprep.mubr.msk.f32.mxu0 %vm6206_vm0, %v6205_v1 }
0x15d3   : > { %v3385_v55 = vpop.f32.mrf.mxu0 }
0x15d4   : > { %5705 = vmatmul.mubr.msk.f32.vlgmr.msra.gmra.mxu1 %vm1035_vm3, %v3385_v55 }
0x15d5   : > { %5725 = vmatpush3.xpose.msk.msra.mxu1 %vm1035_vm3, %v3588_v53  ;;  %v5695_v56 = vpop.f32.mrf.mxu0  ;;  %5707 = vmatprep.mubr.msk.f32.mxu1 %vm6206_vm0, %v6205_v1 }
0x15d6   : > { %5726 = vmatprep.subr.mxu1 %v6205_v1 }
0x15d7   : > { %v3390_v57 = vpop.f32.mrf.mxu0 }
0x15d8   : > { %5708 = vmatmul.mubr.msk.f32.gmra.mxu1 %vm1035_vm3, %v3390_v57 }
0x15d9   : > { %5727 = vmatpush3.xpose.msk.msra.mxu1 %vm1035_vm3, %v3586_v58  ;;  %v5698_v60 = vpop.f32.mrf.mxu0  ;;  %5710 = vmatprep.mubr.msk.f32.mxu1 %vm6206_vm0, %v6205_v1 }
0x15da   : > { %5728 = vmatprep.subr.mxu1 %v6205_v1 }
0x15db   : > { %v3395_v61 = vpop.f32.mrf.mxu0 }
0x15dc   : > { %5711 = vmatmul.mubr.msk.f32.gmra.mxu1 %vm1035_vm3, %v3395_v61 }
0x15dd   : > { %5729 = vmatpush3.xpose.msk.msra.mxu1 %vm1035_vm3, %v3584_v38  ;;  %v5701_v63 = vpop.f32.mrf.mxu0  ;;  %5730 = vmatprep.mubr.msk.f32.mxu1 %vm6206_vm0, %v6205_v1 }
0x15de   : > { %5754 = vmatprep.subr.mxu1 %v6205_v1 }
0x15e0   : > { %5731 = vmatmul.mubr.msk.f32.vlgmr.msra.gmra.mxu1 %vm1035_vm3, %v3578_v49 }
0x15e1   : > { %5733 = vmatprep.mubr.msk.f32.mxu1 %vm6206_vm0, %v6205_v1 }
0x15e4   : > { %5734 = vmatmul.mubr.msk.f32.gmra.mxu1 %vm1035_vm3, %v3580_v54  ;;  %v4893_v54 = vld [vmem:[%s8094_s7 + $0x30] sm:$0xff] }
0x15e5   : > { %5736 = vmatprep.mubr.msk.f32.mxu1 %vm6206_vm0, %v6205_v1  ;;  %5755 = vmatpush3.msra.mxu1 %v4893_v54  ;;  %v7683_v54 = vld [vmem:[%s8095_s8 + $0x1] ss:$0 sm:$0xff] }
0x15e6   : > { %5780 = vmatprep.subr.mxu1 %v6205_v1 }
0x15e8   : > { %5737 = vmatmul.mubr.msk.f32.gmra.mxu1 %vm1035_vm3, %v3582_v3 }
0x15e9   : > { %5756 = vmatprep.mubr.msk.f32.mxu1 %vm6206_vm0, %v6205_v1 }
0x1630   : > { %v7564_v4 = vpop.f32.mrf.mxu0 }
0x1632   : > { %v5717_v17 = vpop.f32.mrf.mxu0 }
0x1634   : > { %v7566_v26 = vpop.f32.mrf.mxu0 }
0x1636   : > { %v5720_v9 = vpop.f32.mrf.mxu0 }
0x1638   : > { %v7568_v59 = vpop.f32.mrf.mxu0 }
0x163a   : > { %v5723_v24 = vpop.f32.mrf.mxu0 }
0x1694   : > { %v7570_v62 = vpop.f32.mrf.mxu1 }
0x1696   : > { %v5706_v0 = vpop.f32.mrf.mxu1 }
0x1698   : > { %v7572_v41 = vpop.f32.mrf.mxu1 }
0x169a   : > { %v5709_v11 = vpop.f32.mrf.mxu1 }
0x169c   : > { %v7574_v22 = vpop.f32.mrf.mxu1 }
0x169e   : > { %v5712_v12 = vpop.f32.mrf.mxu1 }
0x16a0   : > { %v3667_v36 = vpop.f32.mrf.mxu1 }
0x16a1   : > { %v3681_v43 = vsel %vm1134_vm4, %v3667_v36, -inf }
0x16a2   : > { %3682 = vmax.xlane.f32.xlu0 %v3681_v43  ;;  %v5732_v13 = vpop.f32.mrf.mxu1 }
0x16a4   : > { %v3672_v14 = vpop.f32.mrf.mxu1 }
0x16a5   : > { %v3684_v31 = vsel %vm1134_vm4, %v3672_v14, -inf }
0x16a6   : > { %3685 = vmax.xlane.f32.xlu1 %v3684_v31  ;;  %v5735_v15 = vpop.f32.mrf.mxu1 }
0x16a8   : > { %v3677_v16 = vpop.f32.mrf.mxu1 }
0x16a9   : > { %v3687_v21 = vsel %vm1141_vm5, %v3677_v16, -inf }
0x16aa   : > { %3688 = vmax.xlane.f32.xlu0 %v3687_v21  ;;  %v5738_v28 = vpop.f32.mrf.mxu1 }
0x16b7   : > { %3716 = vrot.lane.b32.xlu1 %v7412_v45, %s8097_s29 }
0x16bb   : > { %3714 = vrot.lane.b32.xlu1 %v7419_v7, %s8097_s29 }
0x16bf   : > { %3915 = vrot.lane.b32.xlu1 %v7406_v6, %s8098_s3 }
0x16c0   : > { %3718 = vrot.lane.b32.xlu0 %v7404_v5, %s8097_s29  ;;  %s8069_s29 = sshll.u32 %s6338_s2, 4 }
0x16c1   : > { %s4689_s21 = scalar_lea.hbm %s8050_s20, %s8069_s29 }
0x172b   : > { %v3683_v23 = vpop.xlane.xlu0 %3682 }
0x172c   : > { %v3690_v29 = vsub.f32 %v3667_v36, %v3683_v23  ;;  %v3564_v23 = vadd.f32 %v7564_v4, %v7570_v62 }
0x172e   : > { %v3693_v32 = vmul.f32 1.442695, %v3690_v29 }
0x172f   : > { %v3686_v25 = vpop.xlane.xlu1 %3685 }
0x1730   : > { %6075 = vpow2.f32 %v3693_v32  ;;  %v3691_v47 = vsub.f32 %v3672_v14, %v3686_v25 }
0x1732   : > { %v3695_v34 = vmul.f32 1.442695, %v3691_v47  ;;  %v3569_v47 = vadd.f32 %v7566_v26, %v7572_v41 }
0x1733   : > { %v3689_v35 = vpop.xlane.xlu0 %3688  ;;  %v3717_v40 = vpop.permute.xlu1 %3716 }
0x1734   : > { %6077 = vpow2.f32 %v3695_v34  ;;  %v3692_v37 = vsub.f32 %v3677_v16, %v3689_v35 }
0x1736   : > { %v3697_v42 = vmul.f32 1.442695, %v3692_v37 }
0x1737   : > { %v3719_v44 = vpop.permute.xlu0 %3718  ;;  %v3715_v6 = vpop.permute.xlu1 %3714 }
0x1738   : > { %6079 = vpow2.f32 %v3697_v42  ;;  %5740 = vmatpush3.msk.msra.mxu0 %vm748_vm1, %v3719_v44 }
0x1739   : > { %5741 = vmatprep.subr.mxu0 %v6205_v1 }
0x173a   : > { %5742 = vmatpush3.msra.mxu0 %v3717_v40  ;;  %v3574_v40 = vadd.f32 %v7568_v59, %v7574_v22 }
0x173b   : > { %5743 = vmatprep.subr.mxu0 %v6205_v1  ;;  %v3916_v55 = vpop.permute.xlu1 %3915 }
0x173c   : > { %5744 = vmatpush3.msra.mxu0 %v3715_v6 }
0x173d   : > { %v6076_v48 = vpop.eup %6075  ;;  %5765 = vmatprep.subr.mxu0 %v6205_v1 }
0x173e   : > { %v3699_v50 = vsel %vm1134_vm4, %v6076_v48, 0.0 }
0x173f   : > { %3700 = vadd.xlane.f32.xlu0 %v3699_v50 }
0x1741   : > { %v6078_v51 = vpop.eup %6077 }
0x1742   : > { %v3702_v20 = vsel %vm1134_vm4, %v6078_v51, 0.0 }
0x1743   : > { %3703 = vadd.xlane.f32.xlu0 %v3702_v20 }
0x1745   : > { %v6080_v52 = vpop.eup %6079 }
0x1746   : > { %v3705_v39 = vsel %vm1141_vm5, %v6080_v52, 0.0 }
0x1747   : > { %3706 = vadd.xlane.f32.xlu1 %v3705_v39 }
0x1758   : > { %3911 = vrot.lane.b32.xlu1 %v7423_v19, %s8098_s3 }
0x1759   : > { %3913 = vrot.lane.b32.xlu0 %v7394_v2, %s8098_s3 }
0x175d   : > { %3905 = vrot.lane.b32.xlu0 %v7433_v27, %s8098_s3 }
0x1761   : > { %3907 = vrot.lane.b32.xlu0 %v7440_v10, %s8098_s3 }
0x17c8   : > { %v3701_v53 = vpop.xlane.xlu0 %3700 }
0x17c9   : > { %6081 = vrcp.f32 %v3701_v53 }
0x17cc   : > { %v3704_v56 = vpop.xlane.xlu0 %3703 }
0x17cd   : > { %6083 = vrcp.f32 %v3704_v56 }
0x17d0   : > { %v3707_v57 = vpop.xlane.xlu1 %3706  ;;  %v3914_v27 = vpop.permute.xlu0 %3913 }
0x17d1   : > { %6085 = vrcp.f32 %v3707_v57 }
0x17d4   : > { %v3912_v38 = vpop.permute.xlu1 %3911  ;;  %v3906_v63 = vpop.permute.xlu0 %3905 }
0x17d6   : > { %v6082_v58 = vpop.eup %6081 }
0x17d7   : > { %v3711_v60 = vmul.f32 %v6082_v58, %v6076_v48 }
0x17d8   : > { %v3908_v49 = vpop.permute.xlu0 %3907 }
0x17d9   : > { %5746 = vmatmul.mubr.msk.f32.vlgmr.msra.gmra.mxu0 %vm1134_vm4, %v3711_v60 }
0x17da   : > { %v6084_v19 = vpop.eup %6083  ;;  %5766 = vmatpush3.xpose.msk.msra.mxu0 %vm1035_vm3, %v3916_v55  ;;  %5748 = vmatprep.mubr.msk.f32.mxu0 %vm6206_vm0, %v6205_v1 }
0x17db   : > { %5767 = vmatprep.subr.mxu0 %v6205_v1  ;;  %v3712_v2 = vmul.f32 %v6084_v19, %v6078_v51  ;;  %v4894_v51 = vld [vmem:[%s8094_s7 + $0x38] sm:$0xff] }
0x17dd   : > { %5749 = vmatmul.mubr.msk.f32.gmra.mxu0 %vm1134_vm4, %v3712_v2 }
0x17de   : > { %v6086_v10 = vpop.eup %6085  ;;  %5768 = vmatpush3.xpose.msk.msra.mxu0 %vm1035_vm3, %v3914_v27  ;;  %5751 = vmatprep.mubr.msk.f32.mxu0 %vm6206_vm0, %v6205_v1 }
0x17df   : > { %5769 = vmatprep.subr.mxu0 %v6205_v1  ;;  %v3713_v61 = vmul.f32 %v6086_v10, %v6080_v52 }
0x17e1   : > { %5752 = vmatmul.mubr.msk.f32.gmra.mxu0 %vm1134_vm4, %v3713_v61 }
0x17e2   : > { %5770 = vmatpush3.xpose.msk.msra.mxu0 %vm1035_vm3, %v3912_v38  ;;  %5771 = vmatprep.mubr.msk.f32.mxu0 %vm6206_vm0, %v6205_v1 }
0x17e3   : > { %5795 = vmatprep.subr.mxu0 %v6205_v1 }
0x17e5   : > { %5772 = vmatmul.mubr.msk.f32.vlgmr.msra.gmra.mxu0 %vm1035_vm3, %v3906_v63 }
0x17e6   : > { %5774 = vmatprep.mubr.msk.f32.mxu0 %vm6206_vm0, %v6205_v1  ;;  %5796 = vmatpush3.msra.mxu0 %v4894_v51  ;;  %v7777_v51 = vld [vmem:[%s8040_s10 + $0x1] ss:$0 sm:$0xff] }
0x17e7   : > { %5847 = vmatprep.subr.mxu0 %v6205_v1 }
0x17e9   : > { %5775 = vmatmul.mubr.msk.f32.gmra.mxu0 %vm1035_vm3, %v3908_v49 }
0x17ea   : > { %5777 = vmatprep.mubr.msk.f32.mxu0 %vm6206_vm0, %v6205_v1 }
0x1899   : > { %v3799_v3 = vpop.f32.mrf.mxu0 }
0x189a   : > { %5757 = vmatmul.mubr.msk.f32.vlgmr.msra.gmra.mxu1 %vm1035_vm3, %v3799_v3 }
0x189b   : > { %v5747_v17 = vpop.f32.mrf.mxu0  ;;  %5759 = vmatprep.mubr.msk.f32.mxu1 %vm6206_vm0, %v6205_v1 }
0x189d   : > { %v3804_v9 = vpop.f32.mrf.mxu0 }
0x189e   : > { %5760 = vmatmul.mubr.msk.f32.gmra.mxu1 %vm1035_vm3, %v3804_v9 }
0x189f   : > { %v5750_v24 = vpop.f32.mrf.mxu0  ;;  %5762 = vmatprep.mubr.msk.f32.mxu1 %vm6206_vm0, %v6205_v1 }
0x18a1   : > { %v3809_v0 = vpop.f32.mrf.mxu0 }
0x18a2   : > { %5763 = vmatmul.mubr.msk.f32.gmra.mxu1 %vm1035_vm3, %v3809_v0  ;;  %v4968_v0 = vld [vmem:[%s8041_s11 + $0xf8] sm:$0xff] }
0x18a3   : > { %v5753_v11 = vpop.f32.mrf.mxu0  ;;  %5786 = vmatprep.mubr.msk.f32.mxu1 %vm6206_vm0, %v6205_v1 }
0x18a5   : > { %v3995_v12 = vpop.f32.mrf.mxu0 }
0x18a6   : > { %v4009_v36 = vsel %vm1134_vm4, %v3995_v12, -inf }
0x18a7   : > { %4010 = vmax.xlane.f32.xlu1 %v4009_v36  ;;  %v5773_v43 = vpop.f32.mrf.mxu0  ;;  %v4965_v36 = vld [vmem:[%s8041_s11 + $0xe0] sm:$0xff] }
0x18a9   : > { %v4000_v13 = vpop.f32.mrf.mxu0 }
0x18aa   : > { %v4012_v62 = vsel %vm1134_vm4, %v4000_v13, -inf }
0x18ab   : > { %v5776_v14 = vpop.f32.mrf.mxu0 }
0x18b8   : > { %4046 = vrot.lane.b32.xlu1 %v7404_v5, %s8098_s3 }
0x18bc   : > { %4044 = vrot.lane.b32.xlu1 %v7412_v45, %s8098_s3 }
0x18c0   : > { %4042 = vrot.lane.b32.xlu1 %v7419_v7, %s8098_s3 }
0x1930   : > { %v4011_v31 = vpop.xlane.xlu1 %4010 }
0x1931   : > { %v4018_v15 = vsub.f32 %v3995_v12, %v4011_v31  ;;  %v4966_v12 = vld [vmem:[%s8041_s11 + $0xe8] sm:$0xff] }
0x1933   : > { %v4021_v16 = vmul.f32 1.442695, %v4018_v15 }
0x1934   : > { %v4047_v21 = vpop.permute.xlu1 %4046 }
0x1935   : > { %6087 = vpow2.f32 %v4021_v16  ;;  %5781 = vmatpush3.msk.msra.mxu1 %vm748_vm1, %v4047_v21 }
0x1936   : > { %5782 = vmatprep.subr.mxu1 %v6205_v1 }
0x1938   : > { %v4045_v28 = vpop.permute.xlu1 %4044 }
0x1939   : > { %5783 = vmatpush3.msra.mxu1 %v4045_v28  ;;  %v4964_v28 = vld [vmem:[%s8041_s11 + $0xd8] sm:$0xff] }
0x193a   : > { %5784 = vmatprep.subr.mxu1 %v6205_v1 }
0x193c   : > { %v4043_v5 = vpop.permute.xlu1 %4042 }
0x193d   : > { %5785 = vmatpush3.msra.mxu1 %v4043_v5  ;;  %v4963_v5 = vld [vmem:[%s8041_s11 + $0xd0] sm:$0xff] }
0x193e   : > { %5806 = vmatprep.subr.mxu1 %v6205_v1 }
0x1942   : > { %v6088_v45 = vpop.eup %6087 }
0x1943   : > { %v4027_v7 = vsel %vm1134_vm4, %v6088_v45, 0.0 }
0x1944   : > { %4028 = vadd.xlane.f32.xlu0 %v4027_v7  ;;  %v4961_v7 = vld [vmem:[%s8041_s11 + $0xc0] sm:$0xff] }
0x195a   : > { %v3888_v29 = vpop.f32.mrf.mxu1  ;;  %3909 = vrot.lane.b32.xlu0 %v7402_v18, %s8098_s3  ;;  %s631_s3 = scalar_lea.vmem [#allocation4], %s7873_s28 }
0x195b   : > { %v3902_v32 = vadd.f32 %v3888_v29, %v3564_v23  ;;  %v4960_v23 = vld [vmem:[%s8041_s11 + $0xb8] sm:$0xff]  ;;  %v4959_v29 = vld [vmem:[%s8041_s11 + $0xb0] sm:$0xff]  ;;  %s4691_s5 = sshll.u32 %s631_s3, 4  ;;  %s4692_s5 = int_to_ptr.vmem [resolvable:$true] %s4691_s5 }
0x195c   : > { %v5758_v25 = vpop.f32.mrf.mxu1  ;;  %s6113_s1 = scalar_lea.vmem %s4692_s5, 16  ;;  %p6120_p0 = scmp.lt.s32.totalorder %s4692_s5, %s6118_s23 }
0x195d   : > { %v4957_v25 = vld [vmem:[%s8041_s11 + $0xa0] sm:$0xff]  ;;  %p6114_p11 = scmp.ne.s32.totalorder %s4692_s5, %s6113_s1  ;;  %p6121_p1 = scmp.lt.s32.totalorder %s6119_s6, %s6113_s1 }
0x195e   : > { %v3893_v34 = vpop.f32.mrf.mxu1 }
0x195f   : > { %v7654_v35 = vadd.f32 %v3893_v34, %v3569_v47  ;;  %v4956_v47 = vld [vmem:[%s8041_s11 + $0x98] sm:$0xff]  ;;  %v4955_v34 = vld [vmem:[%s8041_s11 + $0x90] sm:$0xff]  ;;  %p6115_p12 = pnand %p6114_p11, %p6355_p5  ;;  %p6122_p2 = por %p6121_p1, %p6120_p0 }
0x1960   : > { %v5761_v37 = vpop.f32.mrf.mxu1 }
0x1961   : > { %v4954_v37 = vld [vmem:[%s8041_s11 + $0x88] sm:$0xff]  ;;  %p6116_p13 = pneg %p6115_p12 }
0x1962   : > { %v3898_v42 = vpop.f32.mrf.mxu1 }
0x1963   : > { %v7658_v44 = vadd.f32 %v3898_v42, %v3574_v40  ;;  %v4953_v40 = vld [vmem:[%s8041_s11 + $0x80] sm:$0xff]  ;;  %p6123_p3 = pnand %p6122_p2, %p6116_p13 }
0x1964   : > { %v5764_v4 = vpop.f32.mrf.mxu1 }
0x1979   : > { %4013 = vmax.xlane.f32.xlu0 %v4012_v62 }
0x19cd   : > { %v4029_v18 = vpop.xlane.xlu0 %4028 }
0x19ce   : > { %6089 = vrcp.f32 %v4029_v18 }
0x19d1   : > { %v3910_v6 = vpop.permute.xlu0 %3909 }
0x19d2   : > { %5778 = vmatmul.mubr.msk.f32.gmra.mxu0 %vm1035_vm3, %v3910_v6 }
0x19d3   : > { %5797 = vmatprep.mubr.msk.f32.mxu0 %vm6206_vm0, %v6205_v1 }
0x19db   : > { %v6090_v26 = vpop.eup %6089 }
0x19dc   : > { %v4039_v41 = vmul.f32 %v6090_v26, %v6088_v45  ;;  %v4962_v45 = vld [vmem:[%s8041_s11 + $0xc8] sm:$0xff] }
0x19de   : > { %5787 = vmatmul.mubr.msk.f32.vlgmr.msra.gmra.mxu1 %vm1134_vm4, %v4039_v41 }
0x19df   : > { %5789 = vmatprep.mubr.msk.f32.mxu1 %vm6206_vm0, %v6205_v1  ;;  %5807 = vmatpush3.msra.mxu1 %v4968_v0  ;;  %v4973_v0 = vld [vmem:[%s8043_s13 + $0x90] sm:$0xff] }
0x19e0   : > { %5808 = vmatprep.subr.mxu1 %v6205_v1 }
0x1a02   : > { %v4014_v59 = vpop.xlane.xlu0 %4013 }
0x1a03   : > { %v4019_v22 = vsub.f32 %v4000_v13, %v4014_v59 }
0x1a05   : > { %v4023_v48 = vmul.f32 1.442695, %v4019_v22 }
0x1a07   : > { %6091 = vpow2.f32 %v4023_v48 }
0x1a14   : > { %v6092_v50 = vpop.eup %6091 }
0x1a15   : > { %v4030_v20 = vsel %vm1134_vm4, %v6092_v50, 0.0 }
0x1a16   : > { %4031 = vadd.xlane.f32.xlu0 %v4030_v20 }
0x1a92   : > { %v4005_v52 = vpop.f32.mrf.mxu0 }
0x1a93   : > { %v4015_v39 = vsel %vm1141_vm5, %v4005_v52, -inf }
0x1a94   : > { %4016 = vmax.xlane.f32.xlu1 %v4015_v39  ;;  %v5779_v53 = vpop.f32.mrf.mxu0 }
0x1a9e   : > { %v4127_v55 = vpop.f32.mrf.mxu1 }
0x1a9f   : > { %5798 = vmatmul.mubr.msk.f32.vlgmr.msra.gmra.mxu0 %vm1035_vm3, %v4127_v55  ;;  %v4032_v56 = vpop.xlane.xlu0 %4031 }
0x1aa0   : > { %6093 = vrcp.f32 %v4032_v56  ;;  %v5788_v57 = vpop.f32.mrf.mxu1  ;;  %5800 = vmatprep.mubr.msk.f32.mxu0 %vm6206_vm0, %v6205_v1 }
0x1aad   : > { %v6094_v58 = vpop.eup %6093 }
0x1aae   : > { %v4040_v60 = vmul.f32 %v6094_v58, %v6092_v50  ;;  %v4986_v58 = vld [vmem:[%s8043_s13 + $0xf8] sm:$0xff] }
0x1aaf   : > { %5848 = vmatpush3.msra.mxu0 %v4986_v58 }
0x1ab0   : > { %5790 = vmatmul.mubr.msk.f32.gmra.mxu1 %vm1134_vm4, %v4040_v60  ;;  %5849 = vmatprep.subr.mxu0 %v6205_v1  ;;  %v4985_v60 = vld [vmem:[%s8043_s13 + $0xf0] sm:$0xff] }
0x1ab1   : > { %5792 = vmatprep.mubr.msk.f32.mxu1 %vm6206_vm0, %v6205_v1  ;;  %5850 = vmatpush3.msra.mxu0 %v4985_v60 }
0x1ab2   : > { %5851 = vmatprep.subr.mxu0 %v6205_v1 }
0x1b1d   : > { %v4017_v19 = vpop.xlane.xlu1 %4016 }
0x1b1e   : > { %v4020_v2 = vsub.f32 %v4005_v52, %v4017_v19  ;;  %v4984_v19 = vld [vmem:[%s8043_s13 + $0xe8] sm:$0xff] }
0x1b1f   : > { %5852 = vmatpush3.msra.mxu0 %v4984_v19 }
0x1b20   : > { %v4025_v27 = vmul.f32 1.442695, %v4020_v2  ;;  %5853 = vmatprep.subr.mxu0 %v6205_v1  ;;  %v4983_v2 = vld [vmem:[%s8043_s13 + $0xe0] sm:$0xff] }
0x1b21   : > { %5854 = vmatpush3.msra.mxu0 %v4983_v2 }
0x1b22   : > { %6095 = vpow2.f32 %v4025_v27  ;;  %5855 = vmatprep.subr.mxu0 %v6205_v1  ;;  %v4982_v27 = vld [vmem:[%s8043_s13 + $0xd8] sm:$0xff] }
0x1b23   : > { %5856 = vmatpush3.msra.mxu0 %v4982_v27 }
0x1b24   : > { %5857 = vmatprep.subr.mxu0 %v6205_v1 }
0x1b2f   : > { %v6096_v10 = vpop.eup %6095 }
0x1b30   : > { %v4033_v61 = vsel %vm1141_vm5, %v6096_v10, 0.0 }
0x1b31   : > { %4034 = vadd.xlane.f32.xlu0 %v4033_v61  ;;  %v4980_v61 = vld [vmem:[%s8043_s13 + $0xc8] sm:$0xff] }
0x1b5f   : > { %v4216_v38 = vpop.f32.mrf.mxu0 }
0x1b60   : > { %v4230_v63 = vadd.f32 %v4216_v38, %v3902_v32  ;;  %v4958_v32 = vld [vmem:[%s8041_s11 + $0xa8] sm:$0xff]  ;;  %v4979_v38 = vld [vmem:[%s8043_s13 + $0xc0] sm:$0xff] }
0x1b61   : > { %v5799_v49 = vpop.f32.mrf.mxu0 }
0x1b62   : > { %v4233_v3 = vadd.f32 %v4230_v63, %v7178_v30  ;;  %v4967_v30 = vld [vmem:[%s8041_s11 + $0xf0] sm:$0xff]  ;;  %v4978_v63 = vld [vmem:[%s8043_s13 + $0xb8] sm:$0xff] }
0x1b63   : > { %5809 = vmatpush3.msra.mxu1 %v4967_v30  ;;  %v4977_v49 = vld [vmem:[%s8043_s13 + $0xb0] sm:$0xff]  ;;  %v4972_v30 = vld [vmem:[%s8043_s13 + $0x88] sm:$0xff] }
0x1b64   : > { %v7687_v17 = vadd.f32 %v7683_v54, %v4233_v3  ;;  %5810 = vmatprep.subr.mxu1 %v6205_v1  ;;  %v4976_v3 = vld [vmem:[%s8043_s13 + $0xa8] sm:$0xff] }
0x1b65   : > { %5811 = vmatpush3.msra.mxu1 %v4966_v12 }
0x1b66   : > { %4251 = vadd.xlane.f32.xlu0 %v7687_v17  ;;  %5812 = vmatprep.subr.mxu1 %v6205_v1 }
0x1b67   : > { %5813 = vmatpush3.msra.mxu1 %v4965_v36 }
0x1b68   : > { %5814 = vmatprep.subr.mxu1 %v6205_v1 }
0x1b69   : > { %5815 = vmatpush3.msra.mxu1 %v4964_v28  ;;  %v7858_v28 = vld [vmem:[%s8042_s12 + $0x1] ss:$0 sm:$0xff] }
0x1b6a   : > { %5816 = vmatprep.subr.mxu1 %v6205_v1 }
0x1b6b   : > { %5817 = vmatpush3.msra.mxu1 %v4963_v5 }
0x1b6c   : > { %5818 = vmatprep.subr.mxu1 %v6205_v1 }
0x1b6d   : > { %5819 = vmatpush3.msra.mxu1 %v4962_v45 }
0x1b6e   : > { %5820 = vmatprep.subr.mxu1 %v6205_v1 }
0x1b6f   : > { %5821 = vmatpush3.msra.mxu1 %v4961_v7 }
0x1b70   : > { %v4132_v9 = vpop.f32.mrf.mxu1  ;;  %5822 = vmatprep.subr.mxu1 %v6205_v1 }
0x1b71   : > { %5801 = vmatmul.mubr.msk.f32.gmra.mxu0 %vm1035_vm3, %v4132_v9  ;;  %5823 = vmatpush3.msra.mxu1 %v4960_v23  ;;  %v4975_v9 = vld [vmem:[%s8043_s13 + $0xa0] sm:$0xff] }
0x1b72   : > { %v5791_v24 = vpop.f32.mrf.mxu1  ;;  %5803 = vmatprep.mubr.msk.f32.mxu0 %vm6206_vm0, %v6205_v1  ;;  %5824 = vmatprep.subr.mxu1 %v6205_v1 }
0x1b73   : > { %5825 = vmatpush3.msra.mxu1 %v4959_v29  ;;  %v4974_v24 = vld [vmem:[%s8043_s13 + $0x98] sm:$0xff] }
0x1b74   : > { %5826 = vmatprep.subr.mxu1 %v6205_v1 }
0x1b75   : > { %5827 = vmatpush3.msra.mxu1 %v4958_v32 }
0x1b76   : > { %5828 = vmatprep.subr.mxu1 %v6205_v1 }
0x1b77   : > { %5829 = vmatpush3.msra.mxu1 %v4957_v25 }
0x1b78   : > { %5830 = vmatprep.subr.mxu1 %v6205_v1 }
0x1b79   : > { %5831 = vmatpush3.msra.mxu1 %v4956_v47 }
0x1b7a   : > { %5832 = vmatprep.subr.mxu1 %v6205_v1 }
0x1b7b   : > { %5833 = vmatpush3.msra.mxu1 %v4955_v34 }
0x1b7c   : > { %5834 = vmatprep.subr.mxu1 %v6205_v1 }
0x1b7d   : > { %5835 = vmatpush3.msra.mxu1 %v4954_v37 }
0x1b7e   : > { %5836 = vmatprep.subr.mxu1 %v6205_v1 }
0x1b7f   : > { %5837 = vmatpush3.msra.mxu1 %v4953_v40 }
0x1b80   : > { %5888 = vmatprep.subr.mxu1 %v6205_v1 }
0x1bba   : > { %v4035_v11 = vpop.xlane.xlu0 %4034 }
0x1bbb   : > { %6097 = vrcp.f32 %v4035_v11  ;;  %v4971_v11 = vld [vmem:[%s8043_s13 + $0x80] sm:$0xff] }
0x1bc8   : > { %v6098_v43 = vpop.eup %6097 }
0x1bc9   : > { %v4041_v13 = vmul.f32 %v6098_v43, %v6096_v10  ;;  %v4981_v10 = vld [vmem:[%s8043_s13 + $0xd0] sm:$0xff] }
0x1bca   : > { %5858 = vmatpush3.msra.mxu0 %v4981_v10 }
0x1bcb   : > { %5793 = vmatmul.mubr.msk.f32.gmra.mxu1 %vm1134_vm4, %v4041_v13  ;;  %5859 = vmatprep.subr.mxu0 %v6205_v1 }
0x1bcc   : > { %5838 = vmatprep.mubr.msk.f32.mxu1 %vm6206_vm0, %v6205_v1  ;;  %5860 = vmatpush3.msra.mxu0 %v4980_v61 }
0x1bcd   : > { %5861 = vmatprep.subr.mxu0 %v6205_v1 }
0x1bce   : > { %5862 = vmatpush3.msra.mxu0 %v4979_v38 }
0x1bcf   : > { %5863 = vmatprep.subr.mxu0 %v6205_v1 }
0x1bd0   : > { %5864 = vmatpush3.msra.mxu0 %v4978_v63 }
0x1bd1   : > { %5865 = vmatprep.subr.mxu0 %v6205_v1 }
0x1bd2   : > { %5866 = vmatpush3.msra.mxu0 %v4977_v49 }
0x1bd3   : > { %5867 = vmatprep.subr.mxu0 %v6205_v1 }
0x1bd4   : > { %5868 = vmatpush3.msra.mxu0 %v4976_v3 }
0x1bd5   : > { %5869 = vmatprep.subr.mxu0 %v6205_v1 }
0x1bd6   : > { %5870 = vmatpush3.msra.mxu0 %v4975_v9 }
0x1bd7   : > { %5871 = vmatprep.subr.mxu0 %v6205_v1 }
0x1bd8   : > { %5872 = vmatpush3.msra.mxu0 %v4974_v24 }
0x1bd9   : > { %5873 = vmatprep.subr.mxu0 %v6205_v1 }
0x1bda   : > { %5874 = vmatpush3.msra.mxu0 %v4973_v0 }
0x1bdb   : > { %5875 = vmatprep.subr.mxu0 %v6205_v1 }
0x1bdc   : > { %5876 = vmatpush3.msra.mxu0 %v4972_v30 }
0x1bdd   : > { %5877 = vmatprep.subr.mxu0 %v6205_v1 }
0x1bde   : > { %5878 = vmatpush3.msra.mxu0 %v4971_v11 }
0x1bef   : > { %v4252_v14 = vpop.xlane.xlu0 %4251 }
0x1bf0   : > { %v4258_v31 = vmul.f32 0.03125, %v4252_v14 }
0x1bf2   : > { %v4261_v15 = vsub.f32 %v7687_v17, %v4258_v31 }
0x1bf4   : > { %v4264_v16 = vsel %vm639_vm2, %v4261_v15, 0.0 }
0x1bf5   : > { %v4267_v21 = vmul.f32 %v4264_v16, %v4264_v16 }
0x1bf7   : > { %4270 = vadd.xlane.f32.xlu1 %v4267_v21 }
0x1c31   : > { %v4221_v42 = vpop.f32.mrf.mxu0 }
0x1c32   : > { %v4231_v4 = vadd.f32 %v4221_v42, %v7654_v35  ;;  %v7772_v35 = vld [vmem:[%s8039_s9 + $0x1] ss:$0 sm:$0xff] }
0x1c33   : > { %v5802_v62 = vpop.f32.mrf.mxu0 }
0x1c34   : > { %v4234_v18 = vadd.f32 %v4231_v4, %v7182_v8 }
0x1c36   : > { %v4245_v6 = vadd.f32 %v7683_v54, %v4234_v18 }
0x1c38   : > { %4253 = vadd.xlane.f32.xlu0 %v4245_v6 }
0x1c80   : > { %v4271_v26 = vpop.xlane.xlu1 %4270 }
0x1c81   : > { %v4277_v41 = vmul.f32 0.03125, %v4271_v26 }
0x1c83   : > { %v4280_v59 = vadd.f32 1e-05, %v4277_v41 }
0x1c85   : > { %6099 = vrsqrt.f32 %v4280_v59 }
0x1c8b   : > { %v4137_v22 = vpop.f32.mrf.mxu1 }
0x1c8c   : > { %5804 = vmatmul.mubr.msk.f32.gmra.mxu0 %vm1035_vm3, %v4137_v22 }
0x1c8d   : > { %v5794_v48 = vpop.f32.mrf.mxu1  ;;  %5879 = vmatprep.mubr.msk.f32.mxu0 %vm6206_vm0, %v6205_v1 }
0x1c92   : > { %v6100_v50 = vpop.eup %6099 }
0x1c93   : > { %v4286_v8 = vmul.f32 %v6100_v50, %v4261_v15 }
0x1c95   : > { %v4295_v20 = vmul.f32 %v7772_v35, %v4286_v8 }
0x1c97   : > { %v4304_v52 = vadd.f32 %v7777_v51, %v4295_v20 }
0x1c99   : > { %5839 = vmatmul.mubr.f32.vlgmr.msra.gmra.mxu1 %v4304_v52 }
0x1c9a   : > { %5841 = vmatprep.mubr.msk.f32.mxu1 %vm6206_vm0, %v6205_v1 }
0x1cc1   : > { %v4254_v39 = vpop.xlane.xlu0 %4253 }
0x1cc2   : > { %v4259_v53 = vmul.f32 0.03125, %v4254_v39 }
0x1cc4   : > { %v7783_v55 = vsub.f32 %v4245_v6, %v4259_v53 }
0x1cc6   : > { %v4265_v56 = vsel %vm639_vm2, %v7783_v55, 0.0 }
0x1cc7   : > { %v4268_v57 = vmul.f32 %v4265_v56, %v4265_v56  ;;  %v4988_v56 = vld [vmem:[%s8044_s14 + $0x1] ss:$0 sm:$0xff] }
0x1cc9   : > { %4272 = vadd.xlane.f32.xlu0 %v4268_v57 }
0x1d4c   : > { %v4226_v12 = vpop.f32.mrf.mxu0 }
0x1d4d   : > { %v4232_v36 = vadd.f32 %v4226_v12, %v7658_v44 }
0x1d4e   : > { %v5805_v43 = vpop.f32.mrf.mxu0 }
0x1d4f   : > { %v4235_v13 = vadd.f32 %v4232_v36, %v7186_v33  ;;  %v4585_v36 = vld [vmem:[%s8047_s17 + $0x68] sm:$0xff]  ;;  %v4583_v43 = vld [vmem:[%s8047_s17 + $0x58] sm:$0xff] }
0x1d51   : > { %v4246_v14 = vadd.f32 %v7683_v54, %v4235_v13  ;;  %v4582_v13 = vld [vmem:[%s8047_s17 + $0x50] sm:$0xff] }
0x1d52   : > { %v4273_v31 = vpop.xlane.xlu0 %4272 }
0x1d53   : > { %v4278_v15 = vmul.f32 0.03125, %v4273_v31  ;;  %v4255_v16 = vsel %vm748_vm1, %v4246_v14, 0.0  ;;  %v4580_v31 = vld [vmem:[%s8047_s17 + $0x40] sm:$0xff] }
0x1d54   : > { %4256 = vadd.xlane.f32.xlu1 %v4255_v16  ;;  %v4578_v16 = vld [vmem:[%s8047_s17 + $0x30] sm:$0xff] }
0x1d55   : > { %v4281_v21 = vadd.f32 1e-05, %v4278_v15  ;;  %v4579_v15 = vld [vmem:[%s8047_s17 + $0x38] sm:$0xff] }
0x1d57   : > { %6101 = vrsqrt.f32 %v4281_v21  ;;  %v4577_v21 = vld [vmem:[%s8047_s17 + $0x28] sm:$0xff] }
0x1d59   : > { %v4398_v5 = vpop.f32.mrf.mxu1 }
0x1d5a   : > { %v4399_v44 = vadd.f32 %v7858_v28, %v4398_v5  ;;  %v4576_v5 = vld [vmem:[%s8047_s17 + $0x20] sm:$0xff] }
0x1d5b   : > { %v5840_v45 = vpop.f32.mrf.mxu1 }
0x1d5c   : > { %v4412_v7 = vmul.f32 %v4399_v44, %v4399_v44  ;;  %v4574_v45 = vld [vmem:[%s8047_s17 + $0x10] sm:$0xff] }
0x1d5e   : > { %v4415_v33 = vmul.f32 %v4412_v7, %v4399_v44  ;;  %v4573_v7 = vld [vmem:[%s8047_s17 + $0x8] sm:$0xff] }
0x1d60   : > { %v4418_v23 = vmul.f32 0.044715, %v4415_v33  ;;  %v4572_v33 = vld [vmem:[%s8047_s17] sm:$0xff] }
0x1d62   : > { %v4421_v54 = vadd.f32 %v4418_v23, %v4399_v44 }
0x1d64   : > { %v6102_v29 = vpop.eup %6101  ;;  %v4424_v32 = vmul.f32 0.7978846, %v4421_v54 }
0x1d65   : > { %v4287_v25 = vmul.f32 %v6102_v29, %v7783_v55 }
0x1d66   : > { %6103 = vtanh.f32 %v4424_v32 }
0x1d67   : > { %v4296_v47 = vmul.f32 %v7772_v35, %v4287_v25 }
0x1d69   : > { %v4305_v34 = vadd.f32 %v7777_v51, %v4296_v47 }
0x1d6b   : > { %5842 = vmatmul.mubr.f32.gmra.mxu1 %v4305_v34 }
0x1d6c   : > { %5844 = vmatprep.mubr.msk.f32.mxu1 %vm6206_vm0, %v6205_v1 }
0x1d73   : > { %v6104_v37 = vpop.eup %6103 }
0x1d74   : > { %v4430_v40 = vadd.f32 1.0, %v6104_v37 }
0x1d76   : > { %v4433_v42 = vmul.f32 0.5, %v4430_v40 }
0x1d78   : > { %v4436_v4 = vmul.f32 %v4433_v42, %v4399_v44  ;;  %v4575_v44 = vld [vmem:[%s8047_s17 + $0x18] sm:$0xff] }
0x1d7a   : > { %5880 = vmatmul.mubr.f32.vlgmr.msra.gmra.mxu0 %v4436_v4 }
0x1d7b   : > { %5882 = vmatprep.mubr.msk.f32.mxu0 %vm6206_vm0, %v6205_v1 }
0x1ddd   : > { %v4257_v62 = vpop.xlane.xlu1 %4256 }
0x1dde   : > { %v4260_v18 = vmul.f32 0.03125, %v4257_v62 }
0x1de0   : > { %v4263_v6 = vsub.f32 %v4246_v14, %v4260_v18  ;;  %v4581_v14 = vld [vmem:[%s8047_s17 + $0x48] sm:$0xff] }
0x1de2   : > { %v4266_v26 = vsel %vm639_vm2, %v4263_v6, 0.0 }
0x1de3   : > { %v4269_v41 = vmul.f32 %v4266_v26, %v4266_v26 }
0x1de5   : > { %v4274_v59 = vsel %vm748_vm1, %v4269_v41, 0.0 }
0x1de6   : > { %4275 = vadd.xlane.f32.xlu1 %v4274_v59  ;;  %v4989_v59 = vld [vmem:[%s8045_s15] ss:$0 sm:$0xff] }
0x1e2b   : > { %v4403_v22 = vpop.f32.mrf.mxu1 }
0x1e2c   : > { %v4404_v48 = vadd.f32 %v7858_v28, %v4403_v22 }
0x1e2d   : > { %v5843_v50 = vpop.f32.mrf.mxu1 }
0x1e2e   : > { %v4413_v8 = vmul.f32 %v4404_v48, %v4404_v48 }
0x1e30   : > { %v4416_v20 = vmul.f32 %v4413_v8, %v4404_v48 }
0x1e32   : > { %v4419_v52 = vmul.f32 0.044715, %v4416_v20 }
0x1e34   : > { %v4422_v39 = vadd.f32 %v4419_v52, %v4404_v48 }
0x1e36   : > { %v4425_v53 = vmul.f32 0.7978846, %v4422_v39 }
0x1e38   : > { %6105 = vtanh.f32 %v4425_v53 }
0x1e3a   : > { %v4522_v55 = vpop.f32.mrf.mxu0 }
0x1e3b   : > { %v4534_v57 = vadd.f32 %v4522_v55, %v7687_v17 }
0x1e3c   : > { %v5881_v58 = vpop.f32.mrf.mxu0 }
0x1e3d   : > { %v4543_v60 = vadd.f32 %v4988_v56, %v4534_v57 }
0x1e3f   : > { %4546 = vadd.xlane.f32.xlu0 %v4543_v60  ;;  %4660 = vst [vmem:[%s631_s3] sm:$0x1] %v4543_v60 }
0x1e45   : > { %v6106_v19 = vpop.eup %6105 }
0x1e46   : > { %v4431_v2 = vadd.f32 1.0, %v6106_v19 }
0x1e48   : > { %v4434_v27 = vmul.f32 0.5, %v4431_v2 }
0x1e4a   : > { %v4437_v10 = vmul.f32 %v4434_v27, %v4404_v48  ;;  %v4990_v48 = vld [vmem:[%s8046_s16] ss:$0 sm:$0xff] }
0x1e4c   : > { %5883 = vmatmul.mubr.f32.gmra.mxu0 %v4437_v10 }
0x1e4d   : > { %5885 = vmatprep.mubr.msk.f32.mxu0 %vm6206_vm0, %v6205_v1 }
0x1e6f   : > { %v4276_v61 = vpop.xlane.xlu1 %4275 }
0x1e70   : > { %v4279_v38 = vmul.f32 0.03125, %v4276_v61 }
0x1e72   : > { %v4282_v63 = vadd.f32 1e-05, %v4279_v38 }
0x1e74   : > { %6107 = vrsqrt.f32 %v4282_v63 }
0x1e81   : > { %v6108_v49 = vpop.eup %6107 }
0x1e82   : > { %v4288_v17 = vmul.f32 %v6108_v49, %v4263_v6 }
0x1e84   : > { %v4297_v3 = vmul.f32 %v7772_v35, %v4288_v17  ;;  %v4587_v35 = vld [vmem:[%s8047_s17 + $0x78] sm:$0xff] }
0x1e85   : > { %5889 = vmatpush3.msra.mxu1 %v4587_v35 }
0x1e86   : > { %v4306_v9 = vadd.f32 %v7777_v51, %v4297_v3  ;;  %5890 = vmatprep.subr.mxu1 %v6205_v1  ;;  %v4586_v51 = vld [vmem:[%s8047_s17 + $0x70] sm:$0xff] }
0x1e87   : > { %5891 = vmatpush3.msra.mxu1 %v4586_v51 }
0x1e88   : > { %5845 = vmatmul.mubr.f32.gmra.mxu1 %v4306_v9  ;;  %5892 = vmatprep.subr.mxu1 %v6205_v1 }
0x1e89   : > { %5920 = vmatprep.mubr.msk.f32.mxu1 %vm6206_vm0, %v6205_v1  ;;  %5893 = vmatpush3.msra.mxu1 %v4585_v36 }
0x1e8a   : > { %5894 = vmatprep.subr.mxu1 %v6205_v1 }
0x1e8b   : > { %5895 = vmatpush3.msra.mxu1 %v4584_v46 }
0x1e8c   : > { %5896 = vmatprep.subr.mxu1 %v6205_v1 }
0x1e8d   : > { %5897 = vmatpush3.msra.mxu1 %v4583_v43 }
0x1e8e   : > { %5898 = vmatprep.subr.mxu1 %v6205_v1 }
0x1e8f   : > { %5899 = vmatpush3.msra.mxu1 %v4582_v13 }
0x1e90   : > { %5900 = vmatprep.subr.mxu1 %v6205_v1 }
0x1e91   : > { %5901 = vmatpush3.msra.mxu1 %v4581_v14 }
0x1e92   : > { %5902 = vmatprep.subr.mxu1 %v6205_v1 }
0x1e93   : > { %5903 = vmatpush3.msra.mxu1 %v4580_v31 }
0x1e94   : > { %5904 = vmatprep.subr.mxu1 %v6205_v1 }
0x1e95   : > { %5905 = vmatpush3.msra.mxu1 %v4579_v15 }
0x1e96   : > { %5906 = vmatprep.subr.mxu1 %v6205_v1 }
0x1e97   : > { %5907 = vmatpush3.msra.mxu1 %v4578_v16 }
0x1e98   : > { %5908 = vmatprep.subr.mxu1 %v6205_v1 }
0x1e99   : > { %5909 = vmatpush3.msra.mxu1 %v4577_v21 }
0x1e9a   : > { %5910 = vmatprep.subr.mxu1 %v6205_v1 }
0x1e9b   : > { %5911 = vmatpush3.msra.mxu1 %v4576_v5 }
0x1e9c   : > { %5912 = vmatprep.subr.mxu1 %v6205_v1 }
0x1e9d   : > { %5913 = vmatpush3.msra.mxu1 %v4575_v44 }
0x1e9e   : > { %5914 = vmatprep.subr.mxu1 %v6205_v1 }
0x1e9f   : > { %5915 = vmatpush3.msra.mxu1 %v4574_v45 }
0x1ea0   : > { %5916 = vmatprep.subr.mxu1 %v6205_v1 }
0x1ea1   : > { %5917 = vmatpush3.msra.mxu1 %v4573_v7 }
0x1ea2   : > { %5918 = vmatprep.subr.mxu1 %v6205_v1 }
0x1ea3   : > { %5919 = vmatpush3.msra.mxu1 %v4572_v33 }
0x1ec8   : > { %v4547_v24 = vpop.xlane.xlu0 %4546 }
0x1ec9   : > { %v4548_v0 = vmul.f32 0.03125, %v4547_v24 }
0x1ecb   : > { %v7888_v30 = vsub.f32 %v4543_v60, %v4548_v0 }
0x1ecd   : > { %v4550_v11 = vsel %vm639_vm2, %v7888_v30, 0.0 }
0x1ece   : > { %v4551_v12 = vmul.f32 %v4550_v11, %v4550_v11 }
0x1ed0   : > { %4552 = vadd.xlane.f32.xlu1 %v4551_v12 }
0x1f0c   : > { %v4527_v23 = vpop.f32.mrf.mxu0 }
0x1f0e   : > { %v5884_v54 = vpop.f32.mrf.mxu0 }
0x1f48   : > { %v4408_v29 = vpop.f32.mrf.mxu1 }
0x1f49   : > { %v4409_v32 = vadd.f32 %v7858_v28, %v4408_v29 }
0x1f4a   : > { %v5846_v25 = vpop.f32.mrf.mxu1 }
0x1f4b   : > { %v4414_v47 = vmul.f32 %v4409_v32, %v4409_v32 }
0x1f4d   : > { %v4417_v34 = vmul.f32 %v4414_v47, %v4409_v32 }
0x1f4f   : > { %v4420_v37 = vmul.f32 0.044715, %v4417_v34 }
0x1f51   : > { %v4423_v40 = vadd.f32 %v4420_v37, %v4409_v32 }
0x1f53   : > { %v4426_v42 = vmul.f32 0.7978846, %v4423_v40 }
0x1f55   : > { %6109 = vtanh.f32 %v4426_v42 }
0x1f59   : > { %v4553_v4 = vpop.xlane.xlu1 %4552 }
0x1f5a   : > { %v4554_v62 = vmul.f32 0.03125, %v4553_v4 }
0x1f5c   : > { %v4555_v18 = vadd.f32 1e-05, %v4554_v62 }
0x1f5e   : > { %6111 = vrsqrt.f32 %v4555_v18 }
0x1f62   : > { %v6110_v1 = vpop.eup %6109 }
0x1f63   : > { %v4432_v6 = vadd.f32 1.0, %v6110_v1 }
0x1f65   : > { %v4435_v26 = vmul.f32 0.5, %v4432_v6 }
0x1f67   : > { %v4438_v41 = vmul.f32 %v4435_v26, %v4409_v32 }
0x1f69   : > { %5886 = vmatmul.mubr.f32.gmra.mxu0 %v4438_v41 }
0x1f6b   : > { %v6112_v28 = vpop.eup %6111 }
0x1f6c   : > { %v4557_v22 = vmul.f32 %v6112_v28, %v7888_v30 }
0x1f6e   : > { %v4564_v50 = vmul.f32 %v4989_v59, %v4557_v22 }
0x1f70   : > { %v4571_v8 = vadd.f32 %v4990_v48, %v4564_v50 }
0x1f72   : > { %5921 = vmatmul.mubr.f32.vlgmr.msra.gmra.mxu1 %v4571_v8 }
0x1f73   : > { %6126 = shalt.err (!%p6123_p3)
}
0x1f74   : > { %s6127_s25 = scalar_lea.hbm %s4689_s21, 16  ;;  %s6131_s29 = scalar_lea.hbm %s8050_s20, 32 }
0x1f75   : > { %p6128_p4 = scmp.ne.s32.totalorder %s4689_s21, %s6127_s25  ;;  %p6132_p9 = scmp.lt.s32.totalorder %s4689_s21, %s8050_s20 }
0x1f76   : > { %p6133_p10 = scmp.lt.s32.totalorder %s6131_s29, %s6127_s25 }
0x1f77   : > { %p6129_p7 = pnand %p6128_p4, %p6355_p5 }
0x1f78   : > { %p6134_p11 = por %p6133_p10, %p6132_p9 }
0x1f79   : > { %p6130_p8 = pneg %p6129_p7 }
0x1f7b   : > { %p6135_p12 = pnand %p6134_p11, %p6130_p8 }
0x1f7d   : > { %6138 = shalt.err (!%p6135_p12)
}
0x1f7e   : > { %5931 = dma.vmem_to_hbm [thread:$0]  (%p6355_p5), %s4692_s5, 16, %s4689_s21, %s4666_s0   ;;  %v4588_v39 = vld [vmem:[%s8048_s18] sm:$0x1] }
0x1f7f   : > { %s625_s24 = scalar_lea.vmem [#allocation2], %s7873_s28  ;;  %s8099_s8 = sshll.u32 %s6338_s2, 4 }
0x1f80   : > { %s4678_s7 = sshll.u32 %s625_s24, 4  ;;  %s7994_s25 = scalar_lea.hbm %s8049_s19, %s8099_s8  ;;  %s4679_s7 = int_to_ptr.vmem [resolvable:$true] %s4678_s7 }
0x1f81   : > { %s4662_s5 = scalar_lea.sflag [#allocation3], %s7873_s28  ;;  %s6139_s21 = scalar_lea.vmem %s4679_s7, 16 }
0x1f82   : > { %p6140_p13 = scmp.ne.s32.totalorder %s4679_s7, %s6139_s21  ;;  %s6211_s0 = smov [#allocation2]  }
0x1f83   : > { %s6143_s3 = sshll.u32 %s6211_s0, 4  ;;  %s6144_s3 = int_to_ptr.vmem [resolvable:$false] %s6143_s3 }
0x1f84   : > { %p6141_p0 = pnand %p6140_p13, %p6355_p5  ;;  %s6145_s27 = scalar_lea.vmem %s6144_s3, 32 }
0x1f85   : > { %p6146_p2 = scmp.lt.s32.totalorder %s4679_s7, %s6144_s3  ;;  %p6147_p3 = scmp.lt.s32.totalorder %s6145_s27, %s6139_s21 }
0x1f86   : > { %p6142_p1 = pneg %p6141_p0 }
0x1f87   : > { %p6148_p4 = por %p6147_p3, %p6146_p2 }
0x1f89   : > { %p6149_p7 = pnand %p6148_p4, %p6142_p1 }
0x2029   : > { %v4531_v20 = vpop.f32.mrf.mxu0 }
0x202b   : > { %v5887_v52 = vpop.f32.mrf.mxu0 }
0x2032   : > { %v4655_v53 = vpop.f32.mrf.mxu1 }
0x2033   : > { %v4656_v55 = vadd.f32 %v4655_v53, %v4588_v39 }
0x2034   : > { %v5922_v56 = vpop.f32.mrf.mxu1 }
0x2035   : > { %4659 = vst [vmem:[%s625_s24] sm:$0x1] %v4656_v55 }
0x2036   : > { %6152 = shalt.err (!%p6149_p7)
}
0x2037   : > { %s6153_s2 = scalar_lea.hbm %s7994_s25, 16  ;;  %s6157_s1 = scalar_lea.hbm %s8049_s19, 32 }
0x2038   : > { %p6154_p8 = scmp.ne.s32.totalorder %s7994_s25, %s6153_s2  ;;  %p6158_p11 = scmp.lt.s32.totalorder %s7994_s25, %s8049_s19 }
0x2039   : > { %p6159_p12 = scmp.lt.s32.totalorder %s6157_s1, %s6153_s2 }
0x203a   : > { %p6155_p9 = pnand %p6154_p8, %p6355_p5 }
0x203b   : > { %p6160_p13 = por %p6159_p12, %p6158_p11 }
0x203c   : > { %p6156_p10 = pneg %p6155_p9 }
0x203e   : > { %p6161_p0 = pnand %p6160_p13, %p6156_p10 }
0x2040   : > { %6164 = shalt.err (!%p6161_p0)
}
0x2041   : > { %5930 = dma.vmem_to_hbm [thread:$0]  (%p6355_p5), %s4679_s7, 16, %s7994_s25, %s4662_s5  }
0x2042 PF: > { %s8100_s29 = sld [smem:[#allocation10_spill]] }
0x2043   : > { %s8101_s23 = sld [smem:[#allocation8_spill]] }
0x2048   : > { %p5941_p1 = scmp.ge.s32.totalorder %s8100_s29, 2 }
0x2049   : > { %s4703_s0 = sand.u32 1, %s8101_s23  }
0x204a   : > { %p5935_p2 = pnand %p5941_p1, %p6359_p6  ;;  %s4704_s3 = scalar_lea.sflag [#allocation3], %s4703_s0 }
0x204c   : > { %p5936_p3 = pneg %p5935_p2 }
0x204e   : > { %6182 = dma.done.wait (%p5936_p3), %s4704_s3, 16  }
0x204f   : > { %6184 = vsyncadd (%p5936_p3), %s4704_s3, 4294967280  ;;  %s4712_s27 = scalar_lea.sflag [#allocation5], %s4703_s0 }
0x2050   : > { %6186 = dma.done.wait (%p5936_p3), %s4712_s27, 16  }
0x2051   : > { %6188 = vsyncadd (%p5936_p3), %s4712_s27, 4294967280  ;;  %s8103_s24 = sld [smem:[#allocation11_spill]]  ;;  %s8106_s1 = smov %s6195_s22 }
0x2052   : > { %s8104_s4 = sld [smem:[#allocation9_spill]] }
0x2053   : > { %s8105_s23 = sld [smem:[#allocation12_spill]] }
0x2057   : > { %p34_p5 = scmp.ge.s32.totalorder %s8103_s24, 4  }
0x2058   : > { %s8107_s22 = smov %s8104_s4 }
0x2059   :  { %36 = sbr.rel (!%p34_p5) target bundleno = 15 (0xf), region = 160 }
0x205e   :  { %4716 = vsyncpa [#allocation3], 1 }
0x205f   :  { %4718 = vsyncpa [#allocation3 + $0x1], 1 }
0x2060   :  { %4719 = vsyncpa [#allocation5], 1 }
0x2061   :  { %4721 = vsyncpa [#allocation5 + $0x1], 1 }

</bundles_post_ra>
